<compile_context>
chip_gen: v7x
topology: tpu7x:2x2x1
jax: 0.10.0
libtpu: 0.0.40
codegen_flags: <defaults>
</compile_context>

<pallas_src>
import functools

import jax
import jax.numpy as jnp
from jax import lax
from jax.experimental import pallas as pl
from jax.experimental.pallas import tpu as pltpu


# ----------------------------------------------------------------------------
# Fused decoder kernel (one grid step == one batch element, everything in VMEM)
# ----------------------------------------------------------------------------
def _decoder_kernel(x_ref, enc_ref, tbias_ref, ebias_ref,
                    wqkv_ref, bqkv_ref, wo_ref, bo_ref,
                    cwq_ref, cbq_ref, cwkv_ref, cbkv_ref, cwo_ref, cbo_ref,
                    w1_ref, b1_ref, w2_ref, b2_ref,
                    lnw_ref, lnb_ref,
                    o_ref, *, num_heads, eps):
    E = x_ref.shape[2]
    D = E // num_heads
    scale = D ** (-0.5)
    L = wqkv_ref.shape[0]

    x = x_ref[0].astype(jnp.float32)       # (T, E) activations, resident in vregs/VMEM
    enc = enc_ref[0].astype(jnp.float32)   # (S, E)
    tbias = tbias_ref[0]                   # (T, T) additive mask bias (0 / -1e9)
    ebias = ebias_ref[0]                   # (1, S) additive mask bias (0 / -1e9)

    def layer_norm(y, l, idx):
        # residual already added by caller; biased variance like torch LayerNorm
        w = lnw_ref[3 * l + idx]           # (1, E)
        b = lnb_ref[3 * l + idx]           # (1, E)
        mean = jnp.mean(y, axis=-1, keepdims=True)
        var = jnp.mean((y - mean) ** 2, axis=-1, keepdims=True)
        return (y - mean) * lax.rsqrt(var + eps) * w + b

    def attention(q, k, v, bias, wo):
        # q: (Tq, E), k/v: (Tk, E), bias broadcastable to (Tq, Tk), wo: (E, E).
        # Output projection is folded in per head: sum_h (softmax(qh kh^T) vh) @ wo[hD:(h+1)D].
        acc = None
        for h in range(num_heads):
            sl = slice(h * D, (h + 1) * D)
            qh, kh, vh = q[:, sl], k[:, sl], v[:, sl]
            s = lax.dot_general(qh, kh, (((1,), (1,)), ((), ())),
                                preferred_element_type=jnp.float32) * scale
            s = s + bias                               # masked positions -> ~-1e9
            s = s - jnp.max(s, axis=-1, keepdims=True)
            p = jnp.exp(s)
            denom = jnp.sum(p, axis=-1, keepdims=True)
            r = pl.reciprocal(denom, approx=True)      # EUP path
            r = r * (2.0 - denom * r)                  # one NR step -> f32 accuracy
            p = p * r
            oh = jnp.dot(p, vh, preferred_element_type=jnp.float32)          # (Tq, D)
            contrib = jnp.dot(oh, wo[sl, :], preferred_element_type=jnp.float32)
            acc = contrib if acc is None else acc + contrib
        return acc                                     # (Tq, E)

    for l in range(L):
        # ---- self attention (fused QKV projection, N = 3E) ----
        qkv = jnp.dot(x, wqkv_ref[l], preferred_element_type=jnp.float32) + bqkv_ref[l]
        q, k, v = qkv[:, :E], qkv[:, E:2 * E], qkv[:, 2 * E:]
        y = attention(q, k, v, tbias, wo_ref[l]) + bo_ref[l]
        x = layer_norm(x + y, l, 0)                    # dropout: eval-mode no-op

        # ---- cross attention (K/V from encoder, fused KV projection) ----
        qc = jnp.dot(x, cwq_ref[l], preferred_element_type=jnp.float32) + cbq_ref[l]
        kv = jnp.dot(enc, cwkv_ref[l], preferred_element_type=jnp.float32) + cbkv_ref[l]
        kc, vc = kv[:, :E], kv[:, E:]
        y = attention(qc, kc, vc, ebias, cwo_ref[l]) + cbo_ref[l]
        x = layer_norm(x + y, l, 1)

        # ---- feed-forward (bias+ReLU fused) ----
        h1 = jnp.maximum(
            jnp.dot(x, w1_ref[l], preferred_element_type=jnp.float32) + b1_ref[l], 0.0)
        y = jnp.dot(h1, w2_ref[l], preferred_element_type=jnp.float32) + b2_ref[l]
        x = layer_norm(x + y, l, 2)

    o_ref[0] = x.astype(o_ref.dtype)


# ----------------------------------------------------------------------------
# One-time parameter packing (pre-transposed to (in, out), stacked over layers)
# ----------------------------------------------------------------------------
def pack_params(params, E):
    layers = params["layers"]
    st = lambda f: jnp.stack([f(lp) for lp in layers])
    return dict(
        wqkv=st(lambda lp: lp["att"]["w"][:3 * E].T),          # (L, E, 3E)
        bqkv=st(lambda lp: lp["att"]["b"][:3 * E].reshape(1, -1)),
        wo=st(lambda lp: lp["att"]["w"][3 * E:].T),            # (L, E, E)
        bo=st(lambda lp: lp["att"]["b"][3 * E:].reshape(1, -1)),
        cwq=st(lambda lp: lp["cross_att"]["w"][:E].T),         # (L, E, E)
        cbq=st(lambda lp: lp["cross_att"]["b"][:E].reshape(1, -1)),
        cwkv=st(lambda lp: lp["cross_att"]["w"][E:3 * E].T),   # (L, E, 2E)
        cbkv=st(lambda lp: lp["cross_att"]["b"][E:3 * E].reshape(1, -1)),
        cwo=st(lambda lp: lp["cross_att"]["w"][3 * E:].T),     # (L, E, E)
        cbo=st(lambda lp: lp["cross_att"]["b"][3 * E:].reshape(1, -1)),
        w1=st(lambda lp: lp["ff"]["w_in"].T),                  # (L, E, FF)
        b1=st(lambda lp: lp["ff"]["b_in"].reshape(1, -1)),
        w2=st(lambda lp: lp["ff"]["w_out"].T),                 # (L, FF, E)
        b2=st(lambda lp: lp["ff"]["b_out"].reshape(1, -1)),
        lnw=jnp.stack([lp[k]["w"].reshape(1, -1) for lp in layers
                       for k in ("att_scale", "cross_scale", "ff_scale")]),  # (3L,1,E)
        lnb=jnp.stack([lp[k]["b"].reshape(1, -1) for lp in layers
                       for k in ("att_scale", "cross_scale", "ff_scale")]),
    )


# ----------------------------------------------------------------------------
# Forward wrapper: one pallas_call for the whole decoder
# ----------------------------------------------------------------------------
def decoder_forward(packed, tgt_inputs, tgt_mask, encoder_out, encoder_mask,
                    num_heads, eps=1e-5):
    B, T, E = tgt_inputs.shape
    S = encoder_out.shape[1]
    L = packed["wqkv"].shape[0]
    FF = packed["w1"].shape[2]

    # masks -> tiny additive biases (masked_fill(-1e9) semantics)
    tbias = jnp.where(jnp.broadcast_to(tgt_mask, (B, 1, T, T))[:, 0],
                      jnp.float32(-1e9), jnp.float32(0.0))          # (B, T, T)
    ebias = jnp.where(jnp.broadcast_to(encoder_mask, (B, 1, 1, S))[:, 0],
                      jnp.float32(-1e9), jnp.float32(0.0))          # (B, 1, S)

    full3 = lambda b: (0, 0, 0)
    batched = lambda shape: pl.BlockSpec(shape, lambda b: (b, 0, 0))

    in_specs = [
        batched((1, T, E)),                       # x
        batched((1, S, E)),                       # encoder_out
        batched((1, T, T)),                       # tgt mask bias
        batched((1, 1, S)),                       # encoder mask bias
        pl.BlockSpec((L, E, 3 * E), full3),       # wqkv
        pl.BlockSpec((L, 1, 3 * E), full3),       # bqkv
        pl.BlockSpec((L, E, E), full3),           # wo
        pl.BlockSpec((L, 1, E), full3),           # bo
        pl.BlockSpec((L, E, E), full3),           # cwq
        pl.BlockSpec((L, 1, E), full3),           # cbq
        pl.BlockSpec((L, E, 2 * E), full3),       # cwkv
        pl.BlockSpec((L, 1, 2 * E), full3),       # cbkv
        pl.BlockSpec((L, E, E), full3),           # cwo
        pl.BlockSpec((L, 1, E), full3),           # cbo
        pl.BlockSpec((L, E, FF), full3),          # w1
        pl.BlockSpec((L, 1, FF), full3),          # b1
        pl.BlockSpec((L, FF, E), full3),          # w2
        pl.BlockSpec((L, 1, E), full3),           # b2
        pl.BlockSpec((3 * L, 1, E), full3),       # ln weights
        pl.BlockSpec((3 * L, 1, E), full3),       # ln biases
    ]

    return pl.pallas_call(
        functools.partial(_decoder_kernel, num_heads=num_heads, eps=eps),
        out_shape=jax.ShapeDtypeStruct((B, T, E), tgt_inputs.dtype),
        grid=(B,),
        in_specs=in_specs,
        out_specs=pl.BlockSpec((1, T, E), lambda b: (b, 0, 0)),
        compiler_params=pltpu.CompilerParams(
            dimension_semantics=("parallel",)),   # v7x: one batch element per TC
    )(tgt_inputs, encoder_out, tbias, ebias,
      packed["wqkv"], packed["bqkv"], packed["wo"], packed["bo"],
      packed["cwq"], packed["cbq"], packed["cwkv"], packed["cbkv"],
      packed["cwo"], packed["cbo"],
      packed["w1"], packed["b1"], packed["w2"], packed["b2"],
      packed["lnw"], packed["lnb"])


# ----------------------------------------------------------------------------
# Pure-JAX reference (mirrors the PyTorch forward) for a correctness check
# ----------------------------------------------------------------------------
def _ref_mha(q_in, k_in, v_in, mask, params, num_heads):
    W, bvec = params["w"], params["b"]
    E = W.shape[1]
    D = E // num_heads
    q = q_in @ W[:E].T + bvec[:E]
    k = k_in @ W[E:2 * E].T + bvec[E:2 * E]
    v = v_in @ W[2 * E:3 * E].T + bvec[2 * E:3 * E]
    B, T, _ = q.shape
    sh = lambda t: t.reshape(t.shape[0], t.shape[1], num_heads, D).transpose(0, 2, 1, 3)
    qh, kh, vh = sh(q), sh(k), sh(v)
    s = jnp.einsum("bhtd,bhsd->bhts", qh, kh) * (D ** -0.5)
    s = jnp.where(jnp.broadcast_to(mask, s.shape), -1e9, s)
    p = jax.nn.softmax(s, axis=-1)
    o = jnp.einsum("bhts,bhsd->bhtd", p, vh).transpose(0, 2, 1, 3).reshape(B, T, E)
    return o @ W[3 * E:].T + bvec[3 * E:]


def _ref_ln(x, w, b, eps=1e-5):
    m = x.mean(-1, keepdims=True)
    v = ((x - m) ** 2).mean(-1, keepdims=True)
    return (x - m) / jnp.sqrt(v + eps) * w + b


def decoder_reference(params, tgt_inputs, tgt_mask, encoder_out, encoder_mask, num_heads):
    x = tgt_inputs
    for lp in params["layers"]:
        x = _ref_ln(x + _ref_mha(x, x, x, tgt_mask, lp["att"], num_heads),
                    lp["att_scale"]["w"], lp["att_scale"]["b"])
        x = _ref_ln(x + _ref_mha(x, encoder_out, encoder_out, encoder_mask,
                                 lp["cross_att"], num_heads),
                    lp["cross_scale"]["w"], lp["cross_scale"]["b"])
        h = jax.nn.relu(x @ lp["ff"]["w_in"].T + lp["ff"]["b_in"])
        x = _ref_ln(x + (h @ lp["ff"]["w_out"].T + lp["ff"]["b_out"]),
                    lp["ff_scale"]["w"], lp["ff_scale"]["b"])
    return x


# ----------------------------------------------------------------------------
# Parameter init (matches shapes / init scheme of the PyTorch module)
# ----------------------------------------------------------------------------
def init_params(key, num_layers, E, ff_dim):
    std_att = (2.0 / (5 * E)) ** 0.5
    std_ff = (2.0 / (ff_dim + E)) ** 0.5
    layers = []
    for _ in range(num_layers):
        key, k1, k2, k3, k4 = jax.random.split(key, 5)
        ln = lambda: {"w": jnp.ones((E,), jnp.float32), "b": jnp.zeros((E,), jnp.float32)}
        layers.append({
            "att": {"w": std_att * jax.random.normal(k1, (4 * E, E), jnp.float32),
                    "b": jnp.zeros((4 * E,), jnp.float32)},
            "cross_att": {"w": std_att * jax.random.normal(k2, (4 * E, E), jnp.float32),
                          "b": jnp.zeros((4 * E,), jnp.float32)},
            "ff": {"w_in": std_ff * jax.random.normal(k3, (ff_dim, E), jnp.float32),
                   "b_in": jnp.zeros((ff_dim,), jnp.float32),
                   "w_out": std_ff * jax.random.normal(k4, (E, ff_dim), jnp.float32),
                   "b_out": jnp.zeros((E,), jnp.float32)},
            "att_scale": ln(), "cross_scale": ln(), "ff_scale": ln(),
        })
    return {"layers": layers}


# ----------------------------------------------------------------------------
if __name__ == "__main__":
    B, T, S, E, H, FF, L = 2, 8, 8, 32, 4, 64, 2

    key = jax.random.PRNGKey(0)
    kp, kt, ke = jax.random.split(key, 3)
    params = init_params(kp, L, E, FF)
    packed = pack_params(params, E)   # one-time packing: transposes hoisted out of forward

    tgt_inputs = jax.random.normal(kt, (B, T, E), jnp.float32)
    encoder_out = jax.random.normal(ke, (B, S, E), jnp.float32)

    # boolean masks: True == masked position (masked_fill semantics)
    tgt_mask = jnp.triu(jnp.ones((T, T), dtype=bool), k=1).reshape(1, 1, T, T)
    encoder_mask = jnp.zeros((B, 1, 1, S), dtype=bool).at[:, :, :, S - 2:].set(True)

    out = decoder_forward(packed, tgt_inputs, tgt_mask, encoder_out, encoder_mask, H)
    out = jax.block_until_ready(out)

    ref = decoder_reference(params, tgt_inputs, tgt_mask, encoder_out, encoder_mask, H)
    assert out.shape == (B, T, E)
    assert jnp.allclose(out, ref, rtol=1e-4, atol=1e-4), "mismatch vs reference"

    print("KERNEL_OK")
</pallas_src>

<mosaic_0001>
module attributes {stable_mosaic.version = 11 : i64} {
  func.func @_decoder_kernel(%arg0: i32, %arg1: memref<1x8x32xf32, #tpu.memory_space<vmem>>, %arg2: memref<1x8x32xf32, #tpu.memory_space<vmem>>, %arg3: memref<1x8x8xf32, #tpu.memory_space<vmem>>, %arg4: memref<1x1x8xf32, #tpu.memory_space<vmem>>, %arg5: memref<2x32x96xf32, #tpu.memory_space<vmem>>, %arg6: memref<2x1x96xf32, #tpu.memory_space<vmem>>, %arg7: memref<2x32x32xf32, #tpu.memory_space<vmem>>, %arg8: memref<2x1x32xf32, #tpu.memory_space<vmem>>, %arg9: memref<2x32x32xf32, #tpu.memory_space<vmem>>, %arg10: memref<2x1x32xf32, #tpu.memory_space<vmem>>, %arg11: memref<2x32x64xf32, #tpu.memory_space<vmem>>, %arg12: memref<2x1x64xf32, #tpu.memory_space<vmem>>, %arg13: memref<2x32x32xf32, #tpu.memory_space<vmem>>, %arg14: memref<2x1x32xf32, #tpu.memory_space<vmem>>, %arg15: memref<2x32x64xf32, #tpu.memory_space<vmem>>, %arg16: memref<2x1x64xf32, #tpu.memory_space<vmem>>, %arg17: memref<2x64x32xf32, #tpu.memory_space<vmem>>, %arg18: memref<2x1x32xf32, #tpu.memory_space<vmem>>, %arg19: memref<6x1x32xf32, #tpu.memory_space<vmem>>, %arg20: memref<6x1x32xf32, #tpu.memory_space<vmem>>, %arg21: memref<1x8x32xf32, #tpu.memory_space<vmem>>) attributes {dimension_semantics = [#tpu.dimension_semantics<parallel>], iteration_bounds = array<i64: 2>, scalar_prefetch = 0 : i64, scratch_operands = 0 : i64, tpu.core_type = #tpu.core_type<tc>, window_params = [{transform_indices = @transform_0, window_bounds = array<i64: 1, 8, 32>}, {transform_indices = @transform_1, window_bounds = array<i64: 1, 8, 32>}, {transform_indices = @transform_2, window_bounds = array<i64: 1, 8, 8>}, {transform_indices = @transform_3, window_bounds = array<i64: 1, 1, 8>}, {pipeline_mode = #tpu.pipeline_mode<synchronous>, transform_indices = @transform_4, window_bounds = array<i64: 2, 32, 96>}, {pipeline_mode = #tpu.pipeline_mode<synchronous>, transform_indices = @transform_5, window_bounds = array<i64: 2, 1, 96>}, {pipeline_mode = #tpu.pipeline_mode<synchronous>, transform_indices = @transform_6, window_bounds = array<i64: 2, 32, 32>}, {pipeline_mode = #tpu.pipeline_mode<synchronous>, transform_indices = @transform_7, window_bounds = array<i64: 2, 1, 32>}, {pipeline_mode = #tpu.pipeline_mode<synchronous>, transform_indices = @transform_8, window_bounds = array<i64: 2, 32, 32>}, {pipeline_mode = #tpu.pipeline_mode<synchronous>, transform_indices = @transform_9, window_bounds = array<i64: 2, 1, 32>}, {pipeline_mode = #tpu.pipeline_mode<synchronous>, transform_indices = @transform_10, window_bounds = array<i64: 2, 32, 64>}, {pipeline_mode = #tpu.pipeline_mode<synchronous>, transform_indices = @transform_11, window_bounds = array<i64: 2, 1, 64>}, {pipeline_mode = #tpu.pipeline_mode<synchronous>, transform_indices = @transform_12, window_bounds = array<i64: 2, 32, 32>}, {pipeline_mode = #tpu.pipeline_mode<synchronous>, transform_indices = @transform_13, window_bounds = array<i64: 2, 1, 32>}, {pipeline_mode = #tpu.pipeline_mode<synchronous>, transform_indices = @transform_14, window_bounds = array<i64: 2, 32, 64>}, {pipeline_mode = #tpu.pipeline_mode<synchronous>, transform_indices = @transform_15, window_bounds = array<i64: 2, 1, 64>}, {pipeline_mode = #tpu.pipeline_mode<synchronous>, transform_indices = @transform_16, window_bounds = array<i64: 2, 64, 32>}, {pipeline_mode = #tpu.pipeline_mode<synchronous>, transform_indices = @transform_17, window_bounds = array<i64: 2, 1, 32>}, {pipeline_mode = #tpu.pipeline_mode<synchronous>, transform_indices = @transform_18, window_bounds = array<i64: 6, 1, 32>}, {pipeline_mode = #tpu.pipeline_mode<synchronous>, transform_indices = @transform_19, window_bounds = array<i64: 6, 1, 32>}, {transform_indices = @transform_20, window_bounds = array<i64: 1, 8, 32>}]} {
    %c0 = arith.constant 0 : index
    %c0_0 = arith.constant 0 : index
    %c0_1 = arith.constant 0 : index
    %0 = vector.load %arg1[%c0, %c0_0, %c0_1] : memref<1x8x32xf32, #tpu.memory_space<vmem>>, vector<1x8x32xf32>
    %1 = vector.shape_cast %0 : vector<1x8x32xf32> to vector<8x32xf32>
    %c0_2 = arith.constant 0 : index
    %c0_3 = arith.constant 0 : index
    %c0_4 = arith.constant 0 : index
    %2 = vector.load %arg2[%c0_2, %c0_3, %c0_4] : memref<1x8x32xf32, #tpu.memory_space<vmem>>, vector<1x8x32xf32>
    %3 = vector.shape_cast %2 : vector<1x8x32xf32> to vector<8x32xf32>
    %c0_5 = arith.constant 0 : index
    %c0_6 = arith.constant 0 : index
    %c0_7 = arith.constant 0 : index
    %4 = vector.load %arg3[%c0_5, %c0_6, %c0_7] : memref<1x8x8xf32, #tpu.memory_space<vmem>>, vector<1x8x8xf32>
    %5 = vector.shape_cast %4 : vector<1x8x8xf32> to vector<8x8xf32>
    %c0_8 = arith.constant 0 : index
    %c0_9 = arith.constant 0 : index
    %c0_10 = arith.constant 0 : index
    %6 = vector.load %arg4[%c0_8, %c0_9, %c0_10] : memref<1x1x8xf32, #tpu.memory_space<vmem>>, vector<1x1x8xf32>
    %7 = vector.shape_cast %6 : vector<1x1x8xf32> to vector<1x8xf32>
    %c0_11 = arith.constant 0 : index
    %c0_12 = arith.constant 0 : index
    %c0_13 = arith.constant 0 : index
    %8 = vector.load %arg5[%c0_11, %c0_12, %c0_13] : memref<2x32x96xf32, #tpu.memory_space<vmem>>, vector<1x32x96xf32>
    %9 = vector.shape_cast %8 : vector<1x32x96xf32> to vector<32x96xf32>
    %cst = arith.constant dense<0.000000e+00> : vector<8x96xf32>
    %10 = tpu.matmul %1, %9, %cst {dimension_numbers = #tpu.dot_dimension_numbers<[1], [0], [0], [1], [0, 0, 1, 1], [], []>} : vector<8x32xf32>, vector<32x96xf32>, vector<8x96xf32> -> vector<8x96xf32>
    %c0_14 = arith.constant 0 : index
    %c0_15 = arith.constant 0 : index
    %c0_16 = arith.constant 0 : index
    %11 = vector.load %arg6[%c0_14, %c0_15, %c0_16] : memref<2x1x96xf32, #tpu.memory_space<vmem>>, vector<1x1x96xf32>
    %12 = vector.shape_cast %11 : vector<1x1x96xf32> to vector<1x96xf32>
    %13 = vector.broadcast %12 : vector<1x96xf32> to vector<8x96xf32>
    %14 = arith.addf %10, %13 : vector<8x96xf32>
    %15 = vector.extract_strided_slice %14 {offsets = [0, 0], sizes = [8, 32], strides = [1, 1]} : vector<8x96xf32> to vector<8x32xf32>
    %16 = vector.extract_strided_slice %14 {offsets = [0, 32], sizes = [8, 32], strides = [1, 1]} : vector<8x96xf32> to vector<8x32xf32>
    %17 = vector.extract_strided_slice %14 {offsets = [0, 64], sizes = [8, 32], strides = [1, 1]} : vector<8x96xf32> to vector<8x32xf32>
    %c0_17 = arith.constant 0 : index
    %c0_18 = arith.constant 0 : index
    %c0_19 = arith.constant 0 : index
    %18 = vector.load %arg7[%c0_17, %c0_18, %c0_19] : memref<2x32x32xf32, #tpu.memory_space<vmem>>, vector<1x32x32xf32>
    %19 = vector.shape_cast %18 : vector<1x32x32xf32> to vector<32x32xf32>
    %20 = vector.extract_strided_slice %15 {offsets = [0, 0], sizes = [8, 8], strides = [1, 1]} : vector<8x32xf32> to vector<8x8xf32>
    %21 = vector.extract_strided_slice %16 {offsets = [0, 0], sizes = [8, 8], strides = [1, 1]} : vector<8x32xf32> to vector<8x8xf32>
    %22 = vector.extract_strided_slice %17 {offsets = [0, 0], sizes = [8, 8], strides = [1, 1]} : vector<8x32xf32> to vector<8x8xf32>
    %cst_20 = arith.constant dense<0.000000e+00> : vector<8x8xf32>
    %23 = tpu.matmul %20, %21, %cst_20 {dimension_numbers = #tpu.dot_dimension_numbers<[1], [1], [0], [0], [0, 0, 1, 0], [], []>} : vector<8x8xf32>, vector<8x8xf32>, vector<8x8xf32> -> vector<8x8xf32>
    %cst_21 = arith.constant 0.353553385 : f32
    %24 = vector.broadcast %cst_21 : f32 to vector<8x8xf32>
    %25 = arith.mulf %23, %24 : vector<8x8xf32>
    %26 = arith.addf %25, %5 : vector<8x8xf32>
    %cst_22 = arith.constant dense<0xFF800000> : vector<8xf32>
    %27 = vector.multi_reduction <maximumf>, %26, %cst_22 [1] : vector<8x8xf32> to vector<8xf32>
    %28 = vector.shape_cast %27 : vector<8xf32> to vector<8x1xf32>
    %29 = vector.broadcast %28 : vector<8x1xf32> to vector<8x8xf32>
    %30 = arith.subf %26, %29 : vector<8x8xf32>
    %31 = math.exp %30 : vector<8x8xf32>
    %cst_23 = arith.constant dense<0.000000e+00> : vector<8xf32>
    %32 = vector.multi_reduction <add>, %31, %cst_23 [1] : vector<8x8xf32> to vector<8xf32>
    %33 = vector.shape_cast %32 : vector<8xf32> to vector<8x1xf32>
    %34 = tpu.reciprocal %33 {approx = true} : vector<8x1xf32> -> vector<8x1xf32>
    %35 = arith.mulf %33, %34 : vector<8x1xf32>
    %cst_24 = arith.constant 2.000000e+00 : f32
    %36 = vector.broadcast %cst_24 : f32 to vector<8x1xf32>
    %37 = arith.subf %36, %35 : vector<8x1xf32>
    %38 = arith.mulf %34, %37 : vector<8x1xf32>
    %39 = vector.broadcast %38 : vector<8x1xf32> to vector<8x8xf32>
    %40 = arith.mulf %31, %39 : vector<8x8xf32>
    %cst_25 = arith.constant dense<0.000000e+00> : vector<8x8xf32>
    %41 = tpu.matmul %40, %22, %cst_25 {dimension_numbers = #tpu.dot_dimension_numbers<[1], [0], [0], [1], [0, 0, 1, 1], [], []>} : vector<8x8xf32>, vector<8x8xf32>, vector<8x8xf32> -> vector<8x8xf32>
    %42 = vector.extract_strided_slice %19 {offsets = [0, 0], sizes = [8, 32], strides = [1, 1]} : vector<32x32xf32> to vector<8x32xf32>
    %cst_26 = arith.constant dense<0.000000e+00> : vector<8x32xf32>
    %43 = tpu.matmul %41, %42, %cst_26 {dimension_numbers = #tpu.dot_dimension_numbers<[1], [0], [0], [1], [0, 0, 1, 1], [], []>} : vector<8x8xf32>, vector<8x32xf32>, vector<8x32xf32> -> vector<8x32xf32>
    %44 = vector.extract_strided_slice %15 {offsets = [0, 8], sizes = [8, 8], strides = [1, 1]} : vector<8x32xf32> to vector<8x8xf32>
    %45 = vector.extract_strided_slice %16 {offsets = [0, 8], sizes = [8, 8], strides = [1, 1]} : vector<8x32xf32> to vector<8x8xf32>
    %46 = vector.extract_strided_slice %17 {offsets = [0, 8], sizes = [8, 8], strides = [1, 1]} : vector<8x32xf32> to vector<8x8xf32>
    %cst_27 = arith.constant dense<0.000000e+00> : vector<8x8xf32>
    %47 = tpu.matmul %44, %45, %cst_27 {dimension_numbers = #tpu.dot_dimension_numbers<[1], [1], [0], [0], [0, 0, 1, 0], [], []>} : vector<8x8xf32>, vector<8x8xf32>, vector<8x8xf32> -> vector<8x8xf32>
    %cst_28 = arith.constant 0.353553385 : f32
    %48 = vector.broadcast %cst_28 : f32 to vector<8x8xf32>
    %49 = arith.mulf %47, %48 : vector<8x8xf32>
    %50 = arith.addf %49, %5 : vector<8x8xf32>
    %cst_29 = arith.constant dense<0xFF800000> : vector<8xf32>
    %51 = vector.multi_reduction <maximumf>, %50, %cst_29 [1] : vector<8x8xf32> to vector<8xf32>
    %52 = vector.shape_cast %51 : vector<8xf32> to vector<8x1xf32>
    %53 = vector.broadcast %52 : vector<8x1xf32> to vector<8x8xf32>
    %54 = arith.subf %50, %53 : vector<8x8xf32>
    %55 = math.exp %54 : vector<8x8xf32>
    %cst_30 = arith.constant dense<0.000000e+00> : vector<8xf32>
    %56 = vector.multi_reduction <add>, %55, %cst_30 [1] : vector<8x8xf32> to vector<8xf32>
    %57 = vector.shape_cast %56 : vector<8xf32> to vector<8x1xf32>
    %58 = tpu.reciprocal %57 {approx = true} : vector<8x1xf32> -> vector<8x1xf32>
    %59 = arith.mulf %57, %58 : vector<8x1xf32>
    %cst_31 = arith.constant 2.000000e+00 : f32
    %60 = vector.broadcast %cst_31 : f32 to vector<8x1xf32>
    %61 = arith.subf %60, %59 : vector<8x1xf32>
    %62 = arith.mulf %58, %61 : vector<8x1xf32>
    %63 = vector.broadcast %62 : vector<8x1xf32> to vector<8x8xf32>
    %64 = arith.mulf %55, %63 : vector<8x8xf32>
    %cst_32 = arith.constant dense<0.000000e+00> : vector<8x8xf32>
    %65 = tpu.matmul %64, %46, %cst_32 {dimension_numbers = #tpu.dot_dimension_numbers<[1], [0], [0], [1], [0, 0, 1, 1], [], []>} : vector<8x8xf32>, vector<8x8xf32>, vector<8x8xf32> -> vector<8x8xf32>
    %66 = vector.extract_strided_slice %19 {offsets = [8, 0], sizes = [8, 32], strides = [1, 1]} : vector<32x32xf32> to vector<8x32xf32>
    %cst_33 = arith.constant dense<0.000000e+00> : vector<8x32xf32>
    %67 = tpu.matmul %65, %66, %cst_33 {dimension_numbers = #tpu.dot_dimension_numbers<[1], [0], [0], [1], [0, 0, 1, 1], [], []>} : vector<8x8xf32>, vector<8x32xf32>, vector<8x32xf32> -> vector<8x32xf32>
    %68 = arith.addf %43, %67 : vector<8x32xf32>
    %69 = vector.extract_strided_slice %15 {offsets = [0, 16], sizes = [8, 8], strides = [1, 1]} : vector<8x32xf32> to vector<8x8xf32>
    %70 = vector.extract_strided_slice %16 {offsets = [0, 16], sizes = [8, 8], strides = [1, 1]} : vector<8x32xf32> to vector<8x8xf32>
    %71 = vector.extract_strided_slice %17 {offsets = [0, 16], sizes = [8, 8], strides = [1, 1]} : vector<8x32xf32> to vector<8x8xf32>
    %cst_34 = arith.constant dense<0.000000e+00> : vector<8x8xf32>
    %72 = tpu.matmul %69, %70, %cst_34 {dimension_numbers = #tpu.dot_dimension_numbers<[1], [1], [0], [0], [0, 0, 1, 0], [], []>} : vector<8x8xf32>, vector<8x8xf32>, vector<8x8xf32> -> vector<8x8xf32>
    %cst_35 = arith.constant 0.353553385 : f32
    %73 = vector.broadcast %cst_35 : f32 to vector<8x8xf32>
    %74 = arith.mulf %72, %73 : vector<8x8xf32>
    %75 = arith.addf %74, %5 : vector<8x8xf32>
    %cst_36 = arith.constant dense<0xFF800000> : vector<8xf32>
    %76 = vector.multi_reduction <maximumf>, %75, %cst_36 [1] : vector<8x8xf32> to vector<8xf32>
    %77 = vector.shape_cast %76 : vector<8xf32> to vector<8x1xf32>
    %78 = vector.broadcast %77 : vector<8x1xf32> to vector<8x8xf32>
    %79 = arith.subf %75, %78 : vector<8x8xf32>
    %80 = math.exp %79 : vector<8x8xf32>
    %cst_37 = arith.constant dense<0.000000e+00> : vector<8xf32>
    %81 = vector.multi_reduction <add>, %80, %cst_37 [1] : vector<8x8xf32> to vector<8xf32>
    %82 = vector.shape_cast %81 : vector<8xf32> to vector<8x1xf32>
    %83 = tpu.reciprocal %82 {approx = true} : vector<8x1xf32> -> vector<8x1xf32>
    %84 = arith.mulf %82, %83 : vector<8x1xf32>
    %cst_38 = arith.constant 2.000000e+00 : f32
    %85 = vector.broadcast %cst_38 : f32 to vector<8x1xf32>
    %86 = arith.subf %85, %84 : vector<8x1xf32>
    %87 = arith.mulf %83, %86 : vector<8x1xf32>
    %88 = vector.broadcast %87 : vector<8x1xf32> to vector<8x8xf32>
    %89 = arith.mulf %80, %88 : vector<8x8xf32>
    %cst_39 = arith.constant dense<0.000000e+00> : vector<8x8xf32>
    %90 = tpu.matmul %89, %71, %cst_39 {dimension_numbers = #tpu.dot_dimension_numbers<[1], [0], [0], [1], [0, 0, 1, 1], [], []>} : vector<8x8xf32>, vector<8x8xf32>, vector<8x8xf32> -> vector<8x8xf32>
    %91 = vector.extract_strided_slice %19 {offsets = [16, 0], sizes = [8, 32], strides = [1, 1]} : vector<32x32xf32> to vector<8x32xf32>
    %cst_40 = arith.constant dense<0.000000e+00> : vector<8x32xf32>
    %92 = tpu.matmul %90, %91, %cst_40 {dimension_numbers = #tpu.dot_dimension_numbers<[1], [0], [0], [1], [0, 0, 1, 1], [], []>} : vector<8x8xf32>, vector<8x32xf32>, vector<8x32xf32> -> vector<8x32xf32>
    %93 = arith.addf %68, %92 : vector<8x32xf32>
    %94 = vector.extract_strided_slice %15 {offsets = [0, 24], sizes = [8, 8], strides = [1, 1]} : vector<8x32xf32> to vector<8x8xf32>
    %95 = vector.extract_strided_slice %16 {offsets = [0, 24], sizes = [8, 8], strides = [1, 1]} : vector<8x32xf32> to vector<8x8xf32>
    %96 = vector.extract_strided_slice %17 {offsets = [0, 24], sizes = [8, 8], strides = [1, 1]} : vector<8x32xf32> to vector<8x8xf32>
    %cst_41 = arith.constant dense<0.000000e+00> : vector<8x8xf32>
    %97 = tpu.matmul %94, %95, %cst_41 {dimension_numbers = #tpu.dot_dimension_numbers<[1], [1], [0], [0], [0, 0, 1, 0], [], []>} : vector<8x8xf32>, vector<8x8xf32>, vector<8x8xf32> -> vector<8x8xf32>
    %cst_42 = arith.constant 0.353553385 : f32
    %98 = vector.broadcast %cst_42 : f32 to vector<8x8xf32>
    %99 = arith.mulf %97, %98 : vector<8x8xf32>
    %100 = arith.addf %99, %5 : vector<8x8xf32>
    %cst_43 = arith.constant dense<0xFF800000> : vector<8xf32>
    %101 = vector.multi_reduction <maximumf>, %100, %cst_43 [1] : vector<8x8xf32> to vector<8xf32>
    %102 = vector.shape_cast %101 : vector<8xf32> to vector<8x1xf32>
    %103 = vector.broadcast %102 : vector<8x1xf32> to vector<8x8xf32>
    %104 = arith.subf %100, %103 : vector<8x8xf32>
    %105 = math.exp %104 : vector<8x8xf32>
    %cst_44 = arith.constant dense<0.000000e+00> : vector<8xf32>
    %106 = vector.multi_reduction <add>, %105, %cst_44 [1] : vector<8x8xf32> to vector<8xf32>
    %107 = vector.shape_cast %106 : vector<8xf32> to vector<8x1xf32>
    %108 = tpu.reciprocal %107 {approx = true} : vector<8x1xf32> -> vector<8x1xf32>
    %109 = arith.mulf %107, %108 : vector<8x1xf32>
    %cst_45 = arith.constant 2.000000e+00 : f32
    %110 = vector.broadcast %cst_45 : f32 to vector<8x1xf32>
    %111 = arith.subf %110, %109 : vector<8x1xf32>
    %112 = arith.mulf %108, %111 : vector<8x1xf32>
    %113 = vector.broadcast %112 : vector<8x1xf32> to vector<8x8xf32>
    %114 = arith.mulf %105, %113 : vector<8x8xf32>
    %cst_46 = arith.constant dense<0.000000e+00> : vector<8x8xf32>
    %115 = tpu.matmul %114, %96, %cst_46 {dimension_numbers = #tpu.dot_dimension_numbers<[1], [0], [0], [1], [0, 0, 1, 1], [], []>} : vector<8x8xf32>, vector<8x8xf32>, vector<8x8xf32> -> vector<8x8xf32>
    %116 = vector.extract_strided_slice %19 {offsets = [24, 0], sizes = [8, 32], strides = [1, 1]} : vector<32x32xf32> to vector<8x32xf32>
    %cst_47 = arith.constant dense<0.000000e+00> : vector<8x32xf32>
    %117 = tpu.matmul %115, %116, %cst_47 {dimension_numbers = #tpu.dot_dimension_numbers<[1], [0], [0], [1], [0, 0, 1, 1], [], []>} : vector<8x8xf32>, vector<8x32xf32>, vector<8x32xf32> -> vector<8x32xf32>
    %118 = arith.addf %93, %117 : vector<8x32xf32>
    %c0_48 = arith.constant 0 : index
    %c0_49 = arith.constant 0 : index
    %c0_50 = arith.constant 0 : index
    %119 = vector.load %arg8[%c0_48, %c0_49, %c0_50] : memref<2x1x32xf32, #tpu.memory_space<vmem>>, vector<1x1x32xf32>
    %120 = vector.shape_cast %119 : vector<1x1x32xf32> to vector<1x32xf32>
    %121 = vector.broadcast %120 : vector<1x32xf32> to vector<8x32xf32>
    %122 = arith.addf %118, %121 : vector<8x32xf32>
    %123 = arith.addf %1, %122 : vector<8x32xf32>
    %c0_51 = arith.constant 0 : index
    %c0_52 = arith.constant 0 : index
    %c0_53 = arith.constant 0 : index
    %124 = vector.load %arg19[%c0_51, %c0_52, %c0_53] : memref<6x1x32xf32, #tpu.memory_space<vmem>>, vector<1x1x32xf32>
    %125 = vector.shape_cast %124 : vector<1x1x32xf32> to vector<1x32xf32>
    %c0_54 = arith.constant 0 : index
    %c0_55 = arith.constant 0 : index
    %c0_56 = arith.constant 0 : index
    %126 = vector.load %arg20[%c0_54, %c0_55, %c0_56] : memref<6x1x32xf32, #tpu.memory_space<vmem>>, vector<1x1x32xf32>
    %127 = vector.shape_cast %126 : vector<1x1x32xf32> to vector<1x32xf32>
    %cst_57 = arith.constant dense<0.000000e+00> : vector<8xf32>
    %128 = vector.multi_reduction <add>, %123, %cst_57 [1] : vector<8x32xf32> to vector<8xf32>
    %129 = vector.shape_cast %128 : vector<8xf32> to vector<8x1xf32>
    %cst_58 = arith.constant 3.200000e+01 : f32
    %130 = vector.broadcast %cst_58 : f32 to vector<8x1xf32>
    %131 = arith.divf %129, %130 : vector<8x1xf32>
    %132 = vector.broadcast %131 : vector<8x1xf32> to vector<8x32xf32>
    %133 = arith.subf %123, %132 : vector<8x32xf32>
    %134 = arith.mulf %133, %133 : vector<8x32xf32>
    %cst_59 = arith.constant dense<0.000000e+00> : vector<8xf32>
    %135 = vector.multi_reduction <add>, %134, %cst_59 [1] : vector<8x32xf32> to vector<8xf32>
    %136 = vector.shape_cast %135 : vector<8xf32> to vector<8x1xf32>
    %cst_60 = arith.constant 3.200000e+01 : f32
    %137 = vector.broadcast %cst_60 : f32 to vector<8x1xf32>
    %138 = arith.divf %136, %137 : vector<8x1xf32>
    %139 = vector.broadcast %131 : vector<8x1xf32> to vector<8x32xf32>
    %140 = arith.subf %123, %139 : vector<8x32xf32>
    %cst_61 = arith.constant 9.99999974E-6 : f32
    %141 = vector.broadcast %cst_61 : f32 to vector<8x1xf32>
    %142 = arith.addf %138, %141 : vector<8x1xf32>
    %143 = math.rsqrt %142 : vector<8x1xf32>
    %144 = vector.broadcast %143 : vector<8x1xf32> to vector<8x32xf32>
    %145 = arith.mulf %140, %144 : vector<8x32xf32>
    %146 = vector.broadcast %125 : vector<1x32xf32> to vector<8x32xf32>
    %147 = arith.mulf %145, %146 : vector<8x32xf32>
    %148 = vector.broadcast %127 : vector<1x32xf32> to vector<8x32xf32>
    %149 = arith.addf %147, %148 : vector<8x32xf32>
    %c0_62 = arith.constant 0 : index
    %c0_63 = arith.constant 0 : index
    %c0_64 = arith.constant 0 : index
    %150 = vector.load %arg9[%c0_62, %c0_63, %c0_64] : memref<2x32x32xf32, #tpu.memory_space<vmem>>, vector<1x32x32xf32>
    %151 = vector.shape_cast %150 : vector<1x32x32xf32> to vector<32x32xf32>
    %cst_65 = arith.constant dense<0.000000e+00> : vector<8x32xf32>
    %152 = tpu.matmul %149, %151, %cst_65 {dimension_numbers = #tpu.dot_dimension_numbers<[1], [0], [0], [1], [0, 0, 1, 1], [], []>} : vector<8x32xf32>, vector<32x32xf32>, vector<8x32xf32> -> vector<8x32xf32>
    %c0_66 = arith.constant 0 : index
    %c0_67 = arith.constant 0 : index
    %c0_68 = arith.constant 0 : index
    %153 = vector.load %arg10[%c0_66, %c0_67, %c0_68] : memref<2x1x32xf32, #tpu.memory_space<vmem>>, vector<1x1x32xf32>
    %154 = vector.shape_cast %153 : vector<1x1x32xf32> to vector<1x32xf32>
    %155 = vector.broadcast %154 : vector<1x32xf32> to vector<8x32xf32>
    %156 = arith.addf %152, %155 : vector<8x32xf32>
    %c0_69 = arith.constant 0 : index
    %c0_70 = arith.constant 0 : index
    %c0_71 = arith.constant 0 : index
    %157 = vector.load %arg11[%c0_69, %c0_70, %c0_71] : memref<2x32x64xf32, #tpu.memory_space<vmem>>, vector<1x32x64xf32>
    %158 = vector.shape_cast %157 : vector<1x32x64xf32> to vector<32x64xf32>
    %cst_72 = arith.constant dense<0.000000e+00> : vector<8x64xf32>
    %159 = tpu.matmul %3, %158, %cst_72 {dimension_numbers = #tpu.dot_dimension_numbers<[1], [0], [0], [1], [0, 0, 1, 1], [], []>} : vector<8x32xf32>, vector<32x64xf32>, vector<8x64xf32> -> vector<8x64xf32>
    %c0_73 = arith.constant 0 : index
    %c0_74 = arith.constant 0 : index
    %c0_75 = arith.constant 0 : index
    %160 = vector.load %arg12[%c0_73, %c0_74, %c0_75] : memref<2x1x64xf32, #tpu.memory_space<vmem>>, vector<1x1x64xf32>
    %161 = vector.shape_cast %160 : vector<1x1x64xf32> to vector<1x64xf32>
    %162 = vector.broadcast %161 : vector<1x64xf32> to vector<8x64xf32>
    %163 = arith.addf %159, %162 : vector<8x64xf32>
    %164 = vector.extract_strided_slice %163 {offsets = [0, 0], sizes = [8, 32], strides = [1, 1]} : vector<8x64xf32> to vector<8x32xf32>
    %165 = vector.extract_strided_slice %163 {offsets = [0, 32], sizes = [8, 32], strides = [1, 1]} : vector<8x64xf32> to vector<8x32xf32>
    %c0_76 = arith.constant 0 : index
    %c0_77 = arith.constant 0 : index
    %c0_78 = arith.constant 0 : index
    %166 = vector.load %arg13[%c0_76, %c0_77, %c0_78] : memref<2x32x32xf32, #tpu.memory_space<vmem>>, vector<1x32x32xf32>
    %167 = vector.shape_cast %166 : vector<1x32x32xf32> to vector<32x32xf32>
    %168 = vector.extract_strided_slice %156 {offsets = [0, 0], sizes = [8, 8], strides = [1, 1]} : vector<8x32xf32> to vector<8x8xf32>
    %169 = vector.extract_strided_slice %164 {offsets = [0, 0], sizes = [8, 8], strides = [1, 1]} : vector<8x32xf32> to vector<8x8xf32>
    %170 = vector.extract_strided_slice %165 {offsets = [0, 0], sizes = [8, 8], strides = [1, 1]} : vector<8x32xf32> to vector<8x8xf32>
    %cst_79 = arith.constant dense<0.000000e+00> : vector<8x8xf32>
    %171 = tpu.matmul %168, %169, %cst_79 {dimension_numbers = #tpu.dot_dimension_numbers<[1], [1], [0], [0], [0, 0, 1, 0], [], []>} : vector<8x8xf32>, vector<8x8xf32>, vector<8x8xf32> -> vector<8x8xf32>
    %cst_80 = arith.constant 0.353553385 : f32
    %172 = vector.broadcast %cst_80 : f32 to vector<8x8xf32>
    %173 = arith.mulf %171, %172 : vector<8x8xf32>
    %174 = vector.broadcast %7 : vector<1x8xf32> to vector<8x8xf32>
    %175 = arith.addf %173, %174 : vector<8x8xf32>
    %cst_81 = arith.constant dense<0xFF800000> : vector<8xf32>
    %176 = vector.multi_reduction <maximumf>, %175, %cst_81 [1] : vector<8x8xf32> to vector<8xf32>
    %177 = vector.shape_cast %176 : vector<8xf32> to vector<8x1xf32>
    %178 = vector.broadcast %177 : vector<8x1xf32> to vector<8x8xf32>
    %179 = arith.subf %175, %178 : vector<8x8xf32>
    %180 = math.exp %179 : vector<8x8xf32>
    %cst_82 = arith.constant dense<0.000000e+00> : vector<8xf32>
    %181 = vector.multi_reduction <add>, %180, %cst_82 [1] : vector<8x8xf32> to vector<8xf32>
    %182 = vector.shape_cast %181 : vector<8xf32> to vector<8x1xf32>
    %183 = tpu.reciprocal %182 {approx = true} : vector<8x1xf32> -> vector<8x1xf32>
    %184 = arith.mulf %182, %183 : vector<8x1xf32>
    %cst_83 = arith.constant 2.000000e+00 : f32
    %185 = vector.broadcast %cst_83 : f32 to vector<8x1xf32>
    %186 = arith.subf %185, %184 : vector<8x1xf32>
    %187 = arith.mulf %183, %186 : vector<8x1xf32>
    %188 = vector.broadcast %187 : vector<8x1xf32> to vector<8x8xf32>
    %189 = arith.mulf %180, %188 : vector<8x8xf32>
    %cst_84 = arith.constant dense<0.000000e+00> : vector<8x8xf32>
    %190 = tpu.matmul %189, %170, %cst_84 {dimension_numbers = #tpu.dot_dimension_numbers<[1], [0], [0], [1], [0, 0, 1, 1], [], []>} : vector<8x8xf32>, vector<8x8xf32>, vector<8x8xf32> -> vector<8x8xf32>
    %191 = vector.extract_strided_slice %167 {offsets = [0, 0], sizes = [8, 32], strides = [1, 1]} : vector<32x32xf32> to vector<8x32xf32>
    %cst_85 = arith.constant dense<0.000000e+00> : vector<8x32xf32>
    %192 = tpu.matmul %190, %191, %cst_85 {dimension_numbers = #tpu.dot_dimension_numbers<[1], [0], [0], [1], [0, 0, 1, 1], [], []>} : vector<8x8xf32>, vector<8x32xf32>, vector<8x32xf32> -> vector<8x32xf32>
    %193 = vector.extract_strided_slice %156 {offsets = [0, 8], sizes = [8, 8], strides = [1, 1]} : vector<8x32xf32> to vector<8x8xf32>
    %194 = vector.extract_strided_slice %164 {offsets = [0, 8], sizes = [8, 8], strides = [1, 1]} : vector<8x32xf32> to vector<8x8xf32>
    %195 = vector.extract_strided_slice %165 {offsets = [0, 8], sizes = [8, 8], strides = [1, 1]} : vector<8x32xf32> to vector<8x8xf32>
    %cst_86 = arith.constant dense<0.000000e+00> : vector<8x8xf32>
    %196 = tpu.matmul %193, %194, %cst_86 {dimension_numbers = #tpu.dot_dimension_numbers<[1], [1], [0], [0], [0, 0, 1, 0], [], []>} : vector<8x8xf32>, vector<8x8xf32>, vector<8x8xf32> -> vector<8x8xf32>
    %cst_87 = arith.constant 0.353553385 : f32
    %197 = vector.broadcast %cst_87 : f32 to vector<8x8xf32>
    %198 = arith.mulf %196, %197 : vector<8x8xf32>
    %199 = vector.broadcast %7 : vector<1x8xf32> to vector<8x8xf32>
    %200 = arith.addf %198, %199 : vector<8x8xf32>
    %cst_88 = arith.constant dense<0xFF800000> : vector<8xf32>
    %201 = vector.multi_reduction <maximumf>, %200, %cst_88 [1] : vector<8x8xf32> to vector<8xf32>
    %202 = vector.shape_cast %201 : vector<8xf32> to vector<8x1xf32>
    %203 = vector.broadcast %202 : vector<8x1xf32> to vector<8x8xf32>
    %204 = arith.subf %200, %203 : vector<8x8xf32>
    %205 = math.exp %204 : vector<8x8xf32>
    %cst_89 = arith.constant dense<0.000000e+00> : vector<8xf32>
    %206 = vector.multi_reduction <add>, %205, %cst_89 [1] : vector<8x8xf32> to vector<8xf32>
    %207 = vector.shape_cast %206 : vector<8xf32> to vector<8x1xf32>
    %208 = tpu.reciprocal %207 {approx = true} : vector<8x1xf32> -> vector<8x1xf32>
    %209 = arith.mulf %207, %208 : vector<8x1xf32>
    %cst_90 = arith.constant 2.000000e+00 : f32
    %210 = vector.broadcast %cst_90 : f32 to vector<8x1xf32>
    %211 = arith.subf %210, %209 : vector<8x1xf32>
    %212 = arith.mulf %208, %211 : vector<8x1xf32>
    %213 = vector.broadcast %212 : vector<8x1xf32> to vector<8x8xf32>
    %214 = arith.mulf %205, %213 : vector<8x8xf32>
    %cst_91 = arith.constant dense<0.000000e+00> : vector<8x8xf32>
    %215 = tpu.matmul %214, %195, %cst_91 {dimension_numbers = #tpu.dot_dimension_numbers<[1], [0], [0], [1], [0, 0, 1, 1], [], []>} : vector<8x8xf32>, vector<8x8xf32>, vector<8x8xf32> -> vector<8x8xf32>
    %216 = vector.extract_strided_slice %167 {offsets = [8, 0], sizes = [8, 32], strides = [1, 1]} : vector<32x32xf32> to vector<8x32xf32>
    %cst_92 = arith.constant dense<0.000000e+00> : vector<8x32xf32>
    %217 = tpu.matmul %215, %216, %cst_92 {dimension_numbers = #tpu.dot_dimension_numbers<[1], [0], [0], [1], [0, 0, 1, 1], [], []>} : vector<8x8xf32>, vector<8x32xf32>, vector<8x32xf32> -> vector<8x32xf32>
    %218 = arith.addf %192, %217 : vector<8x32xf32>
    %219 = vector.extract_strided_slice %156 {offsets = [0, 16], sizes = [8, 8], strides = [1, 1]} : vector<8x32xf32> to vector<8x8xf32>
    %220 = vector.extract_strided_slice %164 {offsets = [0, 16], sizes = [8, 8], strides = [1, 1]} : vector<8x32xf32> to vector<8x8xf32>
    %221 = vector.extract_strided_slice %165 {offsets = [0, 16], sizes = [8, 8], strides = [1, 1]} : vector<8x32xf32> to vector<8x8xf32>
    %cst_93 = arith.constant dense<0.000000e+00> : vector<8x8xf32>
    %222 = tpu.matmul %219, %220, %cst_93 {dimension_numbers = #tpu.dot_dimension_numbers<[1], [1], [0], [0], [0, 0, 1, 0], [], []>} : vector<8x8xf32>, vector<8x8xf32>, vector<8x8xf32> -> vector<8x8xf32>
    %cst_94 = arith.constant 0.353553385 : f32
    %223 = vector.broadcast %cst_94 : f32 to vector<8x8xf32>
    %224 = arith.mulf %222, %223 : vector<8x8xf32>
    %225 = vector.broadcast %7 : vector<1x8xf32> to vector<8x8xf32>
    %226 = arith.addf %224, %225 : vector<8x8xf32>
    %cst_95 = arith.constant dense<0xFF800000> : vector<8xf32>
    %227 = vector.multi_reduction <maximumf>, %226, %cst_95 [1] : vector<8x8xf32> to vector<8xf32>
    %228 = vector.shape_cast %227 : vector<8xf32> to vector<8x1xf32>
    %229 = vector.broadcast %228 : vector<8x1xf32> to vector<8x8xf32>
    %230 = arith.subf %226, %229 : vector<8x8xf32>
    %231 = math.exp %230 : vector<8x8xf32>
    %cst_96 = arith.constant dense<0.000000e+00> : vector<8xf32>
    %232 = vector.multi_reduction <add>, %231, %cst_96 [1] : vector<8x8xf32> to vector<8xf32>
    %233 = vector.shape_cast %232 : vector<8xf32> to vector<8x1xf32>
    %234 = tpu.reciprocal %233 {approx = true} : vector<8x1xf32> -> vector<8x1xf32>
    %235 = arith.mulf %233, %234 : vector<8x1xf32>
    %cst_97 = arith.constant 2.000000e+00 : f32
    %236 = vector.broadcast %cst_97 : f32 to vector<8x1xf32>
    %237 = arith.subf %236, %235 : vector<8x1xf32>
    %238 = arith.mulf %234, %237 : vector<8x1xf32>
    %239 = vector.broadcast %238 : vector<8x1xf32> to vector<8x8xf32>
    %240 = arith.mulf %231, %239 : vector<8x8xf32>
    %cst_98 = arith.constant dense<0.000000e+00> : vector<8x8xf32>
    %241 = tpu.matmul %240, %221, %cst_98 {dimension_numbers = #tpu.dot_dimension_numbers<[1], [0], [0], [1], [0, 0, 1, 1], [], []>} : vector<8x8xf32>, vector<8x8xf32>, vector<8x8xf32> -> vector<8x8xf32>
    %242 = vector.extract_strided_slice %167 {offsets = [16, 0], sizes = [8, 32], strides = [1, 1]} : vector<32x32xf32> to vector<8x32xf32>
    %cst_99 = arith.constant dense<0.000000e+00> : vector<8x32xf32>
    %243 = tpu.matmul %241, %242, %cst_99 {dimension_numbers = #tpu.dot_dimension_numbers<[1], [0], [0], [1], [0, 0, 1, 1], [], []>} : vector<8x8xf32>, vector<8x32xf32>, vector<8x32xf32> -> vector<8x32xf32>
    %244 = arith.addf %218, %243 : vector<8x32xf32>
    %245 = vector.extract_strided_slice %156 {offsets = [0, 24], sizes = [8, 8], strides = [1, 1]} : vector<8x32xf32> to vector<8x8xf32>
    %246 = vector.extract_strided_slice %164 {offsets = [0, 24], sizes = [8, 8], strides = [1, 1]} : vector<8x32xf32> to vector<8x8xf32>
    %247 = vector.extract_strided_slice %165 {offsets = [0, 24], sizes = [8, 8], strides = [1, 1]} : vector<8x32xf32> to vector<8x8xf32>
    %cst_100 = arith.constant dense<0.000000e+00> : vector<8x8xf32>
    %248 = tpu.matmul %245, %246, %cst_100 {dimension_numbers = #tpu.dot_dimension_numbers<[1], [1], [0], [0], [0, 0, 1, 0], [], []>} : vector<8x8xf32>, vector<8x8xf32>, vector<8x8xf32> -> vector<8x8xf32>
    %cst_101 = arith.constant 0.353553385 : f32
    %249 = vector.broadcast %cst_101 : f32 to vector<8x8xf32>
    %250 = arith.mulf %248, %249 : vector<8x8xf32>
    %251 = vector.broadcast %7 : vector<1x8xf32> to vector<8x8xf32>
    %252 = arith.addf %250, %251 : vector<8x8xf32>
    %cst_102 = arith.constant dense<0xFF800000> : vector<8xf32>
    %253 = vector.multi_reduction <maximumf>, %252, %cst_102 [1] : vector<8x8xf32> to vector<8xf32>
    %254 = vector.shape_cast %253 : vector<8xf32> to vector<8x1xf32>
    %255 = vector.broadcast %254 : vector<8x1xf32> to vector<8x8xf32>
    %256 = arith.subf %252, %255 : vector<8x8xf32>
    %257 = math.exp %256 : vector<8x8xf32>
    %cst_103 = arith.constant dense<0.000000e+00> : vector<8xf32>
    %258 = vector.multi_reduction <add>, %257, %cst_103 [1] : vector<8x8xf32> to vector<8xf32>
    %259 = vector.shape_cast %258 : vector<8xf32> to vector<8x1xf32>
    %260 = tpu.reciprocal %259 {approx = true} : vector<8x1xf32> -> vector<8x1xf32>
    %261 = arith.mulf %259, %260 : vector<8x1xf32>
    %cst_104 = arith.constant 2.000000e+00 : f32
    %262 = vector.broadcast %cst_104 : f32 to vector<8x1xf32>
    %263 = arith.subf %262, %261 : vector<8x1xf32>
    %264 = arith.mulf %260, %263 : vector<8x1xf32>
    %265 = vector.broadcast %264 : vector<8x1xf32> to vector<8x8xf32>
    %266 = arith.mulf %257, %265 : vector<8x8xf32>
    %cst_105 = arith.constant dense<0.000000e+00> : vector<8x8xf32>
    %267 = tpu.matmul %266, %247, %cst_105 {dimension_numbers = #tpu.dot_dimension_numbers<[1], [0], [0], [1], [0, 0, 1, 1], [], []>} : vector<8x8xf32>, vector<8x8xf32>, vector<8x8xf32> -> vector<8x8xf32>
    %268 = vector.extract_strided_slice %167 {offsets = [24, 0], sizes = [8, 32], strides = [1, 1]} : vector<32x32xf32> to vector<8x32xf32>
    %cst_106 = arith.constant dense<0.000000e+00> : vector<8x32xf32>
    %269 = tpu.matmul %267, %268, %cst_106 {dimension_numbers = #tpu.dot_dimension_numbers<[1], [0], [0], [1], [0, 0, 1, 1], [], []>} : vector<8x8xf32>, vector<8x32xf32>, vector<8x32xf32> -> vector<8x32xf32>
    %270 = arith.addf %244, %269 : vector<8x32xf32>
    %c0_107 = arith.constant 0 : index
    %c0_108 = arith.constant 0 : index
    %c0_109 = arith.constant 0 : index
    %271 = vector.load %arg14[%c0_107, %c0_108, %c0_109] : memref<2x1x32xf32, #tpu.memory_space<vmem>>, vector<1x1x32xf32>
    %272 = vector.shape_cast %271 : vector<1x1x32xf32> to vector<1x32xf32>
    %273 = vector.broadcast %272 : vector<1x32xf32> to vector<8x32xf32>
    %274 = arith.addf %270, %273 : vector<8x32xf32>
    %275 = arith.addf %149, %274 : vector<8x32xf32>
    %c1 = arith.constant 1 : index
    %c0_110 = arith.constant 0 : index
    %c0_111 = arith.constant 0 : index
    %276 = vector.load %arg19[%c1, %c0_110, %c0_111] : memref<6x1x32xf32, #tpu.memory_space<vmem>>, vector<1x1x32xf32>
    %277 = vector.shape_cast %276 : vector<1x1x32xf32> to vector<1x32xf32>
    %c1_112 = arith.constant 1 : index
    %c0_113 = arith.constant 0 : index
    %c0_114 = arith.constant 0 : index
    %278 = vector.load %arg20[%c1_112, %c0_113, %c0_114] : memref<6x1x32xf32, #tpu.memory_space<vmem>>, vector<1x1x32xf32>
    %279 = vector.shape_cast %278 : vector<1x1x32xf32> to vector<1x32xf32>
    %cst_115 = arith.constant dense<0.000000e+00> : vector<8xf32>
    %280 = vector.multi_reduction <add>, %275, %cst_115 [1] : vector<8x32xf32> to vector<8xf32>
    %281 = vector.shape_cast %280 : vector<8xf32> to vector<8x1xf32>
    %cst_116 = arith.constant 3.200000e+01 : f32
    %282 = vector.broadcast %cst_116 : f32 to vector<8x1xf32>
    %283 = arith.divf %281, %282 : vector<8x1xf32>
    %284 = vector.broadcast %283 : vector<8x1xf32> to vector<8x32xf32>
    %285 = arith.subf %275, %284 : vector<8x32xf32>
    %286 = arith.mulf %285, %285 : vector<8x32xf32>
    %cst_117 = arith.constant dense<0.000000e+00> : vector<8xf32>
    %287 = vector.multi_reduction <add>, %286, %cst_117 [1] : vector<8x32xf32> to vector<8xf32>
    %288 = vector.shape_cast %287 : vector<8xf32> to vector<8x1xf32>
    %cst_118 = arith.constant 3.200000e+01 : f32
    %289 = vector.broadcast %cst_118 : f32 to vector<8x1xf32>
    %290 = arith.divf %288, %289 : vector<8x1xf32>
    %291 = vector.broadcast %283 : vector<8x1xf32> to vector<8x32xf32>
    %292 = arith.subf %275, %291 : vector<8x32xf32>
    %cst_119 = arith.constant 9.99999974E-6 : f32
    %293 = vector.broadcast %cst_119 : f32 to vector<8x1xf32>
    %294 = arith.addf %290, %293 : vector<8x1xf32>
    %295 = math.rsqrt %294 : vector<8x1xf32>
    %296 = vector.broadcast %295 : vector<8x1xf32> to vector<8x32xf32>
    %297 = arith.mulf %292, %296 : vector<8x32xf32>
    %298 = vector.broadcast %277 : vector<1x32xf32> to vector<8x32xf32>
    %299 = arith.mulf %297, %298 : vector<8x32xf32>
    %300 = vector.broadcast %279 : vector<1x32xf32> to vector<8x32xf32>
    %301 = arith.addf %299, %300 : vector<8x32xf32>
    %c0_120 = arith.constant 0 : index
    %c0_121 = arith.constant 0 : index
    %c0_122 = arith.constant 0 : index
    %302 = vector.load %arg15[%c0_120, %c0_121, %c0_122] : memref<2x32x64xf32, #tpu.memory_space<vmem>>, vector<1x32x64xf32>
    %303 = vector.shape_cast %302 : vector<1x32x64xf32> to vector<32x64xf32>
    %cst_123 = arith.constant dense<0.000000e+00> : vector<8x64xf32>
    %304 = tpu.matmul %301, %303, %cst_123 {dimension_numbers = #tpu.dot_dimension_numbers<[1], [0], [0], [1], [0, 0, 1, 1], [], []>} : vector<8x32xf32>, vector<32x64xf32>, vector<8x64xf32> -> vector<8x64xf32>
    %c0_124 = arith.constant 0 : index
    %c0_125 = arith.constant 0 : index
    %c0_126 = arith.constant 0 : index
    %305 = vector.load %arg16[%c0_124, %c0_125, %c0_126] : memref<2x1x64xf32, #tpu.memory_space<vmem>>, vector<1x1x64xf32>
    %306 = vector.shape_cast %305 : vector<1x1x64xf32> to vector<1x64xf32>
    %307 = vector.broadcast %306 : vector<1x64xf32> to vector<8x64xf32>
    %308 = arith.addf %304, %307 : vector<8x64xf32>
    %cst_127 = arith.constant 0.000000e+00 : f32
    %309 = vector.broadcast %cst_127 : f32 to vector<8x64xf32>
    %310 = arith.maximumf %308, %309 : vector<8x64xf32>
    %c0_128 = arith.constant 0 : index
    %c0_129 = arith.constant 0 : index
    %c0_130 = arith.constant 0 : index
    %311 = vector.load %arg17[%c0_128, %c0_129, %c0_130] : memref<2x64x32xf32, #tpu.memory_space<vmem>>, vector<1x64x32xf32>
    %312 = vector.shape_cast %311 : vector<1x64x32xf32> to vector<64x32xf32>
    %cst_131 = arith.constant dense<0.000000e+00> : vector<8x32xf32>
    %313 = tpu.matmul %310, %312, %cst_131 {dimension_numbers = #tpu.dot_dimension_numbers<[1], [0], [0], [1], [0, 0, 1, 1], [], []>} : vector<8x64xf32>, vector<64x32xf32>, vector<8x32xf32> -> vector<8x32xf32>
    %c0_132 = arith.constant 0 : index
    %c0_133 = arith.constant 0 : index
    %c0_134 = arith.constant 0 : index
    %314 = vector.load %arg18[%c0_132, %c0_133, %c0_134] : memref<2x1x32xf32, #tpu.memory_space<vmem>>, vector<1x1x32xf32>
    %315 = vector.shape_cast %314 : vector<1x1x32xf32> to vector<1x32xf32>
    %316 = vector.broadcast %315 : vector<1x32xf32> to vector<8x32xf32>
    %317 = arith.addf %313, %316 : vector<8x32xf32>
    %318 = arith.addf %301, %317 : vector<8x32xf32>
    %c2 = arith.constant 2 : index
    %c0_135 = arith.constant 0 : index
    %c0_136 = arith.constant 0 : index
    %319 = vector.load %arg19[%c2, %c0_135, %c0_136] : memref<6x1x32xf32, #tpu.memory_space<vmem>>, vector<1x1x32xf32>
    %320 = vector.shape_cast %319 : vector<1x1x32xf32> to vector<1x32xf32>
    %c2_137 = arith.constant 2 : index
    %c0_138 = arith.constant 0 : index
    %c0_139 = arith.constant 0 : index
    %321 = vector.load %arg20[%c2_137, %c0_138, %c0_139] : memref<6x1x32xf32, #tpu.memory_space<vmem>>, vector<1x1x32xf32>
    %322 = vector.shape_cast %321 : vector<1x1x32xf32> to vector<1x32xf32>
    %cst_140 = arith.constant dense<0.000000e+00> : vector<8xf32>
    %323 = vector.multi_reduction <add>, %318, %cst_140 [1] : vector<8x32xf32> to vector<8xf32>
    %324 = vector.shape_cast %323 : vector<8xf32> to vector<8x1xf32>
    %cst_141 = arith.constant 3.200000e+01 : f32
    %325 = vector.broadcast %cst_141 : f32 to vector<8x1xf32>
    %326 = arith.divf %324, %325 : vector<8x1xf32>
    %327 = vector.broadcast %326 : vector<8x1xf32> to vector<8x32xf32>
    %328 = arith.subf %318, %327 : vector<8x32xf32>
    %329 = arith.mulf %328, %328 : vector<8x32xf32>
    %cst_142 = arith.constant dense<0.000000e+00> : vector<8xf32>
    %330 = vector.multi_reduction <add>, %329, %cst_142 [1] : vector<8x32xf32> to vector<8xf32>
    %331 = vector.shape_cast %330 : vector<8xf32> to vector<8x1xf32>
    %cst_143 = arith.constant 3.200000e+01 : f32
    %332 = vector.broadcast %cst_143 : f32 to vector<8x1xf32>
    %333 = arith.divf %331, %332 : vector<8x1xf32>
    %334 = vector.broadcast %326 : vector<8x1xf32> to vector<8x32xf32>
    %335 = arith.subf %318, %334 : vector<8x32xf32>
    %cst_144 = arith.constant 9.99999974E-6 : f32
    %336 = vector.broadcast %cst_144 : f32 to vector<8x1xf32>
    %337 = arith.addf %333, %336 : vector<8x1xf32>
    %338 = math.rsqrt %337 : vector<8x1xf32>
    %339 = vector.broadcast %338 : vector<8x1xf32> to vector<8x32xf32>
    %340 = arith.mulf %335, %339 : vector<8x32xf32>
    %341 = vector.broadcast %320 : vector<1x32xf32> to vector<8x32xf32>
    %342 = arith.mulf %340, %341 : vector<8x32xf32>
    %343 = vector.broadcast %322 : vector<1x32xf32> to vector<8x32xf32>
    %344 = arith.addf %342, %343 : vector<8x32xf32>
    %c1_145 = arith.constant 1 : index
    %c0_146 = arith.constant 0 : index
    %c0_147 = arith.constant 0 : index
    %345 = vector.load %arg5[%c1_145, %c0_146, %c0_147] : memref<2x32x96xf32, #tpu.memory_space<vmem>>, vector<1x32x96xf32>
    %346 = vector.shape_cast %345 : vector<1x32x96xf32> to vector<32x96xf32>
    %cst_148 = arith.constant dense<0.000000e+00> : vector<8x96xf32>
    %347 = tpu.matmul %344, %346, %cst_148 {dimension_numbers = #tpu.dot_dimension_numbers<[1], [0], [0], [1], [0, 0, 1, 1], [], []>} : vector<8x32xf32>, vector<32x96xf32>, vector<8x96xf32> -> vector<8x96xf32>
    %c1_149 = arith.constant 1 : index
    %c0_150 = arith.constant 0 : index
    %c0_151 = arith.constant 0 : index
    %348 = vector.load %arg6[%c1_149, %c0_150, %c0_151] : memref<2x1x96xf32, #tpu.memory_space<vmem>>, vector<1x1x96xf32>
    %349 = vector.shape_cast %348 : vector<1x1x96xf32> to vector<1x96xf32>
    %350 = vector.broadcast %349 : vector<1x96xf32> to vector<8x96xf32>
    %351 = arith.addf %347, %350 : vector<8x96xf32>
    %352 = vector.extract_strided_slice %351 {offsets = [0, 0], sizes = [8, 32], strides = [1, 1]} : vector<8x96xf32> to vector<8x32xf32>
    %353 = vector.extract_strided_slice %351 {offsets = [0, 32], sizes = [8, 32], strides = [1, 1]} : vector<8x96xf32> to vector<8x32xf32>
    %354 = vector.extract_strided_slice %351 {offsets = [0, 64], sizes = [8, 32], strides = [1, 1]} : vector<8x96xf32> to vector<8x32xf32>
    %c1_152 = arith.constant 1 : index
    %c0_153 = arith.constant 0 : index
    %c0_154 = arith.constant 0 : index
    %355 = vector.load %arg7[%c1_152, %c0_153, %c0_154] : memref<2x32x32xf32, #tpu.memory_space<vmem>>, vector<1x32x32xf32>
    %356 = vector.shape_cast %355 : vector<1x32x32xf32> to vector<32x32xf32>
    %357 = vector.extract_strided_slice %352 {offsets = [0, 0], sizes = [8, 8], strides = [1, 1]} : vector<8x32xf32> to vector<8x8xf32>
    %358 = vector.extract_strided_slice %353 {offsets = [0, 0], sizes = [8, 8], strides = [1, 1]} : vector<8x32xf32> to vector<8x8xf32>
    %359 = vector.extract_strided_slice %354 {offsets = [0, 0], sizes = [8, 8], strides = [1, 1]} : vector<8x32xf32> to vector<8x8xf32>
    %cst_155 = arith.constant dense<0.000000e+00> : vector<8x8xf32>
    %360 = tpu.matmul %357, %358, %cst_155 {dimension_numbers = #tpu.dot_dimension_numbers<[1], [1], [0], [0], [0, 0, 1, 0], [], []>} : vector<8x8xf32>, vector<8x8xf32>, vector<8x8xf32> -> vector<8x8xf32>
    %cst_156 = arith.constant 0.353553385 : f32
    %361 = vector.broadcast %cst_156 : f32 to vector<8x8xf32>
    %362 = arith.mulf %360, %361 : vector<8x8xf32>
    %363 = arith.addf %362, %5 : vector<8x8xf32>
    %cst_157 = arith.constant dense<0xFF800000> : vector<8xf32>
    %364 = vector.multi_reduction <maximumf>, %363, %cst_157 [1] : vector<8x8xf32> to vector<8xf32>
    %365 = vector.shape_cast %364 : vector<8xf32> to vector<8x1xf32>
    %366 = vector.broadcast %365 : vector<8x1xf32> to vector<8x8xf32>
    %367 = arith.subf %363, %366 : vector<8x8xf32>
    %368 = math.exp %367 : vector<8x8xf32>
    %cst_158 = arith.constant dense<0.000000e+00> : vector<8xf32>
    %369 = vector.multi_reduction <add>, %368, %cst_158 [1] : vector<8x8xf32> to vector<8xf32>
    %370 = vector.shape_cast %369 : vector<8xf32> to vector<8x1xf32>
    %371 = tpu.reciprocal %370 {approx = true} : vector<8x1xf32> -> vector<8x1xf32>
    %372 = arith.mulf %370, %371 : vector<8x1xf32>
    %cst_159 = arith.constant 2.000000e+00 : f32
    %373 = vector.broadcast %cst_159 : f32 to vector<8x1xf32>
    %374 = arith.subf %373, %372 : vector<8x1xf32>
    %375 = arith.mulf %371, %374 : vector<8x1xf32>
    %376 = vector.broadcast %375 : vector<8x1xf32> to vector<8x8xf32>
    %377 = arith.mulf %368, %376 : vector<8x8xf32>
    %cst_160 = arith.constant dense<0.000000e+00> : vector<8x8xf32>
    %378 = tpu.matmul %377, %359, %cst_160 {dimension_numbers = #tpu.dot_dimension_numbers<[1], [0], [0], [1], [0, 0, 1, 1], [], []>} : vector<8x8xf32>, vector<8x8xf32>, vector<8x8xf32> -> vector<8x8xf32>
    %379 = vector.extract_strided_slice %356 {offsets = [0, 0], sizes = [8, 32], strides = [1, 1]} : vector<32x32xf32> to vector<8x32xf32>
    %cst_161 = arith.constant dense<0.000000e+00> : vector<8x32xf32>
    %380 = tpu.matmul %378, %379, %cst_161 {dimension_numbers = #tpu.dot_dimension_numbers<[1], [0], [0], [1], [0, 0, 1, 1], [], []>} : vector<8x8xf32>, vector<8x32xf32>, vector<8x32xf32> -> vector<8x32xf32>
    %381 = vector.extract_strided_slice %352 {offsets = [0, 8], sizes = [8, 8], strides = [1, 1]} : vector<8x32xf32> to vector<8x8xf32>
    %382 = vector.extract_strided_slice %353 {offsets = [0, 8], sizes = [8, 8], strides = [1, 1]} : vector<8x32xf32> to vector<8x8xf32>
    %383 = vector.extract_strided_slice %354 {offsets = [0, 8], sizes = [8, 8], strides = [1, 1]} : vector<8x32xf32> to vector<8x8xf32>
    %cst_162 = arith.constant dense<0.000000e+00> : vector<8x8xf32>
    %384 = tpu.matmul %381, %382, %cst_162 {dimension_numbers = #tpu.dot_dimension_numbers<[1], [1], [0], [0], [0, 0, 1, 0], [], []>} : vector<8x8xf32>, vector<8x8xf32>, vector<8x8xf32> -> vector<8x8xf32>
    %cst_163 = arith.constant 0.353553385 : f32
    %385 = vector.broadcast %cst_163 : f32 to vector<8x8xf32>
    %386 = arith.mulf %384, %385 : vector<8x8xf32>
    %387 = arith.addf %386, %5 : vector<8x8xf32>
    %cst_164 = arith.constant dense<0xFF800000> : vector<8xf32>
    %388 = vector.multi_reduction <maximumf>, %387, %cst_164 [1] : vector<8x8xf32> to vector<8xf32>
    %389 = vector.shape_cast %388 : vector<8xf32> to vector<8x1xf32>
    %390 = vector.broadcast %389 : vector<8x1xf32> to vector<8x8xf32>
    %391 = arith.subf %387, %390 : vector<8x8xf32>
    %392 = math.exp %391 : vector<8x8xf32>
    %cst_165 = arith.constant dense<0.000000e+00> : vector<8xf32>
    %393 = vector.multi_reduction <add>, %392, %cst_165 [1] : vector<8x8xf32> to vector<8xf32>
    %394 = vector.shape_cast %393 : vector<8xf32> to vector<8x1xf32>
    %395 = tpu.reciprocal %394 {approx = true} : vector<8x1xf32> -> vector<8x1xf32>
    %396 = arith.mulf %394, %395 : vector<8x1xf32>
    %cst_166 = arith.constant 2.000000e+00 : f32
    %397 = vector.broadcast %cst_166 : f32 to vector<8x1xf32>
    %398 = arith.subf %397, %396 : vector<8x1xf32>
    %399 = arith.mulf %395, %398 : vector<8x1xf32>
    %400 = vector.broadcast %399 : vector<8x1xf32> to vector<8x8xf32>
    %401 = arith.mulf %392, %400 : vector<8x8xf32>
    %cst_167 = arith.constant dense<0.000000e+00> : vector<8x8xf32>
    %402 = tpu.matmul %401, %383, %cst_167 {dimension_numbers = #tpu.dot_dimension_numbers<[1], [0], [0], [1], [0, 0, 1, 1], [], []>} : vector<8x8xf32>, vector<8x8xf32>, vector<8x8xf32> -> vector<8x8xf32>
    %403 = vector.extract_strided_slice %356 {offsets = [8, 0], sizes = [8, 32], strides = [1, 1]} : vector<32x32xf32> to vector<8x32xf32>
    %cst_168 = arith.constant dense<0.000000e+00> : vector<8x32xf32>
    %404 = tpu.matmul %402, %403, %cst_168 {dimension_numbers = #tpu.dot_dimension_numbers<[1], [0], [0], [1], [0, 0, 1, 1], [], []>} : vector<8x8xf32>, vector<8x32xf32>, vector<8x32xf32> -> vector<8x32xf32>
    %405 = arith.addf %380, %404 : vector<8x32xf32>
    %406 = vector.extract_strided_slice %352 {offsets = [0, 16], sizes = [8, 8], strides = [1, 1]} : vector<8x32xf32> to vector<8x8xf32>
    %407 = vector.extract_strided_slice %353 {offsets = [0, 16], sizes = [8, 8], strides = [1, 1]} : vector<8x32xf32> to vector<8x8xf32>
    %408 = vector.extract_strided_slice %354 {offsets = [0, 16], sizes = [8, 8], strides = [1, 1]} : vector<8x32xf32> to vector<8x8xf32>
    %cst_169 = arith.constant dense<0.000000e+00> : vector<8x8xf32>
    %409 = tpu.matmul %406, %407, %cst_169 {dimension_numbers = #tpu.dot_dimension_numbers<[1], [1], [0], [0], [0, 0, 1, 0], [], []>} : vector<8x8xf32>, vector<8x8xf32>, vector<8x8xf32> -> vector<8x8xf32>
    %cst_170 = arith.constant 0.353553385 : f32
    %410 = vector.broadcast %cst_170 : f32 to vector<8x8xf32>
    %411 = arith.mulf %409, %410 : vector<8x8xf32>
    %412 = arith.addf %411, %5 : vector<8x8xf32>
    %cst_171 = arith.constant dense<0xFF800000> : vector<8xf32>
    %413 = vector.multi_reduction <maximumf>, %412, %cst_171 [1] : vector<8x8xf32> to vector<8xf32>
    %414 = vector.shape_cast %413 : vector<8xf32> to vector<8x1xf32>
    %415 = vector.broadcast %414 : vector<8x1xf32> to vector<8x8xf32>
    %416 = arith.subf %412, %415 : vector<8x8xf32>
    %417 = math.exp %416 : vector<8x8xf32>
    %cst_172 = arith.constant dense<0.000000e+00> : vector<8xf32>
    %418 = vector.multi_reduction <add>, %417, %cst_172 [1] : vector<8x8xf32> to vector<8xf32>
    %419 = vector.shape_cast %418 : vector<8xf32> to vector<8x1xf32>
    %420 = tpu.reciprocal %419 {approx = true} : vector<8x1xf32> -> vector<8x1xf32>
    %421 = arith.mulf %419, %420 : vector<8x1xf32>
    %cst_173 = arith.constant 2.000000e+00 : f32
    %422 = vector.broadcast %cst_173 : f32 to vector<8x1xf32>
    %423 = arith.subf %422, %421 : vector<8x1xf32>
    %424 = arith.mulf %420, %423 : vector<8x1xf32>
    %425 = vector.broadcast %424 : vector<8x1xf32> to vector<8x8xf32>
    %426 = arith.mulf %417, %425 : vector<8x8xf32>
    %cst_174 = arith.constant dense<0.000000e+00> : vector<8x8xf32>
    %427 = tpu.matmul %426, %408, %cst_174 {dimension_numbers = #tpu.dot_dimension_numbers<[1], [0], [0], [1], [0, 0, 1, 1], [], []>} : vector<8x8xf32>, vector<8x8xf32>, vector<8x8xf32> -> vector<8x8xf32>
    %428 = vector.extract_strided_slice %356 {offsets = [16, 0], sizes = [8, 32], strides = [1, 1]} : vector<32x32xf32> to vector<8x32xf32>
    %cst_175 = arith.constant dense<0.000000e+00> : vector<8x32xf32>
    %429 = tpu.matmul %427, %428, %cst_175 {dimension_numbers = #tpu.dot_dimension_numbers<[1], [0], [0], [1], [0, 0, 1, 1], [], []>} : vector<8x8xf32>, vector<8x32xf32>, vector<8x32xf32> -> vector<8x32xf32>
    %430 = arith.addf %405, %429 : vector<8x32xf32>
    %431 = vector.extract_strided_slice %352 {offsets = [0, 24], sizes = [8, 8], strides = [1, 1]} : vector<8x32xf32> to vector<8x8xf32>
    %432 = vector.extract_strided_slice %353 {offsets = [0, 24], sizes = [8, 8], strides = [1, 1]} : vector<8x32xf32> to vector<8x8xf32>
    %433 = vector.extract_strided_slice %354 {offsets = [0, 24], sizes = [8, 8], strides = [1, 1]} : vector<8x32xf32> to vector<8x8xf32>
    %cst_176 = arith.constant dense<0.000000e+00> : vector<8x8xf32>
    %434 = tpu.matmul %431, %432, %cst_176 {dimension_numbers = #tpu.dot_dimension_numbers<[1], [1], [0], [0], [0, 0, 1, 0], [], []>} : vector<8x8xf32>, vector<8x8xf32>, vector<8x8xf32> -> vector<8x8xf32>
    %cst_177 = arith.constant 0.353553385 : f32
    %435 = vector.broadcast %cst_177 : f32 to vector<8x8xf32>
    %436 = arith.mulf %434, %435 : vector<8x8xf32>
    %437 = arith.addf %436, %5 : vector<8x8xf32>
    %cst_178 = arith.constant dense<0xFF800000> : vector<8xf32>
    %438 = vector.multi_reduction <maximumf>, %437, %cst_178 [1] : vector<8x8xf32> to vector<8xf32>
    %439 = vector.shape_cast %438 : vector<8xf32> to vector<8x1xf32>
    %440 = vector.broadcast %439 : vector<8x1xf32> to vector<8x8xf32>
    %441 = arith.subf %437, %440 : vector<8x8xf32>
    %442 = math.exp %441 : vector<8x8xf32>
    %cst_179 = arith.constant dense<0.000000e+00> : vector<8xf32>
    %443 = vector.multi_reduction <add>, %442, %cst_179 [1] : vector<8x8xf32> to vector<8xf32>
    %444 = vector.shape_cast %443 : vector<8xf32> to vector<8x1xf32>
    %445 = tpu.reciprocal %444 {approx = true} : vector<8x1xf32> -> vector<8x1xf32>
    %446 = arith.mulf %444, %445 : vector<8x1xf32>
    %cst_180 = arith.constant 2.000000e+00 : f32
    %447 = vector.broadcast %cst_180 : f32 to vector<8x1xf32>
    %448 = arith.subf %447, %446 : vector<8x1xf32>
    %449 = arith.mulf %445, %448 : vector<8x1xf32>
    %450 = vector.broadcast %449 : vector<8x1xf32> to vector<8x8xf32>
    %451 = arith.mulf %442, %450 : vector<8x8xf32>
    %cst_181 = arith.constant dense<0.000000e+00> : vector<8x8xf32>
    %452 = tpu.matmul %451, %433, %cst_181 {dimension_numbers = #tpu.dot_dimension_numbers<[1], [0], [0], [1], [0, 0, 1, 1], [], []>} : vector<8x8xf32>, vector<8x8xf32>, vector<8x8xf32> -> vector<8x8xf32>
    %453 = vector.extract_strided_slice %356 {offsets = [24, 0], sizes = [8, 32], strides = [1, 1]} : vector<32x32xf32> to vector<8x32xf32>
    %cst_182 = arith.constant dense<0.000000e+00> : vector<8x32xf32>
    %454 = tpu.matmul %452, %453, %cst_182 {dimension_numbers = #tpu.dot_dimension_numbers<[1], [0], [0], [1], [0, 0, 1, 1], [], []>} : vector<8x8xf32>, vector<8x32xf32>, vector<8x32xf32> -> vector<8x32xf32>
    %455 = arith.addf %430, %454 : vector<8x32xf32>
    %c1_183 = arith.constant 1 : index
    %c0_184 = arith.constant 0 : index
    %c0_185 = arith.constant 0 : index
    %456 = vector.load %arg8[%c1_183, %c0_184, %c0_185] : memref<2x1x32xf32, #tpu.memory_space<vmem>>, vector<1x1x32xf32>
    %457 = vector.shape_cast %456 : vector<1x1x32xf32> to vector<1x32xf32>
    %458 = vector.broadcast %457 : vector<1x32xf32> to vector<8x32xf32>
    %459 = arith.addf %455, %458 : vector<8x32xf32>
    %460 = arith.addf %344, %459 : vector<8x32xf32>
    %c3 = arith.constant 3 : index
    %c0_186 = arith.constant 0 : index
    %c0_187 = arith.constant 0 : index
    %461 = vector.load %arg19[%c3, %c0_186, %c0_187] : memref<6x1x32xf32, #tpu.memory_space<vmem>>, vector<1x1x32xf32>
    %462 = vector.shape_cast %461 : vector<1x1x32xf32> to vector<1x32xf32>
    %c3_188 = arith.constant 3 : index
    %c0_189 = arith.constant 0 : index
    %c0_190 = arith.constant 0 : index
    %463 = vector.load %arg20[%c3_188, %c0_189, %c0_190] : memref<6x1x32xf32, #tpu.memory_space<vmem>>, vector<1x1x32xf32>
    %464 = vector.shape_cast %463 : vector<1x1x32xf32> to vector<1x32xf32>
    %cst_191 = arith.constant dense<0.000000e+00> : vector<8xf32>
    %465 = vector.multi_reduction <add>, %460, %cst_191 [1] : vector<8x32xf32> to vector<8xf32>
    %466 = vector.shape_cast %465 : vector<8xf32> to vector<8x1xf32>
    %cst_192 = arith.constant 3.200000e+01 : f32
    %467 = vector.broadcast %cst_192 : f32 to vector<8x1xf32>
    %468 = arith.divf %466, %467 : vector<8x1xf32>
    %469 = vector.broadcast %468 : vector<8x1xf32> to vector<8x32xf32>
    %470 = arith.subf %460, %469 : vector<8x32xf32>
    %471 = arith.mulf %470, %470 : vector<8x32xf32>
    %cst_193 = arith.constant dense<0.000000e+00> : vector<8xf32>
    %472 = vector.multi_reduction <add>, %471, %cst_193 [1] : vector<8x32xf32> to vector<8xf32>
    %473 = vector.shape_cast %472 : vector<8xf32> to vector<8x1xf32>
    %cst_194 = arith.constant 3.200000e+01 : f32
    %474 = vector.broadcast %cst_194 : f32 to vector<8x1xf32>
    %475 = arith.divf %473, %474 : vector<8x1xf32>
    %476 = vector.broadcast %468 : vector<8x1xf32> to vector<8x32xf32>
    %477 = arith.subf %460, %476 : vector<8x32xf32>
    %cst_195 = arith.constant 9.99999974E-6 : f32
    %478 = vector.broadcast %cst_195 : f32 to vector<8x1xf32>
    %479 = arith.addf %475, %478 : vector<8x1xf32>
    %480 = math.rsqrt %479 : vector<8x1xf32>
    %481 = vector.broadcast %480 : vector<8x1xf32> to vector<8x32xf32>
    %482 = arith.mulf %477, %481 : vector<8x32xf32>
    %483 = vector.broadcast %462 : vector<1x32xf32> to vector<8x32xf32>
    %484 = arith.mulf %482, %483 : vector<8x32xf32>
    %485 = vector.broadcast %464 : vector<1x32xf32> to vector<8x32xf32>
    %486 = arith.addf %484, %485 : vector<8x32xf32>
    %c1_196 = arith.constant 1 : index
    %c0_197 = arith.constant 0 : index
    %c0_198 = arith.constant 0 : index
    %487 = vector.load %arg9[%c1_196, %c0_197, %c0_198] : memref<2x32x32xf32, #tpu.memory_space<vmem>>, vector<1x32x32xf32>
    %488 = vector.shape_cast %487 : vector<1x32x32xf32> to vector<32x32xf32>
    %cst_199 = arith.constant dense<0.000000e+00> : vector<8x32xf32>
    %489 = tpu.matmul %486, %488, %cst_199 {dimension_numbers = #tpu.dot_dimension_numbers<[1], [0], [0], [1], [0, 0, 1, 1], [], []>} : vector<8x32xf32>, vector<32x32xf32>, vector<8x32xf32> -> vector<8x32xf32>
    %c1_200 = arith.constant 1 : index
    %c0_201 = arith.constant 0 : index
    %c0_202 = arith.constant 0 : index
    %490 = vector.load %arg10[%c1_200, %c0_201, %c0_202] : memref<2x1x32xf32, #tpu.memory_space<vmem>>, vector<1x1x32xf32>
    %491 = vector.shape_cast %490 : vector<1x1x32xf32> to vector<1x32xf32>
    %492 = vector.broadcast %491 : vector<1x32xf32> to vector<8x32xf32>
    %493 = arith.addf %489, %492 : vector<8x32xf32>
    %c1_203 = arith.constant 1 : index
    %c0_204 = arith.constant 0 : index
    %c0_205 = arith.constant 0 : index
    %494 = vector.load %arg11[%c1_203, %c0_204, %c0_205] : memref<2x32x64xf32, #tpu.memory_space<vmem>>, vector<1x32x64xf32>
    %495 = vector.shape_cast %494 : vector<1x32x64xf32> to vector<32x64xf32>
    %cst_206 = arith.constant dense<0.000000e+00> : vector<8x64xf32>
    %496 = tpu.matmul %3, %495, %cst_206 {dimension_numbers = #tpu.dot_dimension_numbers<[1], [0], [0], [1], [0, 0, 1, 1], [], []>} : vector<8x32xf32>, vector<32x64xf32>, vector<8x64xf32> -> vector<8x64xf32>
    %c1_207 = arith.constant 1 : index
    %c0_208 = arith.constant 0 : index
    %c0_209 = arith.constant 0 : index
    %497 = vector.load %arg12[%c1_207, %c0_208, %c0_209] : memref<2x1x64xf32, #tpu.memory_space<vmem>>, vector<1x1x64xf32>
    %498 = vector.shape_cast %497 : vector<1x1x64xf32> to vector<1x64xf32>
    %499 = vector.broadcast %498 : vector<1x64xf32> to vector<8x64xf32>
    %500 = arith.addf %496, %499 : vector<8x64xf32>
    %501 = vector.extract_strided_slice %500 {offsets = [0, 0], sizes = [8, 32], strides = [1, 1]} : vector<8x64xf32> to vector<8x32xf32>
    %502 = vector.extract_strided_slice %500 {offsets = [0, 32], sizes = [8, 32], strides = [1, 1]} : vector<8x64xf32> to vector<8x32xf32>
    %c1_210 = arith.constant 1 : index
    %c0_211 = arith.constant 0 : index
    %c0_212 = arith.constant 0 : index
    %503 = vector.load %arg13[%c1_210, %c0_211, %c0_212] : memref<2x32x32xf32, #tpu.memory_space<vmem>>, vector<1x32x32xf32>
    %504 = vector.shape_cast %503 : vector<1x32x32xf32> to vector<32x32xf32>
    %505 = vector.extract_strided_slice %493 {offsets = [0, 0], sizes = [8, 8], strides = [1, 1]} : vector<8x32xf32> to vector<8x8xf32>
    %506 = vector.extract_strided_slice %501 {offsets = [0, 0], sizes = [8, 8], strides = [1, 1]} : vector<8x32xf32> to vector<8x8xf32>
    %507 = vector.extract_strided_slice %502 {offsets = [0, 0], sizes = [8, 8], strides = [1, 1]} : vector<8x32xf32> to vector<8x8xf32>
    %cst_213 = arith.constant dense<0.000000e+00> : vector<8x8xf32>
    %508 = tpu.matmul %505, %506, %cst_213 {dimension_numbers = #tpu.dot_dimension_numbers<[1], [1], [0], [0], [0, 0, 1, 0], [], []>} : vector<8x8xf32>, vector<8x8xf32>, vector<8x8xf32> -> vector<8x8xf32>
    %cst_214 = arith.constant 0.353553385 : f32
    %509 = vector.broadcast %cst_214 : f32 to vector<8x8xf32>
    %510 = arith.mulf %508, %509 : vector<8x8xf32>
    %511 = vector.broadcast %7 : vector<1x8xf32> to vector<8x8xf32>
    %512 = arith.addf %510, %511 : vector<8x8xf32>
    %cst_215 = arith.constant dense<0xFF800000> : vector<8xf32>
    %513 = vector.multi_reduction <maximumf>, %512, %cst_215 [1] : vector<8x8xf32> to vector<8xf32>
    %514 = vector.shape_cast %513 : vector<8xf32> to vector<8x1xf32>
    %515 = vector.broadcast %514 : vector<8x1xf32> to vector<8x8xf32>
    %516 = arith.subf %512, %515 : vector<8x8xf32>
    %517 = math.exp %516 : vector<8x8xf32>
    %cst_216 = arith.constant dense<0.000000e+00> : vector<8xf32>
    %518 = vector.multi_reduction <add>, %517, %cst_216 [1] : vector<8x8xf32> to vector<8xf32>
    %519 = vector.shape_cast %518 : vector<8xf32> to vector<8x1xf32>
    %520 = tpu.reciprocal %519 {approx = true} : vector<8x1xf32> -> vector<8x1xf32>
    %521 = arith.mulf %519, %520 : vector<8x1xf32>
    %cst_217 = arith.constant 2.000000e+00 : f32
    %522 = vector.broadcast %cst_217 : f32 to vector<8x1xf32>
    %523 = arith.subf %522, %521 : vector<8x1xf32>
    %524 = arith.mulf %520, %523 : vector<8x1xf32>
    %525 = vector.broadcast %524 : vector<8x1xf32> to vector<8x8xf32>
    %526 = arith.mulf %517, %525 : vector<8x8xf32>
    %cst_218 = arith.constant dense<0.000000e+00> : vector<8x8xf32>
    %527 = tpu.matmul %526, %507, %cst_218 {dimension_numbers = #tpu.dot_dimension_numbers<[1], [0], [0], [1], [0, 0, 1, 1], [], []>} : vector<8x8xf32>, vector<8x8xf32>, vector<8x8xf32> -> vector<8x8xf32>
    %528 = vector.extract_strided_slice %504 {offsets = [0, 0], sizes = [8, 32], strides = [1, 1]} : vector<32x32xf32> to vector<8x32xf32>
    %cst_219 = arith.constant dense<0.000000e+00> : vector<8x32xf32>
    %529 = tpu.matmul %527, %528, %cst_219 {dimension_numbers = #tpu.dot_dimension_numbers<[1], [0], [0], [1], [0, 0, 1, 1], [], []>} : vector<8x8xf32>, vector<8x32xf32>, vector<8x32xf32> -> vector<8x32xf32>
    %530 = vector.extract_strided_slice %493 {offsets = [0, 8], sizes = [8, 8], strides = [1, 1]} : vector<8x32xf32> to vector<8x8xf32>
    %531 = vector.extract_strided_slice %501 {offsets = [0, 8], sizes = [8, 8], strides = [1, 1]} : vector<8x32xf32> to vector<8x8xf32>
    %532 = vector.extract_strided_slice %502 {offsets = [0, 8], sizes = [8, 8], strides = [1, 1]} : vector<8x32xf32> to vector<8x8xf32>
    %cst_220 = arith.constant dense<0.000000e+00> : vector<8x8xf32>
    %533 = tpu.matmul %530, %531, %cst_220 {dimension_numbers = #tpu.dot_dimension_numbers<[1], [1], [0], [0], [0, 0, 1, 0], [], []>} : vector<8x8xf32>, vector<8x8xf32>, vector<8x8xf32> -> vector<8x8xf32>
    %cst_221 = arith.constant 0.353553385 : f32
    %534 = vector.broadcast %cst_221 : f32 to vector<8x8xf32>
    %535 = arith.mulf %533, %534 : vector<8x8xf32>
    %536 = vector.broadcast %7 : vector<1x8xf32> to vector<8x8xf32>
    %537 = arith.addf %535, %536 : vector<8x8xf32>
    %cst_222 = arith.constant dense<0xFF800000> : vector<8xf32>
    %538 = vector.multi_reduction <maximumf>, %537, %cst_222 [1] : vector<8x8xf32> to vector<8xf32>
    %539 = vector.shape_cast %538 : vector<8xf32> to vector<8x1xf32>
    %540 = vector.broadcast %539 : vector<8x1xf32> to vector<8x8xf32>
    %541 = arith.subf %537, %540 : vector<8x8xf32>
    %542 = math.exp %541 : vector<8x8xf32>
    %cst_223 = arith.constant dense<0.000000e+00> : vector<8xf32>
    %543 = vector.multi_reduction <add>, %542, %cst_223 [1] : vector<8x8xf32> to vector<8xf32>
    %544 = vector.shape_cast %543 : vector<8xf32> to vector<8x1xf32>
    %545 = tpu.reciprocal %544 {approx = true} : vector<8x1xf32> -> vector<8x1xf32>
    %546 = arith.mulf %544, %545 : vector<8x1xf32>
    %cst_224 = arith.constant 2.000000e+00 : f32
    %547 = vector.broadcast %cst_224 : f32 to vector<8x1xf32>
    %548 = arith.subf %547, %546 : vector<8x1xf32>
    %549 = arith.mulf %545, %548 : vector<8x1xf32>
    %550 = vector.broadcast %549 : vector<8x1xf32> to vector<8x8xf32>
    %551 = arith.mulf %542, %550 : vector<8x8xf32>
    %cst_225 = arith.constant dense<0.000000e+00> : vector<8x8xf32>
    %552 = tpu.matmul %551, %532, %cst_225 {dimension_numbers = #tpu.dot_dimension_numbers<[1], [0], [0], [1], [0, 0, 1, 1], [], []>} : vector<8x8xf32>, vector<8x8xf32>, vector<8x8xf32> -> vector<8x8xf32>
    %553 = vector.extract_strided_slice %504 {offsets = [8, 0], sizes = [8, 32], strides = [1, 1]} : vector<32x32xf32> to vector<8x32xf32>
    %cst_226 = arith.constant dense<0.000000e+00> : vector<8x32xf32>
    %554 = tpu.matmul %552, %553, %cst_226 {dimension_numbers = #tpu.dot_dimension_numbers<[1], [0], [0], [1], [0, 0, 1, 1], [], []>} : vector<8x8xf32>, vector<8x32xf32>, vector<8x32xf32> -> vector<8x32xf32>
    %555 = arith.addf %529, %554 : vector<8x32xf32>
    %556 = vector.extract_strided_slice %493 {offsets = [0, 16], sizes = [8, 8], strides = [1, 1]} : vector<8x32xf32> to vector<8x8xf32>
    %557 = vector.extract_strided_slice %501 {offsets = [0, 16], sizes = [8, 8], strides = [1, 1]} : vector<8x32xf32> to vector<8x8xf32>
    %558 = vector.extract_strided_slice %502 {offsets = [0, 16], sizes = [8, 8], strides = [1, 1]} : vector<8x32xf32> to vector<8x8xf32>
    %cst_227 = arith.constant dense<0.000000e+00> : vector<8x8xf32>
    %559 = tpu.matmul %556, %557, %cst_227 {dimension_numbers = #tpu.dot_dimension_numbers<[1], [1], [0], [0], [0, 0, 1, 0], [], []>} : vector<8x8xf32>, vector<8x8xf32>, vector<8x8xf32> -> vector<8x8xf32>
    %cst_228 = arith.constant 0.353553385 : f32
    %560 = vector.broadcast %cst_228 : f32 to vector<8x8xf32>
    %561 = arith.mulf %559, %560 : vector<8x8xf32>
    %562 = vector.broadcast %7 : vector<1x8xf32> to vector<8x8xf32>
    %563 = arith.addf %561, %562 : vector<8x8xf32>
    %cst_229 = arith.constant dense<0xFF800000> : vector<8xf32>
    %564 = vector.multi_reduction <maximumf>, %563, %cst_229 [1] : vector<8x8xf32> to vector<8xf32>
    %565 = vector.shape_cast %564 : vector<8xf32> to vector<8x1xf32>
    %566 = vector.broadcast %565 : vector<8x1xf32> to vector<8x8xf32>
    %567 = arith.subf %563, %566 : vector<8x8xf32>
    %568 = math.exp %567 : vector<8x8xf32>
    %cst_230 = arith.constant dense<0.000000e+00> : vector<8xf32>
    %569 = vector.multi_reduction <add>, %568, %cst_230 [1] : vector<8x8xf32> to vector<8xf32>
    %570 = vector.shape_cast %569 : vector<8xf32> to vector<8x1xf32>
    %571 = tpu.reciprocal %570 {approx = true} : vector<8x1xf32> -> vector<8x1xf32>
    %572 = arith.mulf %570, %571 : vector<8x1xf32>
    %cst_231 = arith.constant 2.000000e+00 : f32
    %573 = vector.broadcast %cst_231 : f32 to vector<8x1xf32>
    %574 = arith.subf %573, %572 : vector<8x1xf32>
    %575 = arith.mulf %571, %574 : vector<8x1xf32>
    %576 = vector.broadcast %575 : vector<8x1xf32> to vector<8x8xf32>
    %577 = arith.mulf %568, %576 : vector<8x8xf32>
    %cst_232 = arith.constant dense<0.000000e+00> : vector<8x8xf32>
    %578 = tpu.matmul %577, %558, %cst_232 {dimension_numbers = #tpu.dot_dimension_numbers<[1], [0], [0], [1], [0, 0, 1, 1], [], []>} : vector<8x8xf32>, vector<8x8xf32>, vector<8x8xf32> -> vector<8x8xf32>
    %579 = vector.extract_strided_slice %504 {offsets = [16, 0], sizes = [8, 32], strides = [1, 1]} : vector<32x32xf32> to vector<8x32xf32>
    %cst_233 = arith.constant dense<0.000000e+00> : vector<8x32xf32>
    %580 = tpu.matmul %578, %579, %cst_233 {dimension_numbers = #tpu.dot_dimension_numbers<[1], [0], [0], [1], [0, 0, 1, 1], [], []>} : vector<8x8xf32>, vector<8x32xf32>, vector<8x32xf32> -> vector<8x32xf32>
    %581 = arith.addf %555, %580 : vector<8x32xf32>
    %582 = vector.extract_strided_slice %493 {offsets = [0, 24], sizes = [8, 8], strides = [1, 1]} : vector<8x32xf32> to vector<8x8xf32>
    %583 = vector.extract_strided_slice %501 {offsets = [0, 24], sizes = [8, 8], strides = [1, 1]} : vector<8x32xf32> to vector<8x8xf32>
    %584 = vector.extract_strided_slice %502 {offsets = [0, 24], sizes = [8, 8], strides = [1, 1]} : vector<8x32xf32> to vector<8x8xf32>
    %cst_234 = arith.constant dense<0.000000e+00> : vector<8x8xf32>
    %585 = tpu.matmul %582, %583, %cst_234 {dimension_numbers = #tpu.dot_dimension_numbers<[1], [1], [0], [0], [0, 0, 1, 0], [], []>} : vector<8x8xf32>, vector<8x8xf32>, vector<8x8xf32> -> vector<8x8xf32>
    %cst_235 = arith.constant 0.353553385 : f32
    %586 = vector.broadcast %cst_235 : f32 to vector<8x8xf32>
    %587 = arith.mulf %585, %586 : vector<8x8xf32>
    %588 = vector.broadcast %7 : vector<1x8xf32> to vector<8x8xf32>
    %589 = arith.addf %587, %588 : vector<8x8xf32>
    %cst_236 = arith.constant dense<0xFF800000> : vector<8xf32>
    %590 = vector.multi_reduction <maximumf>, %589, %cst_236 [1] : vector<8x8xf32> to vector<8xf32>
    %591 = vector.shape_cast %590 : vector<8xf32> to vector<8x1xf32>
    %592 = vector.broadcast %591 : vector<8x1xf32> to vector<8x8xf32>
    %593 = arith.subf %589, %592 : vector<8x8xf32>
    %594 = math.exp %593 : vector<8x8xf32>
    %cst_237 = arith.constant dense<0.000000e+00> : vector<8xf32>
    %595 = vector.multi_reduction <add>, %594, %cst_237 [1] : vector<8x8xf32> to vector<8xf32>
    %596 = vector.shape_cast %595 : vector<8xf32> to vector<8x1xf32>
    %597 = tpu.reciprocal %596 {approx = true} : vector<8x1xf32> -> vector<8x1xf32>
    %598 = arith.mulf %596, %597 : vector<8x1xf32>
    %cst_238 = arith.constant 2.000000e+00 : f32
    %599 = vector.broadcast %cst_238 : f32 to vector<8x1xf32>
    %600 = arith.subf %599, %598 : vector<8x1xf32>
    %601 = arith.mulf %597, %600 : vector<8x1xf32>
    %602 = vector.broadcast %601 : vector<8x1xf32> to vector<8x8xf32>
    %603 = arith.mulf %594, %602 : vector<8x8xf32>
    %cst_239 = arith.constant dense<0.000000e+00> : vector<8x8xf32>
    %604 = tpu.matmul %603, %584, %cst_239 {dimension_numbers = #tpu.dot_dimension_numbers<[1], [0], [0], [1], [0, 0, 1, 1], [], []>} : vector<8x8xf32>, vector<8x8xf32>, vector<8x8xf32> -> vector<8x8xf32>
    %605 = vector.extract_strided_slice %504 {offsets = [24, 0], sizes = [8, 32], strides = [1, 1]} : vector<32x32xf32> to vector<8x32xf32>
    %cst_240 = arith.constant dense<0.000000e+00> : vector<8x32xf32>
    %606 = tpu.matmul %604, %605, %cst_240 {dimension_numbers = #tpu.dot_dimension_numbers<[1], [0], [0], [1], [0, 0, 1, 1], [], []>} : vector<8x8xf32>, vector<8x32xf32>, vector<8x32xf32> -> vector<8x32xf32>
    %607 = arith.addf %581, %606 : vector<8x32xf32>
    %c1_241 = arith.constant 1 : index
    %c0_242 = arith.constant 0 : index
    %c0_243 = arith.constant 0 : index
    %608 = vector.load %arg14[%c1_241, %c0_242, %c0_243] : memref<2x1x32xf32, #tpu.memory_space<vmem>>, vector<1x1x32xf32>
    %609 = vector.shape_cast %608 : vector<1x1x32xf32> to vector<1x32xf32>
    %610 = vector.broadcast %609 : vector<1x32xf32> to vector<8x32xf32>
    %611 = arith.addf %607, %610 : vector<8x32xf32>
    %612 = arith.addf %486, %611 : vector<8x32xf32>
    %c4 = arith.constant 4 : index
    %c0_244 = arith.constant 0 : index
    %c0_245 = arith.constant 0 : index
    %613 = vector.load %arg19[%c4, %c0_244, %c0_245] : memref<6x1x32xf32, #tpu.memory_space<vmem>>, vector<1x1x32xf32>
    %614 = vector.shape_cast %613 : vector<1x1x32xf32> to vector<1x32xf32>
    %c4_246 = arith.constant 4 : index
    %c0_247 = arith.constant 0 : index
    %c0_248 = arith.constant 0 : index
    %615 = vector.load %arg20[%c4_246, %c0_247, %c0_248] : memref<6x1x32xf32, #tpu.memory_space<vmem>>, vector<1x1x32xf32>
    %616 = vector.shape_cast %615 : vector<1x1x32xf32> to vector<1x32xf32>
    %cst_249 = arith.constant dense<0.000000e+00> : vector<8xf32>
    %617 = vector.multi_reduction <add>, %612, %cst_249 [1] : vector<8x32xf32> to vector<8xf32>
    %618 = vector.shape_cast %617 : vector<8xf32> to vector<8x1xf32>
    %cst_250 = arith.constant 3.200000e+01 : f32
    %619 = vector.broadcast %cst_250 : f32 to vector<8x1xf32>
    %620 = arith.divf %618, %619 : vector<8x1xf32>
    %621 = vector.broadcast %620 : vector<8x1xf32> to vector<8x32xf32>
    %622 = arith.subf %612, %621 : vector<8x32xf32>
    %623 = arith.mulf %622, %622 : vector<8x32xf32>
    %cst_251 = arith.constant dense<0.000000e+00> : vector<8xf32>
    %624 = vector.multi_reduction <add>, %623, %cst_251 [1] : vector<8x32xf32> to vector<8xf32>
    %625 = vector.shape_cast %624 : vector<8xf32> to vector<8x1xf32>
    %cst_252 = arith.constant 3.200000e+01 : f32
    %626 = vector.broadcast %cst_252 : f32 to vector<8x1xf32>
    %627 = arith.divf %625, %626 : vector<8x1xf32>
    %628 = vector.broadcast %620 : vector<8x1xf32> to vector<8x32xf32>
    %629 = arith.subf %612, %628 : vector<8x32xf32>
    %cst_253 = arith.constant 9.99999974E-6 : f32
    %630 = vector.broadcast %cst_253 : f32 to vector<8x1xf32>
    %631 = arith.addf %627, %630 : vector<8x1xf32>
    %632 = math.rsqrt %631 : vector<8x1xf32>
    %633 = vector.broadcast %632 : vector<8x1xf32> to vector<8x32xf32>
    %634 = arith.mulf %629, %633 : vector<8x32xf32>
    %635 = vector.broadcast %614 : vector<1x32xf32> to vector<8x32xf32>
    %636 = arith.mulf %634, %635 : vector<8x32xf32>
    %637 = vector.broadcast %616 : vector<1x32xf32> to vector<8x32xf32>
    %638 = arith.addf %636, %637 : vector<8x32xf32>
    %c1_254 = arith.constant 1 : index
    %c0_255 = arith.constant 0 : index
    %c0_256 = arith.constant 0 : index
    %639 = vector.load %arg15[%c1_254, %c0_255, %c0_256] : memref<2x32x64xf32, #tpu.memory_space<vmem>>, vector<1x32x64xf32>
    %640 = vector.shape_cast %639 : vector<1x32x64xf32> to vector<32x64xf32>
    %cst_257 = arith.constant dense<0.000000e+00> : vector<8x64xf32>
    %641 = tpu.matmul %638, %640, %cst_257 {dimension_numbers = #tpu.dot_dimension_numbers<[1], [0], [0], [1], [0, 0, 1, 1], [], []>} : vector<8x32xf32>, vector<32x64xf32>, vector<8x64xf32> -> vector<8x64xf32>
    %c1_258 = arith.constant 1 : index
    %c0_259 = arith.constant 0 : index
    %c0_260 = arith.constant 0 : index
    %642 = vector.load %arg16[%c1_258, %c0_259, %c0_260] : memref<2x1x64xf32, #tpu.memory_space<vmem>>, vector<1x1x64xf32>
    %643 = vector.shape_cast %642 : vector<1x1x64xf32> to vector<1x64xf32>
    %644 = vector.broadcast %643 : vector<1x64xf32> to vector<8x64xf32>
    %645 = arith.addf %641, %644 : vector<8x64xf32>
    %cst_261 = arith.constant 0.000000e+00 : f32
    %646 = vector.broadcast %cst_261 : f32 to vector<8x64xf32>
    %647 = arith.maximumf %645, %646 : vector<8x64xf32>
    %c1_262 = arith.constant 1 : index
    %c0_263 = arith.constant 0 : index
    %c0_264 = arith.constant 0 : index
    %648 = vector.load %arg17[%c1_262, %c0_263, %c0_264] : memref<2x64x32xf32, #tpu.memory_space<vmem>>, vector<1x64x32xf32>
    %649 = vector.shape_cast %648 : vector<1x64x32xf32> to vector<64x32xf32>
    %cst_265 = arith.constant dense<0.000000e+00> : vector<8x32xf32>
    %650 = tpu.matmul %647, %649, %cst_265 {dimension_numbers = #tpu.dot_dimension_numbers<[1], [0], [0], [1], [0, 0, 1, 1], [], []>} : vector<8x64xf32>, vector<64x32xf32>, vector<8x32xf32> -> vector<8x32xf32>
    %c1_266 = arith.constant 1 : index
    %c0_267 = arith.constant 0 : index
    %c0_268 = arith.constant 0 : index
    %651 = vector.load %arg18[%c1_266, %c0_267, %c0_268] : memref<2x1x32xf32, #tpu.memory_space<vmem>>, vector<1x1x32xf32>
    %652 = vector.shape_cast %651 : vector<1x1x32xf32> to vector<1x32xf32>
    %653 = vector.broadcast %652 : vector<1x32xf32> to vector<8x32xf32>
    %654 = arith.addf %650, %653 : vector<8x32xf32>
    %655 = arith.addf %638, %654 : vector<8x32xf32>
    %c5 = arith.constant 5 : index
    %c0_269 = arith.constant 0 : index
    %c0_270 = arith.constant 0 : index
    %656 = vector.load %arg19[%c5, %c0_269, %c0_270] : memref<6x1x32xf32, #tpu.memory_space<vmem>>, vector<1x1x32xf32>
    %657 = vector.shape_cast %656 : vector<1x1x32xf32> to vector<1x32xf32>
    %c5_271 = arith.constant 5 : index
    %c0_272 = arith.constant 0 : index
    %c0_273 = arith.constant 0 : index
    %658 = vector.load %arg20[%c5_271, %c0_272, %c0_273] : memref<6x1x32xf32, #tpu.memory_space<vmem>>, vector<1x1x32xf32>
    %659 = vector.shape_cast %658 : vector<1x1x32xf32> to vector<1x32xf32>
    %cst_274 = arith.constant dense<0.000000e+00> : vector<8xf32>
    %660 = vector.multi_reduction <add>, %655, %cst_274 [1] : vector<8x32xf32> to vector<8xf32>
    %661 = vector.shape_cast %660 : vector<8xf32> to vector<8x1xf32>
    %cst_275 = arith.constant 3.200000e+01 : f32
    %662 = vector.broadcast %cst_275 : f32 to vector<8x1xf32>
    %663 = arith.divf %661, %662 : vector<8x1xf32>
    %664 = vector.broadcast %663 : vector<8x1xf32> to vector<8x32xf32>
    %665 = arith.subf %655, %664 : vector<8x32xf32>
    %666 = arith.mulf %665, %665 : vector<8x32xf32>
    %cst_276 = arith.constant dense<0.000000e+00> : vector<8xf32>
    %667 = vector.multi_reduction <add>, %666, %cst_276 [1] : vector<8x32xf32> to vector<8xf32>
    %668 = vector.shape_cast %667 : vector<8xf32> to vector<8x1xf32>
    %cst_277 = arith.constant 3.200000e+01 : f32
    %669 = vector.broadcast %cst_277 : f32 to vector<8x1xf32>
    %670 = arith.divf %668, %669 : vector<8x1xf32>
    %671 = vector.broadcast %663 : vector<8x1xf32> to vector<8x32xf32>
    %672 = arith.subf %655, %671 : vector<8x32xf32>
    %cst_278 = arith.constant 9.99999974E-6 : f32
    %673 = vector.broadcast %cst_278 : f32 to vector<8x1xf32>
    %674 = arith.addf %670, %673 : vector<8x1xf32>
    %675 = math.rsqrt %674 : vector<8x1xf32>
    %676 = vector.broadcast %675 : vector<8x1xf32> to vector<8x32xf32>
    %677 = arith.mulf %672, %676 : vector<8x32xf32>
    %678 = vector.broadcast %657 : vector<1x32xf32> to vector<8x32xf32>
    %679 = arith.mulf %677, %678 : vector<8x32xf32>
    %680 = vector.broadcast %659 : vector<1x32xf32> to vector<8x32xf32>
    %681 = arith.addf %679, %680 : vector<8x32xf32>
    %c0_279 = arith.constant 0 : index
    %c0_280 = arith.constant 0 : index
    %c0_281 = arith.constant 0 : index
    %682 = vector.load %arg21[%c0_279, %c0_280, %c0_281] : memref<1x8x32xf32, #tpu.memory_space<vmem>>, vector<1x8x32xf32>
    %683 = vector.shape_cast %682 : vector<1x8x32xf32> to vector<8x32xf32>
    %684 = vector.shape_cast %681 : vector<8x32xf32> to vector<1x8x32xf32>
    tpu.vector_store %arg21[%c0_279, %c0_280, %c0_281], %684 {strides = array<i32>} : memref<1x8x32xf32, #tpu.memory_space<vmem>>, vector<1x8x32xf32>,
    return
  }
  func.func @transform_0(%arg0: i32) -> (i32, i32, i32) {
    %c0_i32 = arith.constant 0 : i32
    %c0_i32_0 = arith.constant 0 : i32
    %c0_i32_1 = arith.constant 0 : i32
    return %arg0, %c0_i32, %c0_i32_0 : i32, i32, i32
  }
  func.func @transform_1(%arg0: i32) -> (i32, i32, i32) {
    %c0_i32 = arith.constant 0 : i32
    %c0_i32_0 = arith.constant 0 : i32
    %c0_i32_1 = arith.constant 0 : i32
    return %arg0, %c0_i32, %c0_i32_0 : i32, i32, i32
  }
  func.func @transform_2(%arg0: i32) -> (i32, i32, i32) {
    %c0_i32 = arith.constant 0 : i32
    %c0_i32_0 = arith.constant 0 : i32
    %c0_i32_1 = arith.constant 0 : i32
    return %arg0, %c0_i32, %c0_i32_0 : i32, i32, i32
  }
  func.func @transform_3(%arg0: i32) -> (i32, i32, i32) {
    %c0_i32 = arith.constant 0 : i32
    %c0_i32_0 = arith.constant 0 : i32
    %c0_i32_1 = arith.constant 0 : i32
    return %arg0, %c0_i32, %c0_i32_0 : i32, i32, i32
  }
  func.func @transform_4(%arg0: i32) -> (i32, i32, i32) {
    %c0_i32 = arith.constant 0 : i32
    %c0_i32_0 = arith.constant 0 : i32
    %c0_i32_1 = arith.constant 0 : i32
    %c0_i32_2 = arith.constant 0 : i32
    return %c0_i32, %c0_i32_0, %c0_i32_1 : i32, i32, i32
  }
  func.func @transform_5(%arg0: i32) -> (i32, i32, i32) {
    %c0_i32 = arith.constant 0 : i32
    %c0_i32_0 = arith.constant 0 : i32
    %c0_i32_1 = arith.constant 0 : i32
    %c0_i32_2 = arith.constant 0 : i32
    return %c0_i32, %c0_i32_0, %c0_i32_1 : i32, i32, i32
  }
  func.func @transform_6(%arg0: i32) -> (i32, i32, i32) {
    %c0_i32 = arith.constant 0 : i32
    %c0_i32_0 = arith.constant 0 : i32
    %c0_i32_1 = arith.constant 0 : i32
    %c0_i32_2 = arith.constant 0 : i32
    return %c0_i32, %c0_i32_0, %c0_i32_1 : i32, i32, i32
  }
  func.func @transform_7(%arg0: i32) -> (i32, i32, i32) {
    %c0_i32 = arith.constant 0 : i32
    %c0_i32_0 = arith.constant 0 : i32
    %c0_i32_1 = arith.constant 0 : i32
    %c0_i32_2 = arith.constant 0 : i32
    return %c0_i32, %c0_i32_0, %c0_i32_1 : i32, i32, i32
  }
  func.func @transform_8(%arg0: i32) -> (i32, i32, i32) {
    %c0_i32 = arith.constant 0 : i32
    %c0_i32_0 = arith.constant 0 : i32
    %c0_i32_1 = arith.constant 0 : i32
    %c0_i32_2 = arith.constant 0 : i32
    return %c0_i32, %c0_i32_0, %c0_i32_1 : i32, i32, i32
  }
  func.func @transform_9(%arg0: i32) -> (i32, i32, i32) {
    %c0_i32 = arith.constant 0 : i32
    %c0_i32_0 = arith.constant 0 : i32
    %c0_i32_1 = arith.constant 0 : i32
    %c0_i32_2 = arith.constant 0 : i32
    return %c0_i32, %c0_i32_0, %c0_i32_1 : i32, i32, i32
  }
  func.func @transform_10(%arg0: i32) -> (i32, i32, i32) {
    %c0_i32 = arith.constant 0 : i32
    %c0_i32_0 = arith.constant 0 : i32
    %c0_i32_1 = arith.constant 0 : i32
    %c0_i32_2 = arith.constant 0 : i32
    return %c0_i32, %c0_i32_0, %c0_i32_1 : i32, i32, i32
  }
  func.func @transform_11(%arg0: i32) -> (i32, i32, i32) {
    %c0_i32 = arith.constant 0 : i32
    %c0_i32_0 = arith.constant 0 : i32
    %c0_i32_1 = arith.constant 0 : i32
    %c0_i32_2 = arith.constant 0 : i32
    return %c0_i32, %c0_i32_0, %c0_i32_1 : i32, i32, i32
  }
  func.func @transform_12(%arg0: i32) -> (i32, i32, i32) {
    %c0_i32 = arith.constant 0 : i32
    %c0_i32_0 = arith.constant 0 : i32
    %c0_i32_1 = arith.constant 0 : i32
    %c0_i32_2 = arith.constant 0 : i32
    return %c0_i32, %c0_i32_0, %c0_i32_1 : i32, i32, i32
  }
  func.func @transform_13(%arg0: i32) -> (i32, i32, i32) {
    %c0_i32 = arith.constant 0 : i32
    %c0_i32_0 = arith.constant 0 : i32
    %c0_i32_1 = arith.constant 0 : i32
    %c0_i32_2 = arith.constant 0 : i32
    return %c0_i32, %c0_i32_0, %c0_i32_1 : i32, i32, i32
  }
  func.func @transform_14(%arg0: i32) -> (i32, i32, i32) {
    %c0_i32 = arith.constant 0 : i32
    %c0_i32_0 = arith.constant 0 : i32
    %c0_i32_1 = arith.constant 0 : i32
    %c0_i32_2 = arith.constant 0 : i32
    return %c0_i32, %c0_i32_0, %c0_i32_1 : i32, i32, i32
  }
  func.func @transform_15(%arg0: i32) -> (i32, i32, i32) {
    %c0_i32 = arith.constant 0 : i32
    %c0_i32_0 = arith.constant 0 : i32
    %c0_i32_1 = arith.constant 0 : i32
    %c0_i32_2 = arith.constant 0 : i32
    return %c0_i32, %c0_i32_0, %c0_i32_1 : i32, i32, i32
  }
  func.func @transform_16(%arg0: i32) -> (i32, i32, i32) {
    %c0_i32 = arith.constant 0 : i32
    %c0_i32_0 = arith.constant 0 : i32
    %c0_i32_1 = arith.constant 0 : i32
    %c0_i32_2 = arith.constant 0 : i32
    return %c0_i32, %c0_i32_0, %c0_i32_1 : i32, i32, i32
  }
  func.func @transform_17(%arg0: i32) -> (i32, i32, i32) {
    %c0_i32 = arith.constant 0 : i32
    %c0_i32_0 = arith.constant 0 : i32
    %c0_i32_1 = arith.constant 0 : i32
    %c0_i32_2 = arith.constant 0 : i32
    return %c0_i32, %c0_i32_0, %c0_i32_1 : i32, i32, i32
  }
  func.func @transform_18(%arg0: i32) -> (i32, i32, i32) {
    %c0_i32 = arith.constant 0 : i32
    %c0_i32_0 = arith.constant 0 : i32
    %c0_i32_1 = arith.constant 0 : i32
    %c0_i32_2 = arith.constant 0 : i32
    return %c0_i32, %c0_i32_0, %c0_i32_1 : i32, i32, i32
  }
  func.func @transform_19(%arg0: i32) -> (i32, i32, i32) {
    %c0_i32 = arith.constant 0 : i32
    %c0_i32_0 = arith.constant 0 : i32
    %c0_i32_1 = arith.constant 0 : i32
    %c0_i32_2 = arith.constant 0 : i32
    return %c0_i32, %c0_i32_0, %c0_i32_1 : i32, i32, i32
  }
  func.func @transform_20(%arg0: i32) -> (i32, i32, i32) {
    %c0_i32 = arith.constant 0 : i32
    %c0_i32_0 = arith.constant 0 : i32
    %c0_i32_1 = arith.constant 0 : i32
    return %arg0, %c0_i32, %c0_i32_0 : i32, i32, i32
  }
}

</mosaic_0001>

<bundles_post_ra>
// kernel: tpu_custom_call.1
= control target key start
LH: loop header
LB: loop body
LE: loop exit
PB: predicated region body
PF: predicated region fallthrough
CT: control target
= control target key end

     0   :  { %s8263_s0 = inlined_call_operand.hbm [shape: f32[2,8,32], index: 0, kind: input, shape index: {}]   ;;  %s8264_s1 = inlined_call_operand.hbm [shape: f32[2,8,32], index: 1, kind: input, shape index: {}]   ;;  %s8265_s2 = inlined_call_operand.hbm [shape: f32[2,8,8], index: 2, kind: input, shape index: {}]   ;;  %s8266_s3 = inlined_call_operand.vmem [shape: f32[2,1,8], index: 3, kind: input, shape index: {}]   ;;  %s8267_s4 = inlined_call_operand.vmem [shape: f32[2,32,96], index: 4, kind: input, shape index: {}]   ;;  %s8268_s5 = inlined_call_operand.vmem [shape: f32[2,1,96], index: 5, kind: input, shape index: {}]   ;;  %s8269_s6 = inlined_call_operand.vmem [shape: f32[2,32,32], index: 6, kind: input, shape index: {}]   ;;  %s8270_s7 = inlined_call_operand.vmem [shape: f32[2,1,32], index: 7, kind: input, shape index: {}]   ;;  %s8271_s8 = inlined_call_operand.vmem [shape: f32[2,32,32], index: 8, kind: input, shape index: {}]   ;;  %s8272_s9 = inlined_call_operand.vmem [shape: f32[2,1,32], index: 9, kind: input, shape index: {}]   ;;  %s8273_s10 = inlined_call_operand.hbm [shape: f32[2,32,64], index: 10, kind: input, shape index: {}]   ;;  %s8274_s11 = inlined_call_operand.vmem [shape: f32[2,1,64], index: 11, kind: input, shape index: {}]   ;;  %s8275_s12 = inlined_call_operand.hbm [shape: f32[2,32,32], index: 12, kind: input, shape index: {}]   ;;  %s8276_s13 = inlined_call_operand.vmem [shape: f32[2,1,32], index: 13, kind: input, shape index: {}]   ;;  %s8277_s14 = inlined_call_operand.hbm [shape: f32[2,32,64], index: 14, kind: input, shape index: {}]   ;;  %s8278_s15 = inlined_call_operand.vmem [shape: f32[2,1,64], index: 15, kind: input, shape index: {}]   ;;  %s8279_s16 = inlined_call_operand.vmem [shape: f32[2,64,32], index: 16, kind: input, shape index: {}]   ;;  %s8280_s17 = inlined_call_operand.vmem [shape: f32[2,1,32], index: 17, kind: input, shape index: {}]   ;;  %s8281_s18 = inlined_call_operand.vmem [shape: f32[6,1,32], index: 18, kind: input, shape index: {}]   ;;  %s8282_s19 = inlined_call_operand.vmem [shape: f32[6,1,32], index: 19, kind: input, shape index: {}]   ;;  %s8283_s20 = inlined_call_operand.hbm [shape: f32[2,8,32], index: 20, kind: output, shape index: {}]  }
   0x1   :  { %8343 = sst [smem:[#allocation25_spill]] %s8263_s0 }
   0x2   :  { %8344 = sst [smem:[#allocation26_spill]] %s8264_s1 }
   0x3   :  { %8345 = sst [smem:[#allocation27_spill]] %s8265_s2 }
   0x4   :  { %8346 = sst [smem:[#allocation28_spill]] %s8266_s3 }
   0x5   :  { %8347 = sst [smem:[#allocation29_spill]] %s8267_s4 }
   0x6   :  { %8348 = sst [smem:[#allocation30_spill]] %s8268_s5 }
   0x7   :  { %8349 = sst [smem:[#allocation31_spill]] %s8269_s6 }
   0x8   :  { %8350 = sst [smem:[#allocation32_spill]] %s8270_s7 }
   0x9   :  { %8351 = sst [smem:[#allocation33_spill]] %s8272_s9 }
   0xa   :  { %8352 = sst [smem:[#allocation34_spill]] %s8273_s10 }
   0xb   :  { %8353 = sst [smem:[#allocation35_spill]] %s8274_s11 }
   0xc   :  { %8354 = sst [smem:[#allocation36_spill]] %s8275_s12 }
   0xd   :  { %8355 = sst [smem:[#allocation37_spill]] %s8276_s13 }
   0xe   :  { %8356 = sst [smem:[#allocation38_spill]] %s8277_s14 }
   0xf   :  { %8357 = sst [smem:[#allocation39_spill]] %s8278_s15 }
  0x10   :  { %8358 = sst [smem:[#allocation40_spill]] %s8279_s16 }
  0x11   :  { %8359 = sst [smem:[#allocation41_spill]] %s8280_s17 }
  0x12   :  { %8360 = sst [smem:[#allocation42_spill]] %s8281_s18 }
  0x13   :  { %8361 = sst [smem:[#allocation43_spill]] %s8282_s19 }
  0x14   :  { %8362 = sst [smem:[#allocation44_spill]] %s8283_s20 }
  0x15   :  { %25 = vsyncpa [#allocation3], 0 }
  0x16   :  { %27 = vsyncpa [#allocation3 + $0x1], 0 }
  0x17   :  { %28 = vsyncpa [#allocation6], 0 }
  0x18   :  { %30 = vsyncpa [#allocation6 + $0x1], 0 }
  0x19   :  { %31 = vsyncpa [#allocation9], 0 }
  0x1a   :  { %32 = vsyncpa [#allocation12], 0 }
  0x1b   :  { %33 = vsyncpa [#allocation4], 0 }
  0x1c   :  { %35 = vsyncpa [#allocation4 + $0x1], 0  ;;  %s7260_s1 = smov 0   ;;  %s7262_s22 = smov 0  }
  0x1d   :  { %s7264_s23 = smov 0   ;;  %s7266_s24 = smov 0  }
  0x1e LB: > { %8363 = sst [smem:[#allocation19_spill]] %s7118_s1  ;;  %s7281_s2 = sadd.s32 4294967295, %s7130_s24   ;;  %s7130_s24 = sphi %s7266_s24, %s8432_s24   ;;  %s7126_s23 = sphi %s7264_s23, %s8436_s23   ;;  %s7122_s22 = sphi %s7262_s22, %s8435_s22   ;;  %s7118_s1 = sphi %s7260_s1, %s8434_s1  }
  0x1f   : > { %8364 = sst [smem:[#allocation20_spill]] %s7130_s24  ;;  %s5943_s25 = sadd.s32 4294967294, %s7130_s24  }
  0x20   : > { %p61_p0 = scmp.ne.s32.totalorder %s7122_s22, %s7118_s1  ;;  %p8294_p1 = scmp.eq.s32.totalorder %s7281_s2, 0 }
  0x21   : > { %p505_p3 = scmp.eq.s32.totalorder %s5943_s25, 1  ;;  %p5944_p5 = scmp.ge.s32.totalorder %s7130_s24, 1 }
  0x22   : > { %p7290_p4 = por %p8294_p1, %p61_p0  ;;  %p512_p7 = scmp.lt.s32.totalorder %s7130_s24, 3 }
  0x23   : > { %p7295_p6 = por %p505_p3, %p61_p0  ;;  %s7132_s28 = smov [#allocation8]  }
  0x24   : > { %s8365_s3 = scalar_select %p7290_p4, 1, 0 }
  0x25   : > { %s8366_s26 = scalar_select %p7295_p6, 1, 0 }
  0x26   : > { %p7300_p8 = pnand %p5944_p5, %p512_p7  ;;  %s542_s4 = sshll.u32 %s7132_s28, 4  ;;  %s7304_s4 = int_to_ptr.vmem [resolvable:$true] %s542_s4 }
  0x27   : > { %8367 = sst [smem:[#allocation21_spill]] %s8366_s26  ;;  %s7316_s30 = sadd.s32 1, %s7130_s24  }
  0x28   : > { %s8368_s27 = scalar_select %p7300_p8, 1, 0 }
  0x29   : > { %p6717_p9 = pneg %p7300_p8  ;;  %8370 = sst [smem:[#allocation22_spill]] %s7316_s30 }
  0x2a   : > { %s48_s0 = sadd.s32 1, %s7126_s23  ;;  %s45_s21 = ssub.s32 %s7130_s24, %s7316_s30 }
  0x2b   : > { %p7311_p11 = pnand %p6717_p9, %p8294_p1  ;;  %s8371_s10 = sld [smem:[#allocation34_spill]] }
  0x2d   : > { %s8369_s29 = scalar_select %p7311_p11, 1, 0 }
  0x2e   : > { %p7329_p13 = pneg %p7311_p11 }
  0x30   : > { %s8372_s17 = scalar_select %p7329_p13, 1, 0 }
  0x31   : > { %s6878_s28 = scalar_lea.hbm %s8371_s10, 1024 }
  0x32   : > { %p6879_p12 = scmp.ne.s32.totalorder %s8371_s10, %s6878_s28  ;;  %p6885_p5 = scmp.lt.u32.totalorder %s6878_s28, %s8371_s10 }
  0x34   : > { %p6881_p0 = pnand %p7329_p13, %p6879_p12 }
  0x36   : > { %p6882_p3 = pneg %p6881_p0 }
  0x38   : > { %p6887_p7 = pnand %p6885_p5, %p6882_p3 }
  0x3a   : > { %6890 = shalt.err (!%p6887_p7)
}
  0x3b   : > { %s6891_s20 = scalar_lea.vmem %s7304_s4, 1024  ;;  %p6899_p2 = scmp.lt.s32.totalorder %s7304_s4, %s7304_s4 }
  0x3c   : > { %p6892_p9 = scmp.ne.s32.totalorder %s7304_s4, %s6891_s20  ;;  %p6900_p6 = scmp.lt.s32.totalorder %s6891_s20, %s6891_s20 }
  0x3e   : > { %p6894_p10 = pnand %p6892_p9, %p7329_p13  ;;  %p6901_p12 = por %p6900_p6, %p6899_p2 }
  0x40   : > { %p6895_p1 = pneg %p6894_p10 }
  0x42   : > { %p6902_p0 = pnand %p6901_p12, %p6895_p1 }
  0x44   : > { %6905 = shalt.err (!%p6902_p0)
}
  0x45   : > { %s8298_s1 = smov 128   ;;  %s8300_s15 = smov 8  }
  0x46   : > { %6720 = dma.hbm_to_vmem [thread:$0]  (!%p7311_p11), %s8371_s10, 1024, %s7304_s4, [#allocation9], %s8298_s1, %s8298_s1, %s8300_s15  }
  0x47   : > { %p46_p1 = scmp.eq.s32.totalorder %s45_s21, 0  ;;  %p55_p2 = scmp.ne.s32.totalorder %s7126_s23, %s7122_s22 }
  0x48   : > { %p56_p6 = scmp.eq.s32.totalorder %s7130_s24, 0  ;;  %p6744_p10 = scmp.lt.s32.totalorder %s7130_s24, 2 }
  0x49   : > { %s7358_s25 = scalar_select %p46_p1, %s7126_s23, %s48_s0  }
  0x4a   : > { %p57_p3 = por %p56_p6, %p55_p2  ;;  %p8374_p5 = scmp.eq.s32.totalorder %s7281_s2, 1 }
  0x4b   : > { %8373 = sst [smem:[#allocation23_spill]] %s7358_s25  ;;  %s8302_s20 = sand.u32 1, %s7126_s23  }
  0x4c   : > { %p7362_p7 = por %p8374_p5, %p55_p2  ;;  %s7368_s30 = sshll.u32 %s7130_s24, 7 }
  0x4d   : > { %s7372_s13 = sshll.u32 %s8302_s20, 3  ;;  %p7374_p9 = pnand %p6744_p10, %p57_p3 }
  0x4e   : > { %s8375_s28 = scalar_select %p7362_p7, 1, 0 }
  0x4f   : > { %s8377_s4 = scalar_select %p7374_p9, 1, 0 }
  0x50   : > { %8376 = sst [smem:[#allocation24_spill]] %s8375_s28  ;;  %s621_s0 = sand.u32 1, %s7130_s24  }
  0x51   : > { %s8378_s26 = sld [smem:[#allocation26_spill]]  ;;  %s625_s15 = scalar_lea.vmem [#allocation5], %s7372_s13 }
  0x52   : > { %s632_s10 = sshll.u32 %s625_s15, 4  ;;  %s7388_s20 = scalar_lea.sflag [#allocation6], %s621_s0  ;;  %s7386_s10 = int_to_ptr.vmem [resolvable:$true] %s632_s10 }
  0x53   : > { %p7394_p0 = pneg %p7374_p9 }
  0x55   : > { %s8379_s24 = scalar_select %p7394_p0, 1, 0 }
  0x57   : > { %s7383_s1 = scalar_lea.hbm %s8378_s26, %s7368_s30  ;;  %s6911_s28 = scalar_lea.hbm %s8378_s26, 256 }
  0x58   : > { %s6906_s25 = scalar_lea.hbm %s7383_s1, 128  ;;  %p6912_p6 = scmp.lt.u32.totalorder %s7383_s1, %s8378_s26 }
  0x59   : > { %p6907_p12 = scmp.ne.s32.totalorder %s7383_s1, %s6906_s25  ;;  %p6913_p10 = scmp.lt.u32.totalorder %s6911_s28, %s6906_s25 }
  0x5a   : > { %p6915_p5 = scmp.lt.u32.totalorder %s6906_s25, %s7383_s1 }
  0x5b   : > { %p6909_p1 = pnand %p7394_p0, %p6907_p12  ;;  %p6914_p3 = por %p6913_p10, %p6912_p6 }
  0x5d   : > { %p6910_p2 = pneg %p6909_p1  ;;  %p6916_p7 = por %p6915_p5, %p6914_p3 }
  0x5f   : > { %p6917_p4 = pnand %p6916_p7, %p6910_p2 }
  0x61   : > { %6920 = shalt.err (!%p6917_p4)
}
  0x62   : > { %s6921_s0 = scalar_lea.vmem %s7386_s10, 128  ;;  %s7135_s21 = smov [#allocation5]  }
  0x63   : > { %p6922_p12 = scmp.ne.s32.totalorder %s7386_s10, %s6921_s0  ;;  %s6926_s16 = sshll.u32 %s7135_s21, 4  ;;  %s6927_s16 = int_to_ptr.vmem [resolvable:$false] %s6926_s16 }
  0x64   : > { %s6928_s9 = scalar_lea.vmem %s6927_s16, 256  ;;  %p6929_p11 = scmp.lt.s32.totalorder %s7386_s10, %s6927_s16 }
  0x65   : > { %p6924_p1 = pnand %p6922_p12, %p7394_p0  ;;  %p6930_p13 = scmp.lt.s32.totalorder %s6928_s9, %s6921_s0 }
  0x67   : > { %p6925_p8 = pneg %p6924_p1  ;;  %p6931_p6 = por %p6930_p13, %p6929_p11 }
  0x69   : > { %p6932_p10 = pnand %p6931_p6, %p6925_p8 }
  0x6b   : > { %6935 = shalt.err (!%p6932_p10)
}
  0x6c   : > { %6733 = dma.hbm_to_vmem [thread:$0]  (!%p7374_p9), %s7383_s1, 128, %s7386_s10, %s7388_s20  }
  0x6d   : > { %s7136_s25 = smov [#allocation10]   ;;  %s7137_s15 = smov [#allocation11]  }
  0x6e   : > { %s558_s28 = sshll.u32 %s7136_s25, 4  ;;  %s574_s26 = sshll.u32 %s7137_s15, 4  ;;  %s559_s28 = int_to_ptr.vmem [resolvable:$true] %s558_s28  ;;  %s575_s26 = int_to_ptr.vmem [resolvable:$true] %s574_s26 }
  0x6f   : > { %s8380_s12 = sld [smem:[#allocation36_spill]]  ;;  %p8381_p8 = scmp.ne.s32.totalorder %s8372_s17, 0 }
  0x75   : > { %s6936_s16 = scalar_lea.hbm %s8380_s12, 1024 }
  0x76   : > { %p6937_p4 = scmp.ne.s32.totalorder %s8380_s12, %s6936_s16  ;;  %p6943_p7 = scmp.lt.u32.totalorder %s6936_s16, %s8380_s12 }
  0x78   : > { %p6939_p11 = pnand %p6937_p4, %p8381_p8 }
  0x7a   : > { %p6940_p13 = pneg %p6939_p11 }
  0x7c   : > { %p6945_p2 = pnand %p6943_p7, %p6940_p13 }
  0x7e   : > { %6948 = shalt.err (!%p6945_p2)
}
  0x7f   : > { %s6949_s10 = scalar_lea.vmem %s559_s28, 1024  ;;  %p6957_p1 = scmp.lt.s32.totalorder %s559_s28, %s559_s28 }
  0x80   : > { %p6950_p3 = scmp.ne.s32.totalorder %s559_s28, %s6949_s10  ;;  %p6958_p6 = scmp.lt.s32.totalorder %s6949_s10, %s6949_s10 }
  0x82   : > { %p6952_p5 = pnand %p6950_p3, %p8381_p8  ;;  %p6959_p10 = por %p6958_p6, %p6957_p1 }
  0x84   : > { %p6953_p12 = pneg %p6952_p5 }
  0x86   : > { %p6960_p9 = pnand %p6959_p10, %p6953_p12 }
  0x88   : > { %6963 = shalt.err (!%p6960_p9)
}
  0x89   : > { %p8382_p4 = scmp.ne.s32.totalorder %s8369_s29, 0  ;;  %s8383_s11 = smov 8  }
  0x8a   : > { %s8384_s1 = smov 128   ;;  %s8385_s14 = sld [smem:[#allocation38_spill]] }
  0x8b   : > { %6723 = dma.hbm_to_vmem [thread:$0]  (!%p8382_p4), %s8380_s12, 1024, %s559_s28, [#allocation9], %s8384_s1, %s8384_s1, %s8383_s11  }
  0x90   : > { %s6964_s21 = scalar_lea.hbm %s8385_s14, 1024 }
  0x91   : > { %p6965_p11 = scmp.ne.s32.totalorder %s8385_s14, %s6964_s21  ;;  %p6971_p7 = scmp.lt.u32.totalorder %s6964_s21, %s8385_s14 }
  0x93   : > { %p6967_p9 = pnand %p6965_p11, %p8381_p8 }
  0x95   : > { %p6968_p13 = pneg %p6967_p9 }
  0x97   : > { %p6973_p2 = pnand %p6971_p7, %p6968_p13 }
  0x99   : > { %6976 = shalt.err (!%p6973_p2)
}
  0x9a   : > { %s6977_s18 = scalar_lea.vmem %s575_s26, 1024  ;;  %p6985_p1 = scmp.lt.s32.totalorder %s575_s26, %s575_s26 }
  0x9b   : > { %p6978_p3 = scmp.ne.s32.totalorder %s575_s26, %s6977_s18  ;;  %p6986_p6 = scmp.lt.s32.totalorder %s6977_s18, %s6977_s18 }
  0x9d   : > { %p6980_p5 = pnand %p6978_p3, %p8381_p8  ;;  %p6987_p10 = por %p6986_p6, %p6985_p1 }
  0x9f   : > { %p6981_p12 = pneg %p6980_p5 }
  0xa1   : > { %p6988_p0 = pnand %p6987_p10, %p6981_p12 }
  0xa3   : > { %6991 = shalt.err (!%p6988_p0)
}
  0xa4   : > { %6726 = dma.hbm_to_vmem [thread:$0]  (!%p8382_p4), %s8385_s14, 1024, %s575_s26, [#allocation12], %s8384_s1, %s8384_s1, %s8383_s11  }
  0xa5   : > { %s8386_s15 = sld [smem:[#allocation25_spill]]  ;;  %s607_s29 = scalar_lea.vmem [#allocation2], %s7372_s13 }
  0xa6   : > { %s614_s16 = sshll.u32 %s607_s29, 4  ;;  %s8387_s10 = sld [smem:[#allocation27_spill]]  ;;  %s7467_s16 = int_to_ptr.vmem [resolvable:$true] %s614_s16 }
  0xa7   : > { %s8388_s28 = sand.u32 1, %s7126_s23   ;;  %p8389_p8 = scmp.ne.s32.totalorder %s8379_s24, 0 }
  0xa8   : > { %s604_s26 = scalar_lea.sflag [#allocation3], %s8388_s28 }
  0xab   : > { %s7464_s21 = scalar_lea.hbm %s8386_s15, %s7368_s30  ;;  %s6997_s17 = scalar_lea.hbm %s8386_s15, 256 }
  0xac   : > { %s7473_s18 = scalar_lea.hbm %s8387_s10, %s7368_s30  ;;  %s6992_s11 = scalar_lea.hbm %s7464_s21, 128 }
  0xad   : > { %p6993_p0 = scmp.ne.s32.totalorder %s7464_s21, %s6992_s11  ;;  %p6998_p9 = scmp.lt.u32.totalorder %s7464_s21, %s8386_s15 }
  0xae   : > { %p6999_p13 = scmp.lt.u32.totalorder %s6997_s17, %s6992_s11  ;;  %p7001_p2 = scmp.lt.u32.totalorder %s6992_s11, %s7464_s21 }
  0xaf   : > { %p6995_p4 = pnand %p6993_p0, %p8389_p8 }
  0xb0   : > { %p7000_p7 = por %p6999_p13, %p6998_p9 }
  0xb1   : > { %p6996_p11 = pneg %p6995_p4 }
  0xb2   : > { %p7002_p3 = por %p7001_p2, %p7000_p7 }
  0xb4   : > { %p7003_p5 = pnand %p7002_p3, %p6996_p11 }
  0xb6   : > { %7006 = shalt.err (!%p7003_p5)
}
  0xb7   : > { %s7007_s30 = scalar_lea.vmem %s7467_s16, 128  ;;  %s7138_s0 = smov [#allocation2]  }
  0xb8   : > { %p7008_p12 = scmp.ne.s32.totalorder %s7467_s16, %s7007_s30  ;;  %s7012_s9 = sshll.u32 %s7138_s0, 4  ;;  %s7013_s9 = int_to_ptr.vmem [resolvable:$false] %s7012_s9 }
  0xb9   : > { %s7014_s28 = scalar_lea.vmem %s7013_s9, 256  ;;  %p7015_p10 = scmp.lt.s32.totalorder %s7467_s16, %s7013_s9 }
  0xba   : > { %p7010_p1 = pnand %p7008_p12, %p8389_p8  ;;  %p7016_p0 = scmp.lt.s32.totalorder %s7014_s28, %s7007_s30 }
  0xbc   : > { %p7011_p6 = pneg %p7010_p1  ;;  %p7017_p4 = por %p7016_p0, %p7015_p10 }
  0xbe   : > { %p7018_p9 = pnand %p7017_p4, %p7011_p6 }
  0xc0   : > { %7021 = shalt.err (!%p7018_p9)
}
  0xc1   : > { %p8390_p11 = scmp.ne.s32.totalorder %s8377_s4, 0  ;;  %s643_s11 = scalar_lea.vmem [#allocation7], %s7372_s13 }
  0xc2   : > { %s650_s1 = sshll.u32 %s643_s11, 4  ;;  %s7022_s19 = scalar_lea.hbm %s7473_s18, 128  ;;  %s651_s1 = int_to_ptr.vmem [resolvable:$true] %s650_s1 }
  0xc3   : > { %6730 = dma.hbm_to_vmem [thread:$0]  (!%p8390_p11), %s7464_s21, 128, %s7467_s16, %s604_s26  }
  0xc4   : > { %p7023_p13 = scmp.ne.s32.totalorder %s7473_s18, %s7022_s19  ;;  %s7027_s29 = scalar_lea.hbm %s8387_s10, 256 }
  0xc5   : > { %p7028_p3 = scmp.lt.u32.totalorder %s7473_s18, %s8387_s10  ;;  %p7029_p5 = scmp.lt.u32.totalorder %s7027_s29, %s7022_s19 }
  0xc6   : > { %p7025_p7 = pnand %p7023_p13, %p8389_p8  ;;  %p7031_p1 = scmp.lt.u32.totalorder %s7022_s19, %s7473_s18 }
  0xc7   : > { %p7030_p12 = por %p7029_p5, %p7028_p3 }
  0xc8   : > { %p7026_p2 = pneg %p7025_p7 }
  0xc9   : > { %p7032_p6 = por %p7031_p1, %p7030_p12 }
  0xcb   : > { %p7033_p10 = pnand %p7032_p6, %p7026_p2 }
  0xcd   : > { %7036 = shalt.err (!%p7033_p10)
}
  0xce   : > { %s7037_s13 = scalar_lea.vmem %s651_s1, 128  ;;  %s7139_s21 = smov [#allocation7]  }
  0xcf   : > { %p7038_p0 = scmp.ne.s32.totalorder %s651_s1, %s7037_s13  ;;  %s7042_s16 = sshll.u32 %s7139_s21, 4  ;;  %s7043_s16 = int_to_ptr.vmem [resolvable:$false] %s7042_s16 }
  0xd0   : > { %s7044_s26 = scalar_lea.vmem %s7043_s16, 256  ;;  %p7045_p13 = scmp.lt.s32.totalorder %s651_s1, %s7043_s16 }
  0xd1   : > { %p7040_p4 = pnand %p7038_p0, %p8389_p8  ;;  %p7046_p7 = scmp.lt.s32.totalorder %s7044_s26, %s7037_s13 }
  0xd3   : > { %p7041_p9 = pneg %p7040_p4  ;;  %p7047_p11 = por %p7046_p7, %p7045_p13 }
  0xd5   : > { %p7048_p3 = pnand %p7047_p11, %p7041_p9 }
  0xd7   : > { %7051 = shalt.err (!%p7048_p3)
}
  0xd8   : > { %p8391_p5 = scmp.ne.s32.totalorder %s8377_s4, 0  ;;  %p8392_p2 = scmp.ne.s32.totalorder %s8368_s27, 0 }
  0xd9   : > { %s7520_s24 = sand.u32 (!%p8392_p2), 1, %s7122_s22   ;;  %p8393_p8 = scmp.ne.s32.totalorder (!%p8392_p2), %s8365_s3, 0 }
  0xda   : > { %6736 = dma.hbm_to_vmem [thread:$0]  (!%p8391_p5), %s7473_s18, 128, %s651_s1, %s7388_s20  }
  0xdb   : > { %665 = sbr.rel (%p8392_p2) target bundleno = 13370 (0x343a), region = 100  ;;  %s7523_s9 = sshll.u32 (!%p8392_p2), %s7520_s24, 3 }
  0xdc   : > { %s668_s28 = scalar_lea.sflag (!%p8392_p2), [#allocation3], %s7520_s24  ;;  %s671_s11 = scalar_lea.vmem (!%p8392_p2), [#allocation2], %s7523_s9 }
  0xe2   : > { %7097 = dma.done.wait (%p8393_p8), %s668_s28, 128  }
  0xe3   : > { %7099 = vsyncadd (%p8393_p8), %s668_s28, 4294967168  ;;  %s676_s27 = sand.u32 1, %s7281_s2   ;;  %s680_s4 = scalar_lea.vmem [#allocation5], %s7523_s9 }
  0xe4   : > { %s677_s20 = scalar_lea.sflag [#allocation6], %s676_s27 }
  0xe5   : > { %7101 = dma.done.wait (%p8393_p8), %s677_s20, 256  }
  0xe6   : > { %7103 = vsyncadd (%p8393_p8), %s677_s20, 4294967040  ;;  %s8334_s18 = scalar_lea.vmem [#allocation7], %s7523_s9  ;;  %p8394_p11 = scmp.eq.s32.totalorder %s7281_s2, 0 }
  0xe8   : > { %7105 = dma.done.wait (%p8394_p11), [#allocation9], 2048   ;;  %p8395_p12 = pmov %p8394_p11 }
  0xe9   : > { %p8396_p1 = pmov %p8394_p11 }
  0xea   : > { %7107 = vsyncadd (%p8395_p12), [#allocation9], 4294965248 }
  0xeb   : > { %7109 = dma.done.wait (%p8396_p1), [#allocation12], 1024   ;;  %p8397_p6 = pmov %p8396_p1 }
  0xec   : > { %v7140_v0 = vmov 0.0|0.0   ;;  %vm7141_vm0 = vmmov 0   ;;  %v7142_v1 = vmov 0.0   ;;  %s8398_s19 = sld [smem:[#allocation29_spill]]  ;;  %v7565_v8 = vld [vmem:[%s671_s11] sm:$0xff]  ;;  %vm789_vm1 = vcmask 261120  }
  0xed   : > { %7111 = vsyncadd (%p8397_p6), [#allocation12], 4294966272  ;;  %6625 = vmatprep.subr.bf16.mxu0 %v7140_v0  ;;  %6267 = vmatprep.mubr.msk.f32.mxu0 %vm7141_vm0, %v7142_v1  ;;  %s8399_s5 = sld [smem:[#allocation30_spill]]  ;;  %s8335_s26 = smov 120   ;;  %vm870_vm2 = vcmask 64512   ;;  %v7596_v17 = vld [vmem:[%s8334_s18] sm:$0xff] }
  0xee   : > { %6275 = vmatprep.subr.mxu1 %v7142_v1  ;;  %6277 = vmatprep.mubr.msk.f32.mxu1 %vm7141_vm0, %v7142_v1  ;;  %s8337_s28 = smov 96   ;;  %s8339_s11 = smov 88   ;;  %vm3170_vm3 = vcmask 523264  }
  0xef   : > { %s8325_s27 = smov 56   ;;  %s8324_s20 = smov 64  }
  0xf0   : > { %s8330_s3 = smov 80   ;;  %s8332_s1 = smov 112  }
  0xf1   : > { %s8400_s6 = sld [smem:[#allocation31_spill]]  ;;  %s8326_s0 = smov 72  }
  0xf2   : > { %v778_v2 = vld [vmem:[%s8398_s19] sm:$0xff]  ;;  %v779_v3 = vld [vmem:[%s8398_s19 + $0x8] sm:$0xff]  ;;  %v780_v4 = vld [vmem:[%s8398_s19 + $0x10] sm:$0xff]  ;;  %s8328_s13 = smov 104   ;;  %s8323_s21 = smov 48  }
  0xf3   : > { %v6626_v5 = vpack.c.bf16 %v779_v3, %v778_v2  ;;  %v781_v6 = vld [vmem:[%s8398_s19 + $0x18] sm:$0xff]  ;;  %v5963_v9 = vld [vmem:[%s8399_s5] ss:$0 sm:$0xff]  ;;  %s8322_s25 = smov 40   ;;  %s8401_s7 = sld [smem:[#allocation32_spill]] }
  0xf4   : > { %v6629_v7 = vpack.c.bf16 %v781_v6, %v780_v4  ;;  %s8403_s29 = sld [smem:[#allocation43_spill]]  ;;  %p771_p10 = scmp.lt.s32.totalorder %s7281_s2, 1 }
  0xf5   : > { %6627 = vmatpush3.bf16.msra.mxu0 %v6626_v5  ;;  %s8404_s17 = sld [smem:[#allocation35_spill]]  ;;  %s8407_s16 = sld [smem:[#allocation37_spill]] }
  0xf6   : > { %6628 = vmatprep.subr.bf16.mxu0 %v7140_v0  ;;  %s8408_s30 = sld [smem:[#allocation40_spill]]  ;;  %s8417_s18 = smov 112  }
  0xf7   : > { %v864_v37 = vld [vmem:[%s8400_s6 + $0x8] sm:$0xff]  ;;  %v863_v52 = vld [vmem:[%s8400_s6] sm:$0xff]  ;;  %s8424_s12 = sld [smem:[#allocation24_spill]] }
  0xf9   : > { %6630 = vmatpush3.bf16.msra.mxu0 %v6629_v7 }
  0xfa   : > { %6270 = vmatprep.subr.mxu0 %v7142_v1 }
  0xfc   : > { %6268 = vmatmul.mubr.msk.f32.vlgmr.msra.gmra.mrb[0].mxu0 %vm789_vm1, %v7565_v8 }
  0xfd   : > { %6272 = vmatprep.mubr.msk.f32.mxu0 %vm7141_vm0, %v7142_v1  ;;  %p8426_p4 = scmp.ne.s32.totalorder %s8424_s12, 0 }
 0x1cf   : > { %v859_v10 = vpop.f32.mrb[0].mxu0 }
 0x1d0   : > { %v7575_v11 = vadd.f32 %v5963_v9, %v859_v10  ;;  %v6269_v12 = vpop.f32.mrb[1].mxu0 }
 0x1d2   : > { %1037 = vrot.lane.b32.xlu1 %v7575_v11, %s8335_s26  ;;  %868 = vrot.lane.b32.xlu0 %v7575_v11, %s8337_s28 }
 0x1d6   : > { %1039 = vrot.lane.b32.xlu0 %v7575_v11, %s8339_s11 }
 0x244   : > { %v869_v13 = vpop.permute.xlu0 %868  ;;  %v1038_v15 = vpop.permute.xlu1 %1037 }
 0x245   : > { %6271 = vmatpush3.xpose.msk.msra.mxu0 %vm870_vm2, %v869_v13 }
 0x246   : > { %6280 = vmatprep.subr.mxu0 %v7142_v1 }
 0x248   : > { %6273 = vmatmul.mubr.msk.f32.vlgmr.msra.gmra.mrb[2].mxu0 %vm870_vm2, %v7575_v11  ;;  %v1040_v14 = vpop.permute.xlu0 %1039 }
 0x249   : > { %6281 = vmatpush3.xpose.msk.msra.mxu0 %vm870_vm2, %v1040_v14  ;;  %6282 = vmatprep.mubr.msk.f32.mxu0 %vm7141_vm0, %v7142_v1 }
 0x24a   : > { %6290 = vmatprep.subr.mxu0 %v7142_v1 }
 0x24c   : > { %6283 = vmatmul.mubr.msk.f32.vlgmr.msra.gmra.mrb[4].mxu0 %vm870_vm2, %v1038_v15 }
 0x24d   : > { %6292 = vmatprep.mubr.msk.f32.mxu0 %vm7141_vm0, %v7142_v1  ;;  %6291 = vmatpush3.msra.mxu0 %v864_v37 }
 0x24e   : > { %6300 = vmatprep.subr.mxu0 %v7142_v1 }
 0x31b   : > { %v941_v16 = vpop.f32.mrb[2].mxu0 }
 0x31c   : > { %v945_v18 = vmul.f32 0.35355338, %v941_v16  ;;  %v6274_v19 = vpop.f32.mrb[3].mxu0 }
 0x31e   : > { %v946_v20 = vadd.f32 %v945_v18, %v7596_v17 }
 0x31f   : > { %v1111_v21 = vpop.f32.mrb[4].mxu0 }
 0x320   : > { %v1115_v22 = vmul.f32 0.35355338, %v1111_v21  ;;  %v6284_v23 = vpop.f32.mrb[5].mxu0  ;;  %v947_v24 = vsel %vm870_vm2, %v946_v20, -inf }
 0x321   : > { %948 = vmax.xlane.f32.xlu1 %v947_v24  ;;  %v865_v24 = vld [vmem:[%s8400_s6 + $0x10] sm:$0xff] }
 0x322   : > { %v1116_v25 = vadd.f32 %v1115_v22, %v7596_v17 }
 0x324   : > { %v1117_v26 = vsel %vm870_vm2, %v1116_v25, -inf }
 0x325   : > { %1118 = vmax.xlane.f32.xlu0 %v1117_v26 }
 0x3ae   : > { %v949_v27 = vpop.xlane.xlu1 %948 }
 0x3af   : > { %v950_v28 = vsub.f32 %v946_v20, %v949_v27 }
 0x3b1   : > { %v951_v29 = vmul.f32 1.442695, %v950_v28 }
 0x3b2   : > { %v1119_v30 = vpop.xlane.xlu0 %1118 }
 0x3b3   : > { %6800 = vpow2.f32 %v951_v29  ;;  %v1120_v31 = vsub.f32 %v1116_v25, %v1119_v30 }
 0x3b5   : > { %v1121_v32 = vmul.f32 1.442695, %v1120_v31 }
 0x3b7   : > { %6802 = vpow2.f32 %v1121_v32 }
 0x3bd   : > { %v6801_v33 = vpop.eup %6800 }
 0x3be   : > { %v953_v34 = vsel %vm870_vm2, %v6801_v33, 0.0 }
 0x3bf   : > { %954 = vadd.xlane.f32.xlu0 %v953_v34 }
 0x3c1   : > { %v6803_v35 = vpop.eup %6802 }
 0x3c2   : > { %v1123_v36 = vsel %vm870_vm2, %v6803_v35, 0.0 }
 0x3c3   : > { %1124 = vadd.xlane.f32.xlu1 %v1123_v36 }
 0x3d4   : > { %1131 = vrot.lane.b32.xlu1 %v7575_v11, %s8325_s27  ;;  %s8406_s27 = sld [smem:[#allocation28_spill]] }
 0x3d5   : > { %961 = vrot.lane.b32.xlu0 %v7575_v11, %s8324_s20  ;;  %s8402_s20 = sld [smem:[#allocation42_spill]] }
 0x3d8   : > { %1355 = vrot.lane.b32.xlu1 %v7575_v11, %s8330_s3 }
 0x3d9   : > { %1353 = vrot.lane.b32.xlu0 %v7575_v11, %s8332_s1 }
 0x44c   : > { %v955_v38 = vpop.xlane.xlu0 %954 }
 0x44d   : > { %6804 = vrcp.f32 %v955_v38 }
 0x450   : > { %v1125_v39 = vpop.xlane.xlu1 %1124  ;;  %v962_v40 = vpop.permute.xlu0 %961 }
 0x451   : > { %6806 = vrcp.f32 %v1125_v39  ;;  %6276 = vmatpush3.msra.mxu1 %v962_v40 }
 0x452   : > { %6285 = vmatprep.subr.mxu1 %v7142_v1 }
 0x454   : > { %v1132_v50 = vpop.permute.xlu1 %1131  ;;  %v1354_v58 = vpop.permute.xlu0 %1353 }
 0x457   : > { %v6805_v41 = vpop.eup %6804 }
 0x458   : > { %v957_v42 = vmul.f32 %v6805_v41, %v955_v38  ;;  %v1356_v56 = vpop.permute.xlu1 %1355 }
 0x45a   : > { %v958_v43 = vsub.f32 2.0, %v957_v42 }
 0x45b   : > { %v6807_v44 = vpop.eup %6806 }
 0x45c   : > { %v959_v45 = vmul.f32 %v6805_v41, %v958_v43  ;;  %v1127_v46 = vmul.f32 %v6807_v44, %v1125_v39 }
 0x45e   : > { %v960_v47 = vmul.f32 %v6801_v33, %v959_v45  ;;  %v1128_v48 = vsub.f32 2.0, %v1127_v46 }
 0x460   : > { %v1129_v49 = vmul.f32 %v6807_v44, %v1128_v48  ;;  %6278 = vmatmul.mubr.msk.f32.vlgmr.msra.gmra.mrb[0].mxu1 %vm870_vm2, %v960_v47 }
 0x461   : > { %6286 = vmatpush3.msra.mxu1 %v1132_v50  ;;  %6287 = vmatprep.mubr.msk.f32.mxu1 %vm7141_vm0, %v7142_v1 }
 0x462   : > { %v1130_v51 = vmul.f32 %v6803_v35, %v1129_v49  ;;  %6295 = vmatprep.subr.mxu1 %v7142_v1  ;;  %v5981_v49 = vld [vmem:[%s8401_s7] ss:$0 sm:$0xff] }
 0x464   : > { %6288 = vmatmul.mubr.msk.f32.vlgmr.msra.gmra.mrb[2].mxu1 %vm870_vm2, %v1130_v51 }
 0x465   : > { %6297 = vmatprep.mubr.msk.f32.mxu1 %vm7141_vm0, %v7142_v1  ;;  %6296 = vmatpush3.msra.mxu1 %v863_v52 }
 0x466   : > { %6305 = vmatprep.subr.mxu1 %v7142_v1 }
 0x533   : > { %v1033_v53 = vpop.f32.mrb[0].mxu1 }
 0x534   : > { %v6279_v54 = vpop.f32.mrb[1].mxu1  ;;  %6298 = vmatmul.mubr.msk.f32.vlgmr.msra.gmra.mrb[4].mxu1 %vm870_vm2, %v1033_v53 }
 0x535   : > { %6307 = vmatprep.mubr.msk.f32.mxu1 %vm7141_vm0, %v7142_v1 }
 0x537   : > { %v1203_v55 = vpop.f32.mrb[2].mxu1 }
 0x538   : > { %v6289_v57 = vpop.f32.mrb[3].mxu1  ;;  %6293 = vmatmul.mubr.msk.f32.vlgmr.msra.gmra.mrb[6].mxu0 %vm870_vm2, %v1203_v55 }
 0x539   : > { %6301 = vmatpush3.xpose.msk.msra.mxu0 %vm870_vm2, %v1356_v56  ;;  %6302 = vmatprep.mubr.msk.f32.mxu0 %vm7141_vm0, %v7142_v1 }
 0x53a   : > { %6310 = vmatprep.subr.mxu0 %v7142_v1 }
 0x53c   : > { %6303 = vmatmul.mubr.msk.f32.vlgmr.msra.gmra.mrb[8].mxu0 %vm870_vm2, %v1354_v58 }
 0x53d   : > { %6312 = vmatprep.mubr.msk.f32.mxu0 %vm7141_vm0, %v7142_v1  ;;  %6311 = vmatpush3.msra.mxu0 %v865_v24 }
 0x53e   : > { %6320 = vmatprep.subr.mxu0 %v7142_v1 }
 0x607   : > { %v1349_v59 = vpop.f32.mrb[4].mxu1 }
 0x608   : > { %v6299_v60 = vpop.f32.mrb[5].mxu1 }
 0x609   : > { %v1964_v60 = vld [vmem:[#allocation8] sm:$0xff] }
 0x60b   : > { %v1276_v61 = vpop.f32.mrb[6].mxu0 }
 0x60c   : > { %v7639_v62 = vadd.f32 %v1349_v59, %v1276_v61  ;;  %v6294_v63 = vpop.f32.mrb[7].mxu0  ;;  %v1965_v61 = vld [vmem:[#allocation8 + $0x8] sm:$0xff] }
 0x60d   : > { %v1881_v63 = vld [vmem:[%s8271_s8 + $0x8] sm:$0xff] }
 0x60f   : > { %v1427_v2 = vpop.f32.mrb[8].mxu0 }
 0x610   : > { %v1431_v3 = vmul.f32 0.35355338, %v1427_v2  ;;  %v6304_v4 = vpop.f32.mrb[9].mxu0  ;;  %v1966_v2 = vld [vmem:[#allocation8 + $0x10] sm:$0xff] }
 0x611   : > { %v1967_v4 = vld [vmem:[#allocation8 + $0x18] sm:$0xff] }
 0x612   : > { %v1432_v5 = vadd.f32 %v1431_v3, %v7596_v17 }
 0x614   : > { %v1433_v6 = vsel %vm870_vm2, %v1432_v5, -inf }
 0x615   : > { %1434 = vmax.xlane.f32.xlu1 %v1433_v6  ;;  %v1882_v6 = vld [vmem:[%s8271_s8 + $0x10] sm:$0xff] }
 0x626   : > { %1599 = vrot.lane.b32.xlu1 %v7575_v11, %s8326_s0 }
 0x62a   : > { %1597 = vrot.lane.b32.xlu1 %v7575_v11, %s8328_s13 }
 0x6a2   : > { %v1435_v7 = vpop.xlane.xlu1 %1434 }
 0x6a3   : > { %v1436_v9 = vsub.f32 %v1432_v5, %v1435_v7  ;;  %v6641_v5 = vpack.c.bf16 %v1967_v4, %v1966_v2  ;;  %v1883_v7 = vld [vmem:[%s8271_s8 + $0x18] sm:$0xff]  ;;  %v2048_v2 = vld [vmem:[#allocation10] sm:$0xff] }
 0x6a5   : > { %v1437_v10 = vmul.f32 1.442695, %v1436_v9  ;;  %v7705_v9 = vld [vmem:[%s680_s4] sm:$0xff] }
 0x6a6   : > { %v1600_v21 = vpop.permute.xlu1 %1599 }
 0x6a7   : > { %6808 = vpow2.f32 %v1437_v10  ;;  %v6635_v10 = vpack.c.bf16 %v1883_v7, %v1882_v6 }
 0x6aa   : > { %v1598_v23 = vpop.permute.xlu1 %1597 }
 0x6b1   : > { %v6809_v12 = vpop.eup %6808 }
 0x6b2   : > { %v1439_v13 = vsel %vm870_vm2, %v6809_v12, 0.0 }
 0x6b3   : > { %1440 = vadd.xlane.f32.xlu0 %v1439_v13 }
 0x6c9   : > { %1447 = vrot.lane.b32.xlu0 %v7575_v11, %s8323_s21  ;;  %s8405_s21 = sld [smem:[#allocation33_spill]] }
 0x740   : > { %v1441_v14 = vpop.xlane.xlu0 %1440 }
 0x741   : > { %6810 = vrcp.f32 %v1441_v14 }
 0x744   : > { %v1448_v15 = vpop.permute.xlu0 %1447 }
 0x745   : > { %6306 = vmatpush3.msra.mxu1 %v1448_v15 }
 0x746   : > { %6315 = vmatprep.subr.mxu1 %v7142_v1 }
 0x74b   : > { %v6811_v16 = vpop.eup %6810 }
 0x74c   : > { %v1443_v18 = vmul.f32 %v6811_v16, %v1441_v14 }
 0x74e   : > { %v1444_v19 = vsub.f32 2.0, %v1443_v18 }
 0x750   : > { %v1445_v20 = vmul.f32 %v6811_v16, %v1444_v19  ;;  %v5982_v16 = vld [vmem:[%s8402_s20] ss:$0 sm:$0xff] }
 0x751   : > { %v5983_v19 = vld [vmem:[%s8403_s29] ss:$0 sm:$0xff] }
 0x752   : > { %v1446_v22 = vmul.f32 %v6809_v12, %v1445_v20 }
 0x754   : > { %6308 = vmatmul.mubr.msk.f32.vlgmr.msra.gmra.mrb[6].mxu1 %vm870_vm2, %v1446_v22  ;;  %v5986_v22 = vld [vmem:[%s8404_s17] ss:$0 sm:$0xff] }
 0x755   : > { %6316 = vmatpush3.xpose.msk.msra.mxu1 %vm870_vm2, %v1600_v21  ;;  %6317 = vmatprep.mubr.msk.f32.mxu1 %vm7141_vm0, %v7142_v1 }
 0x756   : > { %6325 = vmatprep.subr.mxu1 %v7142_v1 }
 0x758   : > { %6318 = vmatmul.mubr.msk.f32.vlgmr.msra.gmra.mrb[8].mxu1 %vm870_vm2, %v1598_v23 }
 0x759   : > { %6327 = vmatprep.mubr.msk.f32.mxu1 %vm7141_vm0, %v7142_v1 }
 0x827   : > { %v1519_v25 = vpop.f32.mrb[6].mxu1 }
 0x828   : > { %v6309_v26 = vpop.f32.mrb[7].mxu1  ;;  %6313 = vmatmul.mubr.msk.f32.vlgmr.msra.gmra.mrb[10].mxu0 %vm870_vm2, %v1519_v25 }
 0x829   : > { %6322 = vmatprep.mubr.msk.f32.mxu0 %vm7141_vm0, %v7142_v1  ;;  %v5984_v26 = vld [vmem:[%s8405_s21] ss:$0 sm:$0xff] }
 0x82b   : > { %v1671_v27 = vpop.f32.mrb[8].mxu1 }
 0x82c   : > { %v1675_v28 = vmul.f32 0.35355338, %v1671_v27  ;;  %v6319_v29 = vpop.f32.mrb[9].mxu1 }
 0x82e   : > { %v1676_v30 = vadd.f32 %v1675_v28, %v7596_v17  ;;  %v866_v17 = vld [vmem:[%s8400_s6 + $0x18] sm:$0xff] }
 0x82f   : > { %6326 = vmatpush3.msra.mxu1 %v866_v17 }
 0x830   : > { %v1677_v31 = vsel %vm870_vm2, %v1676_v30, -inf  ;;  %6637 = vmatprep.subr.bf16.mxu1 %v7140_v0 }
 0x831   : > { %1678 = vmax.xlane.f32.xlu0 %v1677_v31 }
 0x847   : > { %1691 = vrot.lane.b32.xlu0 %v7575_v11, %s8322_s25  ;;  %s772_s25 = scalar_select %p771_p10, %s7281_s2, 1 }
 0x849   : > { %s7756_s4 = scalar_lea.vmem %s8406_s27, %s772_s25  ;;  %s8414_s27 = smov 120  }
 0x84a   : > { %s8415_s25 = scalar_lea.vmem [#allocation7], %s7523_s9 }
 0x8be   : > { %v1679_v32 = vpop.xlane.xlu0 %1678 }
 0x8bf   : > { %v1680_v33 = vsub.f32 %v1676_v30, %v1679_v32 }
 0x8c1   : > { %v1681_v34 = vmul.f32 1.442695, %v1680_v33  ;;  %v7759_v33 = vld [vmem:[%s7756_s4] ss:$0 sm:$0xff] }
 0x8c2   : > { %v1692_v35 = vpop.permute.xlu0 %1691 }
 0x8c3   : > { %6812 = vpow2.f32 %v1681_v34  ;;  %6321 = vmatpush3.msra.mxu0 %v1692_v35 }
 0x8c4   : > { %6631 = vmatprep.subr.bf16.mxu0 %v7140_v0 }
 0x8cd   : > { %v6813_v36 = vpop.eup %6812 }
 0x8ce   : > { %v1683_v37 = vsel %vm870_vm2, %v6813_v36, 0.0 }
 0x8cf   : > { %1684 = vadd.xlane.f32.xlu1 %v1683_v37 }
 0x8fb   : > { %v1592_v11 = vpop.f32.mrb[10].mxu0 }
 0x8fc   : > { %v1596_v38 = vadd.f32 %v1592_v11, %v7639_v62  ;;  %v6314_v39 = vpop.f32.mrb[11].mxu0  ;;  %v6638_v62 = vpack.c.bf16 %v1965_v61, %v1964_v60 }
 0x95c   : > { %v1685_v40 = vpop.xlane.xlu1 %1684 }
 0x95d   : > { %6814 = vrcp.f32 %v1685_v40 }
 0x967   : > { %v6815_v41 = vpop.eup %6814 }
 0x968   : > { %v1687_v42 = vmul.f32 %v6815_v41, %v1685_v40 }
 0x96a   : > { %v1688_v43 = vsub.f32 2.0, %v1687_v42 }
 0x96c   : > { %v1689_v44 = vmul.f32 %v6815_v41, %v1688_v43 }
 0x96e   : > { %v1690_v45 = vmul.f32 %v6813_v36, %v1689_v44 }
 0x970   : > { %6323 = vmatmul.mubr.msk.f32.vlgmr.msra.gmra.mrb[12].mxu0 %vm870_vm2, %v1690_v45 }
 0x971   : > { %6338 = vmatprep.mubr.msk.f32.mxu0 %vm7141_vm0, %v7142_v1 }
 0xa43   : > { %v1763_v46 = vpop.f32.mrb[12].mxu0 }
 0xa44   : > { %v6324_v47 = vpop.f32.mrb[13].mxu0  ;;  %6328 = vmatmul.mubr.msk.f32.vlgmr.msra.gmra.mrb[10].mxu1 %vm870_vm2, %v1763_v46 }
 0xa45   : > { %6349 = vmatprep.mubr.msk.f32.mxu1 %vm7141_vm0, %v7142_v1  ;;  %6639 = vmatpush3.bf16.msra.mxu1 %v6638_v62 }
 0xa46   : > { %6640 = vmatprep.subr.bf16.mxu1 %v7140_v0 }
 0xa49   : > { %6642 = vmatpush3.bf16.msra.mxu1 %v6641_v5 }
 0xa4a   : > { %6357 = vmatprep.subr.mxu1 %v7142_v1 }
 0xa4c   : > { %6350 = vmatmul.mubr.msk.f32.vlgmr.msra.gmra.mrb[12].mxu1 %vm789_vm1, %v7705_v9 }
 0xa4d   : > { %6359 = vmatprep.mubr.msk.f32.mxu1 %vm7141_vm0, %v7142_v1 }
 0xb17   : > { %v1836_v48 = vpop.f32.mrb[10].mxu1 }
 0xb18   : > { %v1840_v50 = vadd.f32 %v1836_v48, %v1596_v38  ;;  %v6329_v51 = vpop.f32.mrb[11].mxu1 }
 0xb1a   : > { %v1848_v52 = vadd.f32 %v5981_v49, %v1840_v50 }
 0xb1c   : > { %v1849_v53 = vadd.f32 %v1848_v52, %v7565_v8  ;;  %v1880_v8 = vld [vmem:[%s8271_s8] sm:$0xff] }
 0xb1d   : > { %v6632_v3 = vpack.c.bf16 %v1881_v63, %v1880_v8 }
 0xb1e   : > { %v1852_v54 = vsel %vm789_vm1, %v1849_v53, 0.0 }
 0xb1f   : > { %1853 = vadd.xlane.f32.xlu1 %v1852_v54  ;;  %6633 = vmatpush3.bf16.msra.mxu0 %v6632_v3  ;;  %v2044_v23 = vpop.f32.mrb[12].mxu1  ;;  %v2049_v3 = vld [vmem:[#allocation10 + $0x8] sm:$0xff] }
 0xb20   : > { %6634 = vmatprep.subr.bf16.mxu0 %v7140_v0  ;;  %v7728_v24 = vadd.f32 %v5986_v22, %v2044_v23  ;;  %v6351_v25 = vpop.f32.mrb[13].mxu1 }
 0xb23   : > { %6636 = vmatpush3.bf16.msra.mxu0 %v6635_v10 }
 0xb24   : > { %6352 = vmatprep.subr.mxu0 %v7142_v1 }
 0xbac   : > { %v1854_v55 = vpop.xlane.xlu1 %1853 }
 0xbad   : > { %v1856_v56 = vmul.f32 0.03125, %v1854_v55 }
 0xbaf   : > { %v1857_v57 = vsub.f32 %v1849_v53, %v1856_v56 }
 0xbb1   : > { %v1858_v58 = vmul.f32 %v1857_v57, %v1857_v57 }
 0xbb3   : > { %v1859_v59 = vsel %vm789_vm1, %v1858_v58, 0.0 }
 0xbb4   : > { %1860 = vadd.xlane.f32.xlu1 %v1859_v59 }
 0xbc5   : > { %2228 = vrot.lane.b32.xlu1 %v7728_v24, %s8335_s26 }
 0xc41   : > { %v1861_v12 = vpop.xlane.xlu1 %1860 }
 0xc42   : > { %v1862_v13 = vmul.f32 0.03125, %v1861_v12 }
 0xc44   : > { %v1863_v14 = vadd.f32 1e-05, %v1862_v13 }
 0xc45   : > { %v2229_v30 = vpop.permute.xlu1 %2228 }
 0xc46   : > { %6816 = vrsqrt.f32 %v1863_v14 }
 0xc50   : > { %v6817_v15 = vpop.eup %6816 }
 0xc51   : > { %v1865_v18 = vmul.f32 %v6817_v15, %v1857_v57 }
 0xc53   : > { %v1872_v20 = vmul.f32 %v5982_v16, %v1865_v18 }
 0xc55   : > { %v7719_v21 = vadd.f32 %v5983_v19, %v1872_v20 }
 0xc57   : > { %6339 = vmatmul.mubr.msk.f32.vlgmr.msra.gmra.mrb[14].mxu0 %vm789_vm1, %v7719_v21 }
 0xc58   : > { %6354 = vmatprep.mubr.msk.f32.mxu0 %vm7141_vm0, %v7142_v1  ;;  %6353 = vmatpush3.xpose.msk.msra.mxu0 %vm870_vm2, %v7728_v24 }
 0xc59   : > { %6362 = vmatprep.subr.mxu0 %v7142_v1 }
 0xd2a   : > { %v1960_v27 = vpop.f32.mrb[14].mxu0 }
 0xd2b   : > { %v7738_v28 = vadd.f32 %v5984_v26, %v1960_v27  ;;  %v6340_v29 = vpop.f32.mrb[15].mxu0 }
 0xd2d   : > { %2226 = vrot.lane.b32.xlu0 %v7738_v28, %s8335_s26  ;;  %6355 = vmatmul.mubr.msk.f32.vlgmr.msra.gmra.mrb[16].mxu0 %vm870_vm2, %v7738_v28  ;;  %s8409_s26 = sld [smem:[#allocation39_spill]] }
 0xd2e   : > { %6363 = vmatpush3.xpose.msk.msra.mxu0 %vm870_vm2, %v2229_v30  ;;  %6364 = vmatprep.mubr.msk.f32.mxu0 %vm7141_vm0, %v7142_v1 }
 0xd2f   : > { %6372 = vmatprep.subr.mxu0 %v7142_v1 }
 0xd9f   : > { %v2227_v31 = vpop.permute.xlu0 %2226 }
 0xda0   : > { %6365 = vmatmul.mubr.msk.f32.vlgmr.msra.gmra.mrb[18].mxu0 %vm870_vm2, %v2227_v31 }
 0xda1   : > { %6374 = vmatprep.mubr.msk.f32.mxu0 %vm7141_vm0, %v7142_v1  ;;  %6373 = vmatpush3.msra.mxu0 %v2049_v3 }
 0xda2   : > { %6382 = vmatprep.subr.mxu0 %v7142_v1 }
 0xe00   : > { %v2124_v32 = vpop.f32.mrb[16].mxu0 }
 0xe01   : > { %v2128_v34 = vmul.f32 0.35355338, %v2124_v32  ;;  %v6356_v35 = vpop.f32.mrb[17].mxu0 }
 0xe03   : > { %v2135_v36 = vadd.f32 %v7759_v33, %v2128_v34 }
 0xe05   : > { %v2136_v37 = vsel %vm870_vm2, %v2135_v36, -inf }
 0xe06   : > { %2137 = vmax.xlane.f32.xlu0 %v2136_v37 }
 0xe73   : > { %v2300_v17 = vpop.f32.mrb[18].mxu0 }
 0xe74   : > { %v2304_v11 = vmul.f32 0.35355338, %v2300_v17  ;;  %v6366_v38 = vpop.f32.mrb[19].mxu0 }
 0xe76   : > { %v2305_v39 = vadd.f32 %v7759_v33, %v2304_v11 }
 0xe78   : > { %v2306_v40 = vsel %vm870_vm2, %v2305_v39, -inf }
 0xe79   : > { %2307 = vmax.xlane.f32.xlu1 %v2306_v40 }
 0xe8a   : > { %2320 = vrot.lane.b32.xlu1 %v7728_v24, %s8339_s11  ;;  %s8418_s11 = smov 64  }
 0xe8e   : > { %2544 = vrot.lane.b32.xlu1 %v7728_v24, %s8332_s1 }
 0xe93   : > { %v2138_v41 = vpop.xlane.xlu0 %2137 }
 0xe94   : > { %v2139_v42 = vsub.f32 %v2135_v36, %v2138_v41 }
 0xe96   : > { %v2140_v43 = vmul.f32 1.442695, %v2139_v42 }
 0xe98   : > { %6818 = vpow2.f32 %v2140_v43 }
 0xea2   : > { %v6819_v44 = vpop.eup %6818 }
 0xea3   : > { %v2142_v45 = vsel %vm870_vm2, %v6819_v44, 0.0 }
 0xea4   : > { %2143 = vadd.xlane.f32.xlu0 %v2142_v45 }
 0xf06   : > { %v2308_v46 = vpop.xlane.xlu1 %2307 }
 0xf07   : > { %v2309_v47 = vsub.f32 %v2305_v39, %v2308_v46  ;;  %v2050_v39 = vld [vmem:[#allocation10 + $0x10] sm:$0xff] }
 0xf09   : > { %v2310_v48 = vmul.f32 1.442695, %v2309_v47 }
 0xf0a   : > { %v2321_v59 = vpop.permute.xlu1 %2320 }
 0xf0b   : > { %6820 = vpow2.f32 %v2310_v48 }
 0xf0e   : > { %v2545_v7 = vpop.permute.xlu1 %2544 }
 0xf15   : > { %v6821_v49 = vpop.eup %6820 }
 0xf16   : > { %v2312_v50 = vsel %vm870_vm2, %v6821_v49, 0.0 }
 0xf17   : > { %2313 = vadd.xlane.f32.xlu0 %v2312_v50 }
 0xf2d   : > { %2150 = vrot.lane.b32.xlu0 %v7728_v24, %s8337_s28  ;;  %s8419_s28 = smov 80  }
 0xf31   : > { %2542 = vrot.lane.b32.xlu0 %v7738_v28, %s8332_s1  ;;  %v2144_v51 = vpop.xlane.xlu0 %2143  ;;  %s8410_s1 = sld [smem:[#allocation41_spill]] }
 0xf32   : > { %6822 = vrcp.f32 %v2144_v51 }
 0xf3c   : > { %v6823_v52 = vpop.eup %6822 }
 0xf3d   : > { %v2146_v53 = vmul.f32 %v6823_v52, %v2144_v51 }
 0xf3f   : > { %v2147_v54 = vsub.f32 2.0, %v2146_v53  ;;  %v2051_v53 = vld [vmem:[#allocation10 + $0x18] sm:$0xff] }
 0xf41   : > { %v2148_v55 = vmul.f32 %v6823_v52, %v2147_v54 }
 0xf43   : > { %v2149_v57 = vmul.f32 %v6819_v44, %v2148_v55 }
 0xfa4   : > { %v2314_v56 = vpop.xlane.xlu0 %2313 }
 0xfa5   : > { %6824 = vrcp.f32 %v2314_v56 }
 0xfa8   : > { %v2151_v58 = vpop.permute.xlu0 %2150 }
 0xfa9   : > { %6358 = vmatpush3.msra.mxu1 %v2151_v58 }
 0xfaa   : > { %6360 = vmatmul.mubr.msk.f32.vlgmr.msra.gmra.mrb[14].mxu1 %vm870_vm2, %v2149_v57  ;;  %6367 = vmatprep.subr.mxu1 %v7142_v1 }
 0xfab   : > { %6368 = vmatpush3.msra.mxu1 %v2321_v59  ;;  %6369 = vmatprep.mubr.msk.f32.mxu1 %vm7141_vm0, %v7142_v1 }
 0xfac   : > { %6377 = vmatprep.subr.mxu1 %v7142_v1  ;;  %v2543_v12 = vpop.permute.xlu0 %2542 }
 0xfaf   : > { %v6825_v60 = vpop.eup %6824 }
 0xfb0   : > { %v2316_v61 = vmul.f32 %v6825_v60, %v2314_v56 }
 0xfb2   : > { %v2317_v62 = vsub.f32 2.0, %v2316_v61 }
 0xfb4   : > { %v2318_v8 = vmul.f32 %v6825_v60, %v2317_v62 }
 0xfb6   : > { %v2319_v63 = vmul.f32 %v6821_v49, %v2318_v8 }
 0xfb8   : > { %6370 = vmatmul.mubr.msk.f32.vlgmr.msra.gmra.mrb[16].mxu1 %vm870_vm2, %v2319_v63 }
 0xfb9   : > { %6379 = vmatprep.mubr.msk.f32.mxu1 %vm7141_vm0, %v7142_v1  ;;  %6378 = vmatpush3.msra.mxu1 %v2048_v2  ;;  %v6005_v2 = vld [vmem:[%s8407_s16] ss:$0 sm:$0xff] }
 0xfba   : > { %6387 = vmatprep.subr.mxu1 %v7142_v1 }
0x107d   : > { %v2222_v4 = vpop.f32.mrb[14].mxu1 }
0x107e   : > { %v6361_v5 = vpop.f32.mrb[15].mxu1  ;;  %6380 = vmatmul.mubr.msk.f32.vlgmr.msra.gmra.mrb[18].mxu1 %vm870_vm2, %v2222_v4 }
0x107f   : > { %6389 = vmatprep.mubr.msk.f32.mxu1 %vm7141_vm0, %v7142_v1 }
0x108b   : > { %v2392_v6 = vpop.f32.mrb[16].mxu1 }
0x108c   : > { %v6371_v10 = vpop.f32.mrb[17].mxu1  ;;  %6375 = vmatmul.mubr.msk.f32.vlgmr.msra.gmra.mrb[20].mxu0 %vm870_vm2, %v2392_v6 }
0x108d   : > { %6383 = vmatpush3.xpose.msk.msra.mxu0 %vm870_vm2, %v2545_v7  ;;  %6384 = vmatprep.mubr.msk.f32.mxu0 %vm7141_vm0, %v7142_v1 }
0x108e   : > { %6392 = vmatprep.subr.mxu0 %v7142_v1 }
0x1090   : > { %6385 = vmatmul.mubr.msk.f32.vlgmr.msra.gmra.mrb[22].mxu0 %vm870_vm2, %v2543_v12 }
0x1091   : > { %6394 = vmatprep.mubr.msk.f32.mxu0 %vm7141_vm0, %v7142_v1  ;;  %6393 = vmatpush3.msra.mxu0 %v2050_v39 }
0x1092   : > { %6402 = vmatprep.subr.mxu0 %v7142_v1 }
0x1151   : > { %v2538_v13 = vpop.f32.mrb[18].mxu1 }
0x1152   : > { %v6381_v14 = vpop.f32.mrb[19].mxu1 }
0x115f   : > { %v2465_v15 = vpop.f32.mrb[20].mxu0 }
0x1160   : > { %v7796_v16 = vadd.f32 %v2538_v13, %v2465_v15  ;;  %v6376_v18 = vpop.f32.mrb[21].mxu0 }
0x1161   : > { %v3071_v18 = vld [vmem:[#allocation11 + $0x8] sm:$0xff] }
0x1163   : > { %v2616_v19 = vpop.f32.mrb[22].mxu0 }
0x1164   : > { %v2620_v20 = vmul.f32 0.35355338, %v2616_v19  ;;  %v6386_v22 = vpop.f32.mrb[23].mxu0 }
0x1165   : > { %v3073_v22 = vld [vmem:[#allocation11 + $0x18] sm:$0xff] }
0x1166   : > { %v2621_v23 = vadd.f32 %v7759_v33, %v2620_v20  ;;  %v3072_v20 = vld [vmem:[#allocation11 + $0x10] sm:$0xff] }
0x1168   : > { %v2622_v25 = vsel %vm870_vm2, %v2621_v23, -inf }
0x1169   : > { %2623 = vmax.xlane.f32.xlu1 %v2622_v25  ;;  %v3156_v25 = vld [vmem:[%s8408_s30 + $0x8] sm:$0xff] }
0x117a   : > { %2788 = vrot.lane.b32.xlu1 %v7728_v24, %s8328_s13 }
0x117e   : > { %2786 = vrot.lane.b32.xlu1 %v7738_v28, %s8328_s13  ;;  %s8411_s13 = smov %s8410_s1 }
0x11f6   : > { %v2624_v26 = vpop.xlane.xlu1 %2623 }
0x11f7   : > { %v2625_v27 = vsub.f32 %v2621_v23, %v2624_v26  ;;  %v6647_v23 = vpack.c.bf16 %v3073_v22, %v3072_v20  ;;  %v3157_v26 = vld [vmem:[%s8408_s30 + $0x10] sm:$0xff] }
0x11f9   : > { %v2626_v29 = vmul.f32 1.442695, %v2625_v27 }
0x11fa   : > { %v2789_v17 = vpop.permute.xlu1 %2788 }
0x11fb   : > { %6826 = vpow2.f32 %v2626_v29  ;;  %v3158_v29 = vld [vmem:[%s8408_s30 + $0x18] sm:$0xff] }
0x11fe   : > { %v2787_v38 = vpop.permute.xlu1 %2786 }
0x1205   : > { %v6827_v30 = vpop.eup %6826 }
0x1206   : > { %v2628_v31 = vsel %vm870_vm2, %v6827_v30, 0.0 }
0x1207   : > { %2629 = vadd.xlane.f32.xlu0 %v2628_v31  ;;  %v3159_v31 = vld [vmem:[%s8408_s30 + $0x20] sm:$0xff] }
0x121d   : > { %2636 = vrot.lane.b32.xlu0 %v7728_v24, %s8330_s3  ;;  %s8412_s3 = smov 88  }
0x1294   : > { %v2630_v32 = vpop.xlane.xlu0 %2629 }
0x1295   : > { %6828 = vrcp.f32 %v2630_v32 }
0x1298   : > { %v2637_v34 = vpop.permute.xlu0 %2636 }
0x1299   : > { %6388 = vmatpush3.msra.mxu1 %v2637_v34 }
0x129a   : > { %6397 = vmatprep.subr.mxu1 %v7142_v1 }
0x129f   : > { %v6829_v35 = vpop.eup %6828 }
0x12a0   : > { %v2632_v36 = vmul.f32 %v6829_v35, %v2630_v32  ;;  %v3160_v32 = vld [vmem:[%s8408_s30 + $0x28] sm:$0xff] }
0x12a1   : > { %v6656_v34 = vpack.c.bf16 %v3160_v32, %v3159_v31 }
0x12a2   : > { %v2633_v28 = vsub.f32 2.0, %v2632_v36 }
0x12a4   : > { %v2634_v37 = vmul.f32 %v6829_v35, %v2633_v28 }
0x12a6   : > { %v2635_v11 = vmul.f32 %v6827_v30, %v2634_v37  ;;  %v6653_v30 = vpack.c.bf16 %v3158_v29, %v3157_v26  ;;  %v7940_v26 = vld [vmem:[%s8415_s25] sm:$0xff]  ;;  %s8422_s25 = smov 72  }
0x12a8   : > { %6390 = vmatmul.mubr.msk.f32.vlgmr.msra.gmra.mrb[20].mxu1 %vm870_vm2, %v2635_v11 }
0x12a9   : > { %6398 = vmatpush3.xpose.msk.msra.mxu1 %vm870_vm2, %v2789_v17  ;;  %6399 = vmatprep.mubr.msk.f32.mxu1 %vm7141_vm0, %v7142_v1  ;;  %v6008_v17 = vld [vmem:[%s8402_s20 + $0x1] ss:$0 sm:$0xff] }
0x12aa   : > { %6407 = vmatprep.subr.mxu1 %v7142_v1 }
0x12ac   : > { %6400 = vmatmul.mubr.msk.f32.vlgmr.msra.gmra.mrb[22].mxu1 %vm870_vm2, %v2787_v38  ;;  %v6009_v38 = vld [vmem:[%s8403_s29 + $0x1] ss:$0 sm:$0xff] }
0x12ad   : > { %6409 = vmatprep.mubr.msk.f32.mxu1 %vm7141_vm0, %v7142_v1  ;;  %6408 = vmatpush3.msra.mxu1 %v2051_v53 }
0x12ae   : > { %6649 = vmatprep.subr.bf16.mxu1 %v7140_v0 }
0x137b   : > { %v2708_v40 = vpop.f32.mrb[20].mxu1 }
0x137c   : > { %v6391_v41 = vpop.f32.mrb[21].mxu1  ;;  %6395 = vmatmul.mubr.msk.f32.vlgmr.msra.gmra.mrb[24].mxu0 %vm870_vm2, %v2708_v40 }
0x137d   : > { %6404 = vmatprep.mubr.msk.f32.mxu0 %vm7141_vm0, %v7142_v1  ;;  %v3161_v41 = vld [vmem:[%s8408_s30 + $0x30] sm:$0xff] }
0x137f   : > { %v2860_v42 = vpop.f32.mrb[22].mxu1 }
0x1380   : > { %v2864_v43 = vmul.f32 0.35355338, %v2860_v42  ;;  %v6401_v44 = vpop.f32.mrb[23].mxu1  ;;  %v3162_v42 = vld [vmem:[%s8408_s30 + $0x38] sm:$0xff] }
0x1381   : > { %v6010_v44 = vld [vmem:[%s8409_s26] ss:$0 sm:$0xff] }
0x1382   : > { %v2865_v45 = vadd.f32 %v7759_v33, %v2864_v43  ;;  %v6659_v43 = vpack.c.bf16 %v3162_v42, %v3161_v41 }
0x1384   : > { %v2866_v46 = vsel %vm870_vm2, %v2865_v45, -inf }
0x1385   : > { %2867 = vmax.xlane.f32.xlu0 %v2866_v46 }
0x139b   : > { %2880 = vrot.lane.b32.xlu0 %v7728_v24, %s8326_s0  ;;  %s8416_s0 = smov 56  }
0x1412   : > { %v2868_v47 = vpop.xlane.xlu0 %2867 }
0x1413   : > { %v2869_v48 = vsub.f32 %v2865_v45, %v2868_v47 }
0x1415   : > { %v2870_v49 = vmul.f32 1.442695, %v2869_v48 }
0x1416   : > { %v2881_v50 = vpop.permute.xlu0 %2880 }
0x1417   : > { %6830 = vpow2.f32 %v2870_v49  ;;  %6403 = vmatpush3.msra.mxu0 %v2881_v50  ;;  %v6012_v49 = vld [vmem:[%s8410_s1] ss:$0 sm:$0xff]  ;;  %s8413_s1 = smov 96  }
0x1418   : > { %6643 = vmatprep.subr.bf16.mxu0 %v7140_v0 }
0x1421   : > { %v6831_v51 = vpop.eup %6830 }
0x1422   : > { %v2872_v52 = vsel %vm870_vm2, %v6831_v51, 0.0 }
0x1423   : > { %2873 = vadd.xlane.f32.xlu1 %v2872_v52 }
0x144f   : > { %v2781_v54 = vpop.f32.mrb[24].mxu0 }
0x1450   : > { %v2785_v55 = vadd.f32 %v2781_v54, %v7796_v16  ;;  %v6396_v24 = vpop.f32.mrb[25].mxu0  ;;  %v3070_v16 = vld [vmem:[#allocation11] sm:$0xff] }
0x1451   : > { %v6644_v19 = vpack.c.bf16 %v3071_v18, %v3070_v16 }
0x14b0   : > { %v2874_v56 = vpop.xlane.xlu1 %2873 }
0x14b1   : > { %6832 = vrcp.f32 %v2874_v56 }
0x14bb   : > { %v6833_v57 = vpop.eup %6832 }
0x14bc   : > { %v2876_v58 = vmul.f32 %v6833_v57, %v2874_v56 }
0x14be   : > { %v2877_v59 = vsub.f32 2.0, %v2876_v58 }
0x14c0   : > { %v2878_v60 = vmul.f32 %v6833_v57, %v2877_v59  ;;  %v6018_v59 = vld [vmem:[%s8398_s19 + $0x20] sm:$0xff] }
0x14c2   : > { %v2879_v61 = vmul.f32 %v6831_v51, %v2878_v60  ;;  %v6019_v60 = vld [vmem:[%s8398_s19 + $0x28] sm:$0xff] }
0x14c4   : > { %6405 = vmatmul.mubr.msk.f32.vlgmr.msra.gmra.mrb[26].mxu0 %vm870_vm2, %v2879_v61  ;;  %v6662_v61 = vpack.c.bf16 %v6019_v60, %v6018_v59 }
0x14c5   : > { %6420 = vmatprep.mubr.msk.f32.mxu0 %vm7141_vm0, %v7142_v1  ;;  %6645 = vmatpush3.bf16.msra.mxu0 %v6644_v19 }
0x14c6   : > { %6646 = vmatprep.subr.bf16.mxu0 %v7140_v0 }
0x14c9   : > { %6648 = vmatpush3.bf16.msra.mxu0 %v6647_v23 }
0x14ca   : > { %6661 = vmatprep.subr.bf16.mxu0 %v7140_v0 }
0x1597   : > { %v2952_v62 = vpop.f32.mrb[26].mxu0 }
0x1598   : > { %v6406_v8 = vpop.f32.mrb[27].mxu0  ;;  %6410 = vmatmul.mubr.msk.f32.vlgmr.msra.gmra.mrb[24].mxu1 %vm870_vm2, %v2952_v62  ;;  %v6020_v62 = vld [vmem:[%s8398_s19 + $0x30] sm:$0xff] }
0x1599   : > { %6439 = vmatprep.mubr.msk.f32.mxu1 %vm7141_vm0, %v7142_v1  ;;  %v6021_v8 = vld [vmem:[%s8398_s19 + $0x38] sm:$0xff] }
0x166b   : > { %v3025_v63 = vpop.f32.mrb[24].mxu1 }
0x166c   : > { %v3029_v3 = vadd.f32 %v3025_v63, %v2785_v55  ;;  %v6411_v4 = vpop.f32.mrb[25].mxu1  ;;  %v6665_v63 = vpack.c.bf16 %v6021_v8, %v6020_v62 }
0x166e   : > { %v3037_v5 = vadd.f32 %v6005_v2, %v3029_v3 }
0x1670   : > { %v3038_v6 = vadd.f32 %v3037_v5, %v7719_v21  ;;  %v3155_v21 = vld [vmem:[%s8408_s30] sm:$0xff] }
0x1671   : > { %v6650_v27 = vpack.c.bf16 %v3156_v25, %v3155_v21 }
0x1672   : > { %v3043_v7 = vsel %vm789_vm1, %v3038_v6, 0.0 }
0x1673   : > { %3044 = vadd.xlane.f32.xlu1 %v3043_v7  ;;  %6651 = vmatpush3.bf16.msra.mxu1 %v6650_v27 }
0x1674   : > { %6652 = vmatprep.subr.bf16.mxu1 %v7140_v0 }
0x1677   : > { %6654 = vmatpush3.bf16.msra.mxu1 %v6653_v30 }
0x1678   : > { %6655 = vmatprep.subr.bf16.mxu1 %v7140_v0 }
0x167b   : > { %6657 = vmatpush3.bf16.msra.mxu1 %v6656_v34 }
0x167c   : > { %6658 = vmatprep.subr.bf16.mxu1 %v7140_v0 }
0x167f   : > { %6660 = vmatpush3.bf16.msra.mxu1 %v6659_v43  ;;  %v6026_v43 = vld [vmem:[%s8400_s6 + $0x28] sm:$0xff] }
0x1680   : > { %6458 = vmatprep.subr.mxu1 %v7142_v1 }
0x1700   : > { %v3045_v10 = vpop.xlane.xlu1 %3044 }
0x1701   : > { %v3046_v12 = vmul.f32 0.03125, %v3045_v10  ;;  %v6017_v10 = vld [vmem:[%s8403_s29 + $0x2] ss:$0 sm:$0xff] }
0x1703   : > { %v3047_v13 = vsub.f32 %v3038_v6, %v3046_v12  ;;  %v6016_v6 = vld [vmem:[%s8402_s20 + $0x2] ss:$0 sm:$0xff] }
0x1705   : > { %v3048_v14 = vmul.f32 %v3047_v13, %v3047_v13 }
0x1707   : > { %v3049_v15 = vsel %vm789_vm1, %v3048_v14, 0.0  ;;  %v6023_v14 = vld [vmem:[%s8399_s5 + $0x1] ss:$0 sm:$0xff]  ;;  %s8423_s5 = smov 40  }
0x1708   : > { %3050 = vadd.xlane.f32.xlu1 %v3049_v15 }
0x1795   : > { %v3051_v35 = vpop.xlane.xlu1 %3050 }
0x1796   : > { %v3052_v36 = vmul.f32 0.03125, %v3051_v35 }
0x1798   : > { %v3053_v28 = vadd.f32 1e-05, %v3052_v36 }
0x179a   : > { %6834 = vrsqrt.f32 %v3053_v28 }
0x17a4   : > { %v6835_v37 = vpop.eup %6834 }
0x17a5   : > { %v3055_v11 = vmul.f32 %v6835_v37, %v3047_v13 }
0x17a7   : > { %v3062_v39 = vmul.f32 %v6008_v17, %v3055_v11 }
0x17a9   : > { %v3069_v40 = vadd.f32 %v6009_v38, %v3062_v39 }
0x17ab   : > { %6421 = vmatmul.mubr.msk.f32.vlgmr.msra.gmra.mrb[28].mxu0 %vm789_vm1, %v3069_v40 }
0x17ac   : > { %6450 = vmatprep.mubr.msk.f32.mxu0 %vm7141_vm0, %v7142_v1  ;;  %6663 = vmatpush3.bf16.msra.mxu0 %v6662_v61 }
0x17ad   : > { %6664 = vmatprep.subr.bf16.mxu0 %v7140_v0 }
0x17b0   : > { %6666 = vmatpush3.bf16.msra.mxu0 %v6665_v63 }
0x17b1   : > { %6453 = vmatprep.subr.mxu0 %v7142_v1 }
0x187e   : > { %v3150_v45 = vpop.f32.mrb[28].mxu0 }
0x187f   : > { %v3151_v46 = vadd.f32 %v6010_v44, %v3150_v45  ;;  %v6422_v47 = vpop.f32.mrb[29].mxu0 }
0x1881   : > { %v3154_v48 = vmax.f32 %v3151_v46, 0.0 }
0x1883   : > { %6440 = vmatmul.mubr.msk.f32.vlgmr.msra.gmra.mrb[26].mxu1 %vm3170_vm3, %v3154_v48 }
0x1884   : > { %6460 = vmatprep.mubr.msk.f32.mxu1 %vm7141_vm0, %v7142_v1 }
0x1956   : > { %v3240_v50 = vpop.f32.mrb[26].mxu1 }
0x1957   : > { %v3241_v51 = vadd.f32 %v6012_v49, %v3240_v50  ;;  %v6441_v52 = vpop.f32.mrb[27].mxu1 }
0x1959   : > { %v3244_v53 = vadd.f32 %v3241_v51, %v3069_v40 }
0x195b   : > { %v3249_v54 = vsel %vm789_vm1, %v3244_v53, 0.0 }
0x195c   : > { %3250 = vadd.xlane.f32.xlu1 %v3249_v54 }
0x19e9   : > { %v3251_v55 = vpop.xlane.xlu1 %3250 }
0x19ea   : > { %v3252_v24 = vmul.f32 0.03125, %v3251_v55 }
0x19ec   : > { %v3253_v56 = vsub.f32 %v3244_v53, %v3252_v24 }
0x19ee   : > { %v3254_v57 = vmul.f32 %v3253_v56, %v3253_v56 }
0x19f0   : > { %v3255_v58 = vsel %vm789_vm1, %v3254_v57, 0.0  ;;  %v6025_v57 = vld [vmem:[%s8400_s6 + $0x20] sm:$0xff] }
0x19f1   : > { %3256 = vadd.xlane.f32.xlu1 %v3255_v58 }
0x1a7e   : > { %v3257_v2 = vpop.xlane.xlu1 %3256 }
0x1a7f   : > { %v3258_v3 = vmul.f32 0.03125, %v3257_v2 }
0x1a81   : > { %v3259_v4 = vadd.f32 1e-05, %v3258_v3 }
0x1a83   : > { %6836 = vrsqrt.f32 %v3259_v4 }
0x1a8d   : > { %v6837_v5 = vpop.eup %6836 }
0x1a8e   : > { %v3261_v7 = vmul.f32 %v6837_v5, %v3253_v56 }
0x1a90   : > { %v3268_v12 = vmul.f32 %v6016_v6, %v3261_v7 }
0x1a92   : > { %v7910_v13 = vadd.f32 %v6017_v10, %v3268_v12 }
0x1a94   : > { %6451 = vmatmul.mubr.msk.f32.vlgmr.msra.gmra.mrb[30].mxu0 %vm789_vm1, %v7910_v13 }
0x1a95   : > { %6455 = vmatprep.mubr.msk.f32.mxu0 %vm7141_vm0, %v7142_v1 }
0x1b67   : > { %v3358_v15 = vpop.f32.mrb[30].mxu0 }
0x1b68   : > { %v7919_v16 = vadd.f32 %v6023_v14, %v3358_v15  ;;  %v6452_v18 = vpop.f32.mrb[31].mxu0 }
0x1b6a   : > { %3538 = vrot.lane.b32.xlu0 %v7919_v16, %s8412_s3  ;;  %3368 = vrot.lane.b32.xlu1 %v7919_v16, %s8413_s1 }
0x1b6e   : > { %3536 = vrot.lane.b32.xlu0 %v7919_v16, %s8414_s27 }
0x1bdc   : > { %v3369_v19 = vpop.permute.xlu1 %3368  ;;  %v3539_v20 = vpop.permute.xlu0 %3538 }
0x1bdd   : > { %6454 = vmatpush3.xpose.msk.msra.mxu0 %vm870_vm2, %v3369_v19 }
0x1bde   : > { %6463 = vmatprep.subr.mxu0 %v7142_v1 }
0x1be0   : > { %6456 = vmatmul.mubr.msk.f32.vlgmr.msra.gmra.mrb[32].mxu0 %vm870_vm2, %v7919_v16  ;;  %v3537_v22 = vpop.permute.xlu0 %3536 }
0x1be1   : > { %6464 = vmatpush3.xpose.msk.msra.mxu0 %vm870_vm2, %v3539_v20  ;;  %6465 = vmatprep.mubr.msk.f32.mxu0 %vm7141_vm0, %v7142_v1 }
0x1be2   : > { %6473 = vmatprep.subr.mxu0 %v7142_v1 }
0x1be4   : > { %6466 = vmatmul.mubr.msk.f32.vlgmr.msra.gmra.mrb[34].mxu0 %vm870_vm2, %v3537_v22 }
0x1be5   : > { %6475 = vmatprep.mubr.msk.f32.mxu0 %vm7141_vm0, %v7142_v1  ;;  %6474 = vmatpush3.msra.mxu0 %v6026_v43 }
0x1be6   : > { %6483 = vmatprep.subr.mxu0 %v7142_v1 }
0x1cb3   : > { %v3440_v23 = vpop.f32.mrb[32].mxu0 }
0x1cb4   : > { %v3444_v21 = vmul.f32 0.35355338, %v3440_v23  ;;  %v6457_v25 = vpop.f32.mrb[33].mxu0 }
0x1cb6   : > { %v3445_v27 = vadd.f32 %v7940_v26, %v3444_v21 }
0x1cb7   : > { %v3610_v29 = vpop.f32.mrb[34].mxu0 }
0x1cb8   : > { %v3614_v30 = vmul.f32 0.35355338, %v3610_v29  ;;  %v6467_v31 = vpop.f32.mrb[35].mxu0  ;;  %v3446_v32 = vsel %vm870_vm2, %v3445_v27, -inf }
0x1cb9   : > { %3447 = vmax.xlane.f32.xlu0 %v3446_v32 }
0x1cba   : > { %v3615_v34 = vadd.f32 %v7940_v26, %v3614_v30 }
0x1cbc   : > { %v3616_v35 = vsel %vm870_vm2, %v3615_v34, -inf }
0x1cbd   : > { %3617 = vmax.xlane.f32.xlu1 %v3616_v35  ;;  %v6027_v35 = vld [vmem:[%s8400_s6 + $0x30] sm:$0xff] }
0x1cce   : > { %3630 = vrot.lane.b32.xlu1 %v7919_v16, %s8416_s0  ;;  %s8420_s0 = smov 48  }
0x1cd2   : > { %3852 = vrot.lane.b32.xlu1 %v7919_v16, %s8417_s18 }
0x1d46   : > { %v3448_v36 = vpop.xlane.xlu0 %3447 }
0x1d47   : > { %v3449_v28 = vsub.f32 %v3445_v27, %v3448_v36 }
0x1d49   : > { %v3450_v37 = vmul.f32 1.442695, %v3449_v28 }
0x1d4a   : > { %v3618_v17 = vpop.xlane.xlu1 %3617 }
0x1d4b   : > { %6838 = vpow2.f32 %v3450_v37  ;;  %v3619_v11 = vsub.f32 %v3615_v34, %v3618_v17 }
0x1d4d   : > { %v3620_v38 = vmul.f32 1.442695, %v3619_v11 }
0x1d4e   : > { %v3631_v55 = vpop.permute.xlu1 %3630 }
0x1d4f   : > { %6840 = vpow2.f32 %v3620_v38 }
0x1d52   : > { %v3853_v8 = vpop.permute.xlu1 %3852 }
0x1d55   : > { %v6839_v39 = vpop.eup %6838 }
0x1d56   : > { %v3452_v40 = vsel %vm870_vm2, %v6839_v39, 0.0 }
0x1d57   : > { %3453 = vadd.xlane.f32.xlu0 %v3452_v40 }
0x1d59   : > { %v6841_v41 = vpop.eup %6840 }
0x1d5a   : > { %v3622_v42 = vsel %vm870_vm2, %v6841_v41, 0.0 }
0x1d5b   : > { %3623 = vadd.xlane.f32.xlu0 %v3622_v42 }
0x1d71   : > { %3460 = vrot.lane.b32.xlu0 %v7919_v16, %s8418_s11  ;;  %s8421_s11 = smov 104  }
0x1d75   : > { %3854 = vrot.lane.b32.xlu0 %v7919_v16, %s8419_s28 }
0x1de4   : > { %v3454_v44 = vpop.xlane.xlu0 %3453 }
0x1de5   : > { %6842 = vrcp.f32 %v3454_v44 }
0x1de8   : > { %v3624_v45 = vpop.xlane.xlu0 %3623 }
0x1de9   : > { %6844 = vrcp.f32 %v3624_v45 }
0x1dec   : > { %v3461_v46 = vpop.permute.xlu0 %3460 }
0x1ded   : > { %6459 = vmatpush3.msra.mxu1 %v3461_v46 }
0x1dee   : > { %6468 = vmatprep.subr.mxu1 %v7142_v1 }
0x1def   : > { %v6843_v47 = vpop.eup %6842 }
0x1df0   : > { %v3456_v48 = vmul.f32 %v6843_v47, %v3454_v44  ;;  %v3855_v61 = vpop.permute.xlu0 %3854 }
0x1df2   : > { %v3457_v49 = vsub.f32 2.0, %v3456_v48 }
0x1df3   : > { %v6845_v50 = vpop.eup %6844 }
0x1df4   : > { %v3458_v51 = vmul.f32 %v6843_v47, %v3457_v49  ;;  %v3626_v52 = vmul.f32 %v6845_v50, %v3624_v45  ;;  %v6028_v45 = vld [vmem:[%s8400_s6 + $0x38] sm:$0xff] }
0x1df6   : > { %v3459_v53 = vmul.f32 %v6839_v39, %v3458_v51  ;;  %v3627_v54 = vsub.f32 2.0, %v3626_v52 }
0x1df8   : > { %v3628_v24 = vmul.f32 %v6845_v50, %v3627_v54  ;;  %6461 = vmatmul.mubr.msk.f32.vlgmr.msra.gmra.mrb[28].mxu1 %vm870_vm2, %v3459_v53 }
0x1df9   : > { %6469 = vmatpush3.msra.mxu1 %v3631_v55  ;;  %6470 = vmatprep.mubr.msk.f32.mxu1 %vm7141_vm0, %v7142_v1 }
0x1dfa   : > { %v3629_v56 = vmul.f32 %v6841_v41, %v3628_v24  ;;  %6478 = vmatprep.subr.mxu1 %v7142_v1 }
0x1dfc   : > { %6471 = vmatmul.mubr.msk.f32.vlgmr.msra.gmra.mrb[30].mxu1 %vm870_vm2, %v3629_v56  ;;  %v6046_v56 = vld [vmem:[%s8401_s7 + $0x1] ss:$0 sm:$0xff] }
0x1dfd   : > { %6480 = vmatprep.mubr.msk.f32.mxu1 %vm7141_vm0, %v7142_v1  ;;  %6479 = vmatpush3.msra.mxu1 %v6025_v57 }
0x1dfe   : > { %6488 = vmatprep.subr.mxu1 %v7142_v1 }
0x1ecb   : > { %v3532_v58 = vpop.f32.mrb[28].mxu1 }
0x1ecc   : > { %v6462_v59 = vpop.f32.mrb[29].mxu1  ;;  %6481 = vmatmul.mubr.msk.f32.vlgmr.msra.gmra.mrb[32].mxu1 %vm870_vm2, %v3532_v58 }
0x1ecd   : > { %6490 = vmatprep.mubr.msk.f32.mxu1 %vm7141_vm0, %v7142_v1 }
0x1ecf   : > { %v3702_v60 = vpop.f32.mrb[30].mxu1 }
0x1ed0   : > { %v6472_v62 = vpop.f32.mrb[31].mxu1  ;;  %6476 = vmatmul.mubr.msk.f32.vlgmr.msra.gmra.mrb[36].mxu0 %vm870_vm2, %v3702_v60 }
0x1ed1   : > { %6484 = vmatpush3.xpose.msk.msra.mxu0 %vm870_vm2, %v3855_v61  ;;  %6485 = vmatprep.mubr.msk.f32.mxu0 %vm7141_vm0, %v7142_v1 }
0x1ed2   : > { %6493 = vmatprep.subr.mxu0 %v7142_v1 }
0x1ed4   : > { %6486 = vmatmul.mubr.msk.f32.vlgmr.msra.gmra.mrb[38].mxu0 %vm870_vm2, %v3853_v8 }
0x1ed5   : > { %6495 = vmatprep.mubr.msk.f32.mxu0 %vm7141_vm0, %v7142_v1  ;;  %6494 = vmatpush3.msra.mxu0 %v6027_v35 }
0x1ed6   : > { %6503 = vmatprep.subr.mxu0 %v7142_v1 }
0x1f9f   : > { %v3848_v63 = vpop.f32.mrb[32].mxu1 }
0x1fa0   : > { %v6482_v2 = vpop.f32.mrb[33].mxu1 }
0x1fa3   : > { %v3775_v3 = vpop.f32.mrb[36].mxu0 }
0x1fa4   : > { %v3849_v4 = vadd.f32 %v3848_v63, %v3775_v3  ;;  %v6477_v5 = vpop.f32.mrb[37].mxu0 }
0x1fa5   : > { %v4469_v5 = vld [vmem:[#allocation8 + $0x28] sm:$0xff] }
0x1fa7   : > { %v3926_v6 = vpop.f32.mrb[38].mxu0 }
0x1fa8   : > { %v3930_v7 = vmul.f32 0.35355338, %v3926_v6  ;;  %v6487_v10 = vpop.f32.mrb[39].mxu0 }
0x1fa9   : > { %v4470_v10 = vld [vmem:[#allocation8 + $0x30] sm:$0xff] }
0x1faa   : > { %v3931_v12 = vadd.f32 %v7940_v26, %v3930_v7  ;;  %v6052_v7 = vld [vmem:[%s8271_s8 + $0x28] sm:$0xff] }
0x1fac   : > { %v3932_v14 = vsel %vm870_vm2, %v3931_v12, -inf }
0x1fad   : > { %3933 = vmax.xlane.f32.xlu0 %v3932_v14  ;;  %v4471_v14 = vld [vmem:[#allocation8 + $0x38] sm:$0xff] }
0x1fc3   : > { %3946 = vrot.lane.b32.xlu0 %v7919_v16, %s8420_s0 }
0x1fc7   : > { %4096 = vrot.lane.b32.xlu0 %v7919_v16, %s8421_s11 }
0x203a   : > { %v3934_v15 = vpop.xlane.xlu0 %3933 }
0x203b   : > { %v3935_v18 = vsub.f32 %v3931_v12, %v3934_v15  ;;  %v6677_v15 = vpack.c.bf16 %v4471_v14, %v4470_v10 }
0x203d   : > { %v3936_v19 = vmul.f32 1.442695, %v3935_v18  ;;  %v6053_v18 = vld [vmem:[%s8271_s8 + $0x30] sm:$0xff] }
0x203e   : > { %v3947_v20 = vpop.permute.xlu0 %3946 }
0x203f   : > { %6846 = vpow2.f32 %v3936_v19  ;;  %6489 = vmatpush3.msra.mxu1 %v3947_v20  ;;  %v6054_v19 = vld [vmem:[%s8271_s8 + $0x38] sm:$0xff] }
0x2040   : > { %6498 = vmatprep.subr.mxu1 %v7142_v1  ;;  %v6671_v20 = vpack.c.bf16 %v6054_v19, %v6053_v18 }
0x2042   : > { %v4097_v34 = vpop.permute.xlu0 %4096 }
0x2049   : > { %v6847_v22 = vpop.eup %6846 }
0x204a   : > { %v3938_v23 = vsel %vm870_vm2, %v6847_v22, 0.0 }
0x204b   : > { %3939 = vadd.xlane.f32.xlu1 %v3938_v23 }
0x205c   : > { %4098 = vrot.lane.b32.xlu1 %v7919_v16, %s8422_s25 }
0x20d8   : > { %v3940_v21 = vpop.xlane.xlu1 %3939 }
0x20d9   : > { %6848 = vrcp.f32 %v3940_v21 }
0x20dc   : > { %v4099_v32 = vpop.permute.xlu1 %4098 }
0x20e3   : > { %v6849_v25 = vpop.eup %6848 }
0x20e4   : > { %v3942_v27 = vmul.f32 %v6849_v25, %v3940_v21 }
0x20e6   : > { %v3943_v29 = vsub.f32 2.0, %v3942_v27  ;;  %v6049_v27 = vld [vmem:[%s8402_s20 + $0x3] ss:$0 sm:$0xff] }
0x20e8   : > { %v3944_v30 = vmul.f32 %v6849_v25, %v3943_v29 }
0x20ea   : > { %v3945_v31 = vmul.f32 %v6847_v22, %v3944_v30 }
0x20ec   : > { %6491 = vmatmul.mubr.msk.f32.vlgmr.msra.gmra.mrb[34].mxu1 %vm870_vm2, %v3945_v31 }
0x20ed   : > { %6499 = vmatpush3.xpose.msk.msra.mxu1 %vm870_vm2, %v4099_v32  ;;  %6500 = vmatprep.mubr.msk.f32.mxu1 %vm7141_vm0, %v7142_v1  ;;  %v6059_v32 = vld [vmem:[%s8404_s17 + $0x1] ss:$0 sm:$0xff] }
0x20ee   : > { %6508 = vmatprep.subr.mxu1 %v7142_v1 }
0x20f0   : > { %6501 = vmatmul.mubr.msk.f32.vlgmr.msra.gmra.mrb[36].mxu1 %vm870_vm2, %v4097_v34 }
0x20f1   : > { %6510 = vmatprep.mubr.msk.f32.mxu1 %vm7141_vm0, %v7142_v1  ;;  %6509 = vmatpush3.msra.mxu1 %v6028_v45 }
0x20f2   : > { %6673 = vmatprep.subr.bf16.mxu1 %v7140_v0 }
0x21bf   : > { %v4018_v36 = vpop.f32.mrb[34].mxu1 }
0x21c0   : > { %v6492_v28 = vpop.f32.mrb[35].mxu1  ;;  %6496 = vmatmul.mubr.msk.f32.vlgmr.msra.gmra.mrb[40].mxu0 %vm870_vm2, %v4018_v36 }
0x21c1   : > { %6505 = vmatprep.mubr.msk.f32.mxu0 %vm7141_vm0, %v7142_v1  ;;  %v6056_v28 = vld [vmem:[%s8405_s21 + $0x1] ss:$0 sm:$0xff] }
0x21c3   : > { %v4170_v37 = vpop.f32.mrb[36].mxu1 }
0x21c4   : > { %v4174_v17 = vmul.f32 0.35355338, %v4170_v37  ;;  %v6502_v11 = vpop.f32.mrb[37].mxu1 }
0x21c6   : > { %v4175_v38 = vadd.f32 %v7940_v26, %v4174_v17 }
0x21c8   : > { %v4176_v39 = vsel %vm870_vm2, %v4175_v38, -inf }
0x21c9   : > { %4177 = vmax.xlane.f32.xlu1 %v4176_v39 }
0x2256   : > { %v4178_v40 = vpop.xlane.xlu1 %4177 }
0x2257   : > { %v4179_v41 = vsub.f32 %v4175_v38, %v4178_v40 }
0x2259   : > { %v4180_v42 = vmul.f32 1.442695, %v4179_v41 }
0x225b   : > { %6850 = vpow2.f32 %v4180_v42 }
0x2265   : > { %v6851_v43 = vpop.eup %6850 }
0x2266   : > { %v4182_v44 = vsel %vm870_vm2, %v6851_v43, 0.0 }
0x2267   : > { %4183 = vadd.xlane.f32.xlu0 %v4182_v44 }
0x227d   : > { %4190 = vrot.lane.b32.xlu0 %v7919_v16, %s8423_s5  ;;  %s6102_s5 = sshll.u32 %s7281_s2, 7  ;;  %s7154_s2 = smov [#allocation13]  }
0x2293   : > { %v4091_v26 = vpop.f32.mrb[40].mxu0 }
0x2294   : > { %v4095_v46 = vadd.f32 %v4091_v26, %v3849_v4  ;;  %v6497_v47 = vpop.f32.mrb[41].mxu0  ;;  %v4468_v4 = vld [vmem:[#allocation8 + $0x20] sm:$0xff] }
0x2295   : > { %v6674_v6 = vpack.c.bf16 %v4469_v5, %v4468_v4 }
0x22f4   : > { %v4184_v48 = vpop.xlane.xlu0 %4183 }
0x22f5   : > { %6852 = vrcp.f32 %v4184_v48 }
0x22f8   : > { %v4191_v49 = vpop.permute.xlu0 %4190 }
0x22f9   : > { %6504 = vmatpush3.msra.mxu0 %v4191_v49 }
0x22fa   : > { %6667 = vmatprep.subr.bf16.mxu0 %v7140_v0 }
0x22ff   : > { %v6853_v50 = vpop.eup %6852 }
0x2300   : > { %v4186_v51 = vmul.f32 %v6853_v50, %v4184_v48 }
0x2302   : > { %v4187_v52 = vsub.f32 2.0, %v4186_v51 }
0x2304   : > { %v4188_v16 = vmul.f32 %v6853_v50, %v4187_v52 }
0x2306   : > { %v4189_v53 = vmul.f32 %v6851_v43, %v4188_v16 }
0x2308   : > { %6506 = vmatmul.mubr.msk.f32.vlgmr.msra.gmra.mrb[42].mxu0 %vm870_vm2, %v4189_v53 }
0x2309   : > { %6521 = vmatprep.mubr.msk.f32.mxu0 %vm7141_vm0, %v7142_v1 }
0x23db   : > { %v4262_v54 = vpop.f32.mrb[42].mxu0 }
0x23dc   : > { %v6507_v55 = vpop.f32.mrb[43].mxu0  ;;  %6511 = vmatmul.mubr.msk.f32.vlgmr.msra.gmra.mrb[38].mxu1 %vm870_vm2, %v4262_v54 }
0x23dd   : > { %6532 = vmatprep.mubr.msk.f32.mxu1 %vm7141_vm0, %v7142_v1  ;;  %6675 = vmatpush3.bf16.msra.mxu1 %v6674_v6 }
0x23de   : > { %6676 = vmatprep.subr.bf16.mxu1 %v7140_v0 }
0x23e1   : > { %6678 = vmatpush3.bf16.msra.mxu1 %v6677_v15 }
0x23e2   : > { %6540 = vmatprep.subr.mxu1 %v7142_v1 }
0x23e4   : > { %6533 = vmatmul.mubr.msk.f32.vlgmr.msra.gmra.mrb[40].mxu1 %vm789_vm1, %v7705_v9  ;;  %v6050_v9 = vld [vmem:[%s8403_s29 + $0x3] ss:$0 sm:$0xff] }
0x23e5   : > { %6542 = vmatprep.mubr.msk.f32.mxu1 %vm7141_vm0, %v7142_v1 }
0x24af   : > { %v4335_v24 = vpop.f32.mrb[38].mxu1 }
0x24b0   : > { %v4339_v57 = vadd.f32 %v4335_v24, %v4095_v46  ;;  %v6512_v58 = vpop.f32.mrb[39].mxu1 }
0x24b2   : > { %v4348_v59 = vadd.f32 %v6046_v56, %v4339_v57 }
0x24b4   : > { %v4349_v60 = vadd.f32 %v4348_v59, %v7910_v13  ;;  %v6051_v13 = vld [vmem:[%s8271_s8 + $0x20] sm:$0xff] }
0x24b5   : > { %v6668_v12 = vpack.c.bf16 %v6052_v7, %v6051_v13  ;;  %v4551_v7 = vld [vmem:[#allocation10 + $0x20] sm:$0xff] }
0x24b6   : > { %v4354_v61 = vsel %vm789_vm1, %v4349_v60, 0.0 }
0x24b7   : > { %4355 = vadd.xlane.f32.xlu1 %v4354_v61  ;;  %6669 = vmatpush3.bf16.msra.mxu0 %v6668_v12  ;;  %v4546_v34 = vpop.f32.mrb[40].mxu1 }
0x24b8   : > { %6670 = vmatprep.subr.bf16.mxu0 %v7140_v0  ;;  %v8065_v35 = vadd.f32 %v6059_v32, %v4546_v34  ;;  %v6534_v36 = vpop.f32.mrb[41].mxu1 }
0x24bb   : > { %6672 = vmatpush3.bf16.msra.mxu0 %v6671_v20 }
0x24bc   : > { %6535 = vmatprep.subr.mxu0 %v7142_v1 }
0x2544   : > { %v4356_v62 = vpop.xlane.xlu1 %4355 }
0x2545   : > { %v4357_v8 = vmul.f32 0.03125, %v4356_v62 }
0x2547   : > { %v4358_v63 = vsub.f32 %v4349_v60, %v4357_v8  ;;  %v4552_v8 = vld [vmem:[#allocation10 + $0x28] sm:$0xff] }
0x2549   : > { %v4359_v2 = vmul.f32 %v4358_v63, %v4358_v63 }
0x254b   : > { %v4360_v3 = vsel %vm789_vm1, %v4359_v2, 0.0 }
0x254c   : > { %4361 = vadd.xlane.f32.xlu1 %v4360_v3 }
0x255d   : > { %4725 = vrot.lane.b32.xlu1 %v8065_v35, %s8414_s27 }
0x25d9   : > { %v4362_v22 = vpop.xlane.xlu1 %4361 }
0x25da   : > { %v4363_v23 = vmul.f32 0.03125, %v4362_v22 }
0x25dc   : > { %v4364_v21 = vadd.f32 1e-05, %v4363_v23 }
0x25dd   : > { %v4726_v38 = vpop.permute.xlu1 %4725 }
0x25de   : > { %6854 = vrsqrt.f32 %v4364_v21 }
0x25e8   : > { %v6855_v25 = vpop.eup %6854 }
0x25e9   : > { %v4366_v29 = vmul.f32 %v6855_v25, %v4358_v63 }
0x25eb   : > { %v4373_v30 = vmul.f32 %v6049_v27, %v4366_v29 }
0x25ed   : > { %v8056_v31 = vadd.f32 %v6050_v9, %v4373_v30  ;;  %v6877_v30 = vld [vmem:[%s7756_s4] ss:$0 sm:$0xff]  ;;  %s770_s4 = scalar_lea.vmem [#allocation13], %s7523_s9  ;;  %s7056_s9 = sshll.u32 %s7154_s2, 4  ;;  %s7057_s9 = int_to_ptr.vmem [resolvable:$false] %s7056_s9 }
0x25ee   : > { %s7058_s6 = scalar_lea.vmem %s7057_s9, 256 }
0x25ef   : > { %6522 = vmatmul.mubr.msk.f32.vlgmr.msra.gmra.mrb[44].mxu0 %vm789_vm1, %v8056_v31 }
0x25f0   : > { %6537 = vmatprep.mubr.msk.f32.mxu0 %vm7141_vm0, %v7142_v1  ;;  %6536 = vmatpush3.xpose.msk.msra.mxu0 %vm870_vm2, %v8065_v35 }
0x25f1   : > { %6545 = vmatprep.subr.mxu0 %v7142_v1 }
0x26c2   : > { %v4463_v37 = vpop.f32.mrb[44].mxu0 }
0x26c3   : > { %v8075_v17 = vadd.f32 %v6056_v28, %v4463_v37  ;;  %v6523_v11 = vpop.f32.mrb[45].mxu0 }
0x26c5   : > { %4723 = vrot.lane.b32.xlu0 %v8075_v17, %s8414_s27  ;;  %6538 = vmatmul.mubr.msk.f32.vlgmr.msra.gmra.mrb[46].mxu0 %vm870_vm2, %v8075_v17 }
0x26c6   : > { %6546 = vmatpush3.xpose.msk.msra.mxu0 %vm870_vm2, %v4726_v38  ;;  %6547 = vmatprep.mubr.msk.f32.mxu0 %vm7141_vm0, %v7142_v1 }
0x26c7   : > { %6555 = vmatprep.subr.mxu0 %v7142_v1 }
0x2737   : > { %v4724_v39 = vpop.permute.xlu0 %4723 }
0x2738   : > { %6548 = vmatmul.mubr.msk.f32.vlgmr.msra.gmra.mrb[48].mxu0 %vm870_vm2, %v4724_v39 }
0x2739   : > { %6557 = vmatprep.mubr.msk.f32.mxu0 %vm7141_vm0, %v7142_v1  ;;  %6556 = vmatpush3.msra.mxu0 %v4552_v8 }
0x273a   : > { %6565 = vmatprep.subr.mxu0 %v7142_v1 }
0x2798   : > { %v4627_v40 = vpop.f32.mrb[46].mxu0 }
0x2799   : > { %v4631_v41 = vmul.f32 0.35355338, %v4627_v40  ;;  %v6539_v42 = vpop.f32.mrb[47].mxu0 }
0x279b   : > { %v4632_v43 = vadd.f32 %v7759_v33, %v4631_v41 }
0x279d   : > { %v4633_v44 = vsel %vm870_vm2, %v4632_v43, -inf }
0x279e   : > { %4634 = vmax.xlane.f32.xlu0 %v4633_v44 }
0x280b   : > { %v4797_v45 = vpop.f32.mrb[48].mxu0 }
0x280c   : > { %v4801_v26 = vmul.f32 0.35355338, %v4797_v45  ;;  %v6549_v46 = vpop.f32.mrb[49].mxu0 }
0x280d   : > { %v4553_v46 = vld [vmem:[#allocation10 + $0x30] sm:$0xff] }
0x280e   : > { %v4802_v47 = vadd.f32 %v7759_v33, %v4801_v26 }
0x2810   : > { %v4803_v48 = vsel %vm870_vm2, %v4802_v47, -inf }
0x2811   : > { %4804 = vmax.xlane.f32.xlu1 %v4803_v48 }
0x2822   : > { %4647 = vrot.lane.b32.xlu1 %v8065_v35, %s8413_s1 }
0x2826   : > { %5041 = vrot.lane.b32.xlu1 %v8065_v35, %s8417_s18 }
0x282a   : > { %5039 = vrot.lane.b32.xlu1 %v8075_v17, %s8417_s18  ;;  %s8425_s18 = sld [smem:[#allocation44_spill]] }
0x282b   : > { %v4635_v49 = vpop.xlane.xlu0 %4634 }
0x282c   : > { %v4636_v50 = vsub.f32 %v4632_v43, %v4635_v49 }
0x282e   : > { %v4637_v51 = vmul.f32 1.442695, %v4636_v50 }
0x2830   : > { %6856 = vpow2.f32 %v4637_v51 }
0x283a   : > { %v6857_v52 = vpop.eup %6856 }
0x283b   : > { %v4639_v16 = vsel %vm870_vm2, %v6857_v52, 0.0 }
0x283c   : > { %4640 = vadd.xlane.f32.xlu0 %v4639_v16 }
0x289e   : > { %v4805_v33 = vpop.xlane.xlu1 %4804 }
0x289f   : > { %v4806_v53 = vsub.f32 %v4802_v47, %v4805_v33 }
0x28a1   : > { %v4807_v54 = vmul.f32 1.442695, %v4806_v53 }
0x28a2   : > { %v4648_v55 = vpop.permute.xlu1 %4647 }
0x28a3   : > { %6858 = vpow2.f32 %v4807_v54  ;;  %6541 = vmatpush3.msra.mxu1 %v4648_v55 }
0x28a4   : > { %6550 = vmatprep.subr.mxu1 %v7142_v1 }
0x28a6   : > { %v5042_v14 = vpop.permute.xlu1 %5041 }
0x28aa   : > { %v5040_v19 = vpop.permute.xlu1 %5039 }
0x28ad   : > { %v6859_v24 = vpop.eup %6858 }
0x28ae   : > { %v4809_v56 = vsel %vm870_vm2, %v6859_v24, 0.0 }
0x28af   : > { %4810 = vadd.xlane.f32.xlu0 %v4809_v56  ;;  %v4554_v56 = vld [vmem:[#allocation10 + $0x38] sm:$0xff] }
0x28c5   : > { %4817 = vrot.lane.b32.xlu0 %v8065_v35, %s8412_s3  ;;  %s5792_s3 = sshll.u32 %s770_s4, 4  ;;  %s8220_s3 = int_to_ptr.vmem [resolvable:$true] %s5792_s3 }
0x28c6   : > { %p7059_p7 = scmp.lt.s32.totalorder %s8220_s3, %s7057_s9 }
0x28c9   : > { %v4641_v57 = vpop.xlane.xlu0 %4640 }
0x28ca   : > { %6860 = vrcp.f32 %v4641_v57 }
0x28d4   : > { %v6861_v58 = vpop.eup %6860 }
0x28d5   : > { %v4643_v59 = vmul.f32 %v6861_v58, %v4641_v57 }
0x28d7   : > { %v4644_v60 = vsub.f32 2.0, %v4643_v59 }
0x28d9   : > { %v4645_v61 = vmul.f32 %v6861_v58, %v4644_v60 }
0x28db   : > { %v4646_v62 = vmul.f32 %v6857_v52, %v4645_v61 }
0x28dd   : > { %6543 = vmatmul.mubr.msk.f32.vlgmr.msra.gmra.mrb[42].mxu1 %vm870_vm2, %v4646_v62 }
0x28de   : > { %6552 = vmatprep.mubr.msk.f32.mxu1 %vm7141_vm0, %v7142_v1 }
0x293c   : > { %v4811_v63 = vpop.xlane.xlu0 %4810 }
0x293d   : > { %6862 = vrcp.f32 %v4811_v63 }
0x2940   : > { %v4818_v2 = vpop.permute.xlu0 %4817 }
0x2941   : > { %6551 = vmatpush3.msra.mxu1 %v4818_v2 }
0x2942   : > { %6560 = vmatprep.subr.mxu1 %v7142_v1 }
0x2947   : > { %v6863_v3 = vpop.eup %6862 }
0x2948   : > { %v4813_v4 = vmul.f32 %v6863_v3, %v4811_v63 }
0x294a   : > { %v4814_v5 = vsub.f32 2.0, %v4813_v4 }
0x294c   : > { %v4815_v6 = vmul.f32 %v6863_v3, %v4814_v5 }
0x294e   : > { %v4816_v13 = vmul.f32 %v6859_v24, %v4815_v6  ;;  %v6078_v6 = vld [vmem:[%s8407_s16 + $0x1] ss:$0 sm:$0xff] }
0x2950   : > { %6553 = vmatmul.mubr.msk.f32.vlgmr.msra.gmra.mrb[44].mxu1 %vm870_vm2, %v4816_v13 }
0x2951   : > { %6561 = vmatpush3.msra.mxu1 %v4551_v7  ;;  %6562 = vmatprep.mubr.msk.f32.mxu1 %vm7141_vm0, %v7142_v1 }
0x2952   : > { %6570 = vmatprep.subr.mxu1 %v7142_v1 }
0x29b0   : > { %v4719_v10 = vpop.f32.mrb[42].mxu1 }
0x29b1   : > { %v6544_v12 = vpop.f32.mrb[43].mxu1  ;;  %6563 = vmatmul.mubr.msk.f32.vlgmr.msra.gmra.mrb[46].mxu1 %vm870_vm2, %v4719_v10 }
0x29b2   : > { %6572 = vmatprep.mubr.msk.f32.mxu1 %vm7141_vm0, %v7142_v1 }
0x2a23   : > { %v4889_v15 = vpop.f32.mrb[44].mxu1 }
0x2a24   : > { %v6554_v18 = vpop.f32.mrb[45].mxu1  ;;  %6558 = vmatmul.mubr.msk.f32.vlgmr.msra.gmra.mrb[50].mxu0 %vm870_vm2, %v4889_v15 }
0x2a25   : > { %6566 = vmatpush3.xpose.msk.msra.mxu0 %vm870_vm2, %v5042_v14  ;;  %6567 = vmatprep.mubr.msk.f32.mxu0 %vm7141_vm0, %v7142_v1 }
0x2a26   : > { %6575 = vmatprep.subr.mxu0 %v7142_v1 }
0x2a28   : > { %6568 = vmatmul.mubr.msk.f32.vlgmr.msra.gmra.mrb[52].mxu0 %vm870_vm2, %v5040_v19 }
0x2a29   : > { %6577 = vmatprep.mubr.msk.f32.mxu0 %vm7141_vm0, %v7142_v1  ;;  %6576 = vmatpush3.msra.mxu0 %v4553_v46 }
0x2a2a   : > { %6585 = vmatprep.subr.mxu0 %v7142_v1 }
0x2a84   : > { %v5035_v20 = vpop.f32.mrb[46].mxu1 }
0x2a85   : > { %v6564_v22 = vpop.f32.mrb[47].mxu1 }
0x2af7   : > { %v4962_v23 = vpop.f32.mrb[50].mxu0 }
0x2af8   : > { %v5036_v21 = vadd.f32 %v5035_v20, %v4962_v23  ;;  %v6559_v25 = vpop.f32.mrb[51].mxu0  ;;  %v5570_v23 = vld [vmem:[#allocation11 + $0x28] sm:$0xff] }
0x2af9   : > { %v5571_v25 = vld [vmem:[#allocation11 + $0x30] sm:$0xff] }
0x2afb   : > { %v5113_v27 = vpop.f32.mrb[52].mxu0 }
0x2afc   : > { %v5117_v29 = vmul.f32 0.35355338, %v5113_v27  ;;  %v6569_v9 = vpop.f32.mrb[53].mxu0  ;;  %v5572_v27 = vld [vmem:[#allocation11 + $0x38] sm:$0xff] }
0x2afd   : > { %v6087_v9 = vld [vmem:[%s8408_s30 + $0x48] sm:$0xff] }
0x2afe   : > { %v5118_v32 = vadd.f32 %v6877_v30, %v5117_v29  ;;  %v6683_v29 = vpack.c.bf16 %v5572_v27, %v5571_v25 }
0x2b00   : > { %v5119_v34 = vsel %vm870_vm2, %v5118_v32, -inf }
0x2b01   : > { %5120 = vmax.xlane.f32.xlu0 %v5119_v34  ;;  %v6089_v34 = vld [vmem:[%s8408_s30 + $0x58] sm:$0xff] }
0x2b17   : > { %5133 = vrot.lane.b32.xlu0 %v8065_v35, %s8419_s28  ;;  %s8218_s28 = scalar_lea.hbm %s8425_s18, %s6102_s5 }
0x2b1b   : > { %5283 = vrot.lane.b32.xlu0 %v8075_v17, %s8421_s11 }
0x2b8e   : > { %v5121_v36 = vpop.xlane.xlu0 %5120 }
0x2b8f   : > { %v5122_v28 = vsub.f32 %v5118_v32, %v5121_v36 }
0x2b91   : > { %v5123_v37 = vmul.f32 1.442695, %v5122_v28  ;;  %v6090_v28 = vld [vmem:[%s8408_s30 + $0x60] sm:$0xff] }
0x2b92   : > { %v5134_v11 = vpop.permute.xlu0 %5133 }
0x2b93   : > { %6864 = vpow2.f32 %v5123_v37  ;;  %6571 = vmatpush3.msra.mxu1 %v5134_v11  ;;  %v6091_v37 = vld [vmem:[%s8408_s30 + $0x68] sm:$0xff] }
0x2b94   : > { %6580 = vmatprep.subr.mxu1 %v7142_v1  ;;  %v6692_v11 = vpack.c.bf16 %v6091_v37, %v6090_v28 }
0x2b96   : > { %v5284_v26 = vpop.permute.xlu0 %5283 }
0x2b9d   : > { %v6865_v38 = vpop.eup %6864 }
0x2b9e   : > { %v5125_v39 = vsel %vm870_vm2, %v6865_v38, 0.0 }
0x2b9f   : > { %5126 = vadd.xlane.f32.xlu1 %v5125_v39 }
0x2bb0   : > { %5285 = vrot.lane.b32.xlu1 %v8065_v35, %s8421_s11  ;;  %s5779_s11 = scalar_lea.sflag [#allocation4], %s7520_s24 }
0x2c2c   : > { %v5127_v40 = vpop.xlane.xlu1 %5126 }
0x2c2d   : > { %6866 = vrcp.f32 %v5127_v40 }
0x2c30   : > { %v5286_v45 = vpop.permute.xlu1 %5285 }
0x2c37   : > { %v6867_v41 = vpop.eup %6866 }
0x2c38   : > { %v5129_v42 = vmul.f32 %v6867_v41, %v5127_v40 }
0x2c3a   : > { %v5130_v17 = vsub.f32 2.0, %v5129_v42  ;;  %v6081_v42 = vld [vmem:[%s8402_s20 + $0x4] ss:$0 sm:$0xff] }
0x2c3c   : > { %v5131_v43 = vmul.f32 %v6867_v41, %v5130_v17 }
0x2c3e   : > { %v5132_v44 = vmul.f32 %v6865_v38, %v5131_v43  ;;  %v6082_v43 = vld [vmem:[%s8403_s29 + $0x4] ss:$0 sm:$0xff] }
0x2c40   : > { %6573 = vmatmul.mubr.msk.f32.vlgmr.msra.gmra.mrb[48].mxu1 %vm870_vm2, %v5132_v44 }
0x2c41   : > { %6581 = vmatpush3.xpose.msk.msra.mxu1 %vm870_vm2, %v5286_v45  ;;  %6582 = vmatprep.mubr.msk.f32.mxu1 %vm7141_vm0, %v7142_v1 }
0x2c42   : > { %6590 = vmatprep.subr.mxu1 %v7142_v1 }
0x2c44   : > { %6583 = vmatmul.mubr.msk.f32.vlgmr.msra.gmra.mrb[50].mxu1 %vm870_vm2, %v5284_v26  ;;  %v6093_v26 = vld [vmem:[%s8408_s30 + $0x78] sm:$0xff] }
0x2c45   : > { %6592 = vmatprep.mubr.msk.f32.mxu1 %vm7141_vm0, %v7142_v1  ;;  %6591 = vmatpush3.msra.mxu1 %v4554_v56 }
0x2c46   : > { %6685 = vmatprep.subr.bf16.mxu1 %v7140_v0 }
0x2d13   : > { %v5205_v47 = vpop.f32.mrb[48].mxu1 }
0x2d14   : > { %v6574_v48 = vpop.f32.mrb[49].mxu1  ;;  %6578 = vmatmul.mubr.msk.f32.vlgmr.msra.gmra.mrb[54].mxu0 %vm870_vm2, %v5205_v47  ;;  %v6084_v47 = vld [vmem:[%s8409_s26 + $0x1] ss:$0 sm:$0xff] }
0x2d15   : > { %6587 = vmatprep.mubr.msk.f32.mxu0 %vm7141_vm0, %v7142_v1 }
0x2d17   : > { %v5357_v49 = vpop.f32.mrb[50].mxu1 }
0x2d18   : > { %v5361_v50 = vmul.f32 0.35355338, %v5357_v49  ;;  %v6584_v51 = vpop.f32.mrb[51].mxu1 }
0x2d1a   : > { %v5362_v52 = vadd.f32 %v6877_v30, %v5361_v50  ;;  %v6088_v30 = vld [vmem:[%s8408_s30 + $0x50] sm:$0xff] }
0x2d1b   : > { %v6689_v36 = vpack.c.bf16 %v6089_v34, %v6088_v30 }
0x2d1c   : > { %v5363_v16 = vsel %vm870_vm2, %v5362_v52, -inf }
0x2d1d   : > { %5364 = vmax.xlane.f32.xlu1 %v5363_v16 }
0x2daa   : > { %v5365_v33 = vpop.xlane.xlu1 %5364 }
0x2dab   : > { %v5366_v53 = vsub.f32 %v5362_v52, %v5365_v33  ;;  %v6095_v52 = vld [vmem:[%s8411_s13 + $0x1] ss:$0 sm:$0xff] }
0x2dad   : > { %v5367_v54 = vmul.f32 1.442695, %v5366_v53 }
0x2daf   : > { %6868 = vpow2.f32 %v5367_v54 }
0x2db9   : > { %v6869_v55 = vpop.eup %6868 }
0x2dba   : > { %v5369_v24 = vsel %vm870_vm2, %v6869_v55, 0.0 }
0x2dbb   : > { %5370 = vadd.xlane.f32.xlu0 %v5369_v24 }
0x2dd1   : > { %5377 = vrot.lane.b32.xlu0 %v8065_v35, %s8422_s25  ;;  %s7052_s25 = scalar_lea.vmem %s8220_s3, 128 }
0x2dd2   : > { %p7053_p0 = scmp.ne.s32.totalorder %s8220_s3, %s7052_s25  ;;  %p7060_p3 = scmp.lt.s32.totalorder %s7058_s6, %s7052_s25 }
0x2dd4   : > { %p7054_p9 = pnand %p7053_p0, %p8426_p4  ;;  %p7061_p5 = por %p7060_p3, %p7059_p7 }
0x2dd6   : > { %p7055_p13 = pneg %p7054_p9 }
0x2dd8   : > { %p7062_p2 = pnand %p7061_p5, %p7055_p13 }
0x2de7   : > { %v5278_v57 = vpop.f32.mrb[54].mxu0 }
0x2de8   : > { %v5282_v58 = vadd.f32 %v5278_v57, %v5036_v21  ;;  %v6579_v59 = vpop.f32.mrb[55].mxu0 }
0x2e48   : > { %v5371_v60 = vpop.xlane.xlu0 %5370 }
0x2e49   : > { %6870 = vrcp.f32 %v5371_v60 }
0x2e4c   : > { %v5378_v61 = vpop.permute.xlu0 %5377 }
0x2e4d   : > { %6586 = vmatpush3.msra.mxu0 %v5378_v61 }
0x2e4e   : > { %6679 = vmatprep.subr.bf16.mxu0 %v7140_v0 }
0x2e53   : > { %v6871_v62 = vpop.eup %6870 }
0x2e54   : > { %v5373_v8 = vmul.f32 %v6871_v62, %v5371_v60 }
0x2e56   : > { %v5374_v63 = vsub.f32 2.0, %v5373_v8 }
0x2e58   : > { %v5375_v2 = vmul.f32 %v6871_v62, %v5374_v63  ;;  %v6099_v63 = vld [vmem:[%s8402_s20 + $0x5] ss:$0 sm:$0xff] }
0x2e5a   : > { %v5376_v3 = vmul.f32 %v6869_v55, %v5375_v2 }
0x2e5c   : > { %6588 = vmatmul.mubr.msk.f32.vlgmr.msra.gmra.mrb[56].mxu0 %vm870_vm2, %v5376_v3  ;;  %v6100_v3 = vld [vmem:[%s8403_s29 + $0x5] ss:$0 sm:$0xff] }
0x2e5d   : > { %6603 = vmatprep.mubr.msk.f32.mxu0 %vm7141_vm0, %v7142_v1 }
0x2f2f   : > { %v5449_v35 = vpop.f32.mrb[56].mxu0 }
0x2f30   : > { %v6589_v4 = vpop.f32.mrb[57].mxu0  ;;  %6593 = vmatmul.mubr.msk.f32.vlgmr.msra.gmra.mrb[52].mxu1 %vm870_vm2, %v5449_v35 }
0x2f31   : > { %6622 = vmatprep.mubr.msk.f32.mxu1 %vm7141_vm0, %v7142_v1  ;;  %v5569_v1 = vld [vmem:[#allocation11 + $0x20] sm:$0xff] }
0x2f32   : > { %v6680_v21 = vpack.c.bf16 %v5570_v23, %v5569_v1 }
0x2f34   : > { %6681 = vmatpush3.bf16.msra.mxu0 %v6680_v21 }
0x2f35   : > { %6682 = vmatprep.subr.bf16.mxu0 %v7140_v0 }
0x2f38   : > { %6684 = vmatpush3.bf16.msra.mxu0 %v6683_v29 }
0x3003   : > { %v5522_v5 = vpop.f32.mrb[52].mxu1 }
0x3004   : > { %v5526_v13 = vadd.f32 %v5522_v5, %v5282_v58  ;;  %v6594_v7 = vpop.f32.mrb[53].mxu1 }
0x3006   : > { %v5535_v10 = vadd.f32 %v6078_v6, %v5526_v13 }
0x3008   : > { %v5536_v12 = vadd.f32 %v5535_v10, %v8056_v31  ;;  %v6086_v31 = vld [vmem:[%s8408_s30 + $0x40] sm:$0xff] }
0x3009   : > { %v6686_v32 = vpack.c.bf16 %v6087_v9, %v6086_v31 }
0x300a   : > { %v5541_v14 = vsel %vm789_vm1, %v5536_v12, 0.0 }
0x300b   : > { %5542 = vadd.xlane.f32.xlu1 %v5541_v14  ;;  %6687 = vmatpush3.bf16.msra.mxu1 %v6686_v32 }
0x300c   : > { %6688 = vmatprep.subr.bf16.mxu1 %v7140_v0 }
0x300f   : > { %6690 = vmatpush3.bf16.msra.mxu1 %v6689_v36 }
0x3010   : > { %6691 = vmatprep.subr.bf16.mxu1 %v7140_v0 }
0x3013   : > { %6693 = vmatpush3.bf16.msra.mxu1 %v6692_v11 }
0x3014   : > { %6694 = vmatprep.subr.bf16.mxu1 %v7140_v0  ;;  %v6092_v0 = vld [vmem:[%s8408_s30 + $0x70] sm:$0xff] }
0x3015   : > { %v6695_v46 = vpack.c.bf16 %v6093_v26, %v6092_v0 }
0x3017   : > { %6696 = vmatpush3.bf16.msra.mxu1 %v6695_v46 }
0x3098   : > { %v5543_v15 = vpop.xlane.xlu1 %5542 }
0x3099   : > { %v5544_v18 = vmul.f32 0.03125, %v5543_v15 }
0x309b   : > { %v5545_v19 = vsub.f32 %v5536_v12, %v5544_v18 }
0x309d   : > { %v5546_v20 = vmul.f32 %v5545_v19, %v5545_v19 }
0x309f   : > { %v5547_v22 = vsel %vm789_vm1, %v5546_v20, 0.0 }
0x30a0   : > { %5548 = vadd.xlane.f32.xlu1 %v5547_v22 }
0x312d   : > { %v5549_v38 = vpop.xlane.xlu1 %5548 }
0x312e   : > { %v5550_v39 = vmul.f32 0.03125, %v5549_v38 }
0x3130   : > { %v5551_v40 = vadd.f32 1e-05, %v5550_v39 }
0x3132   : > { %6872 = vrsqrt.f32 %v5551_v40 }
0x313c   : > { %v6873_v41 = vpop.eup %6872 }
0x313d   : > { %v5553_v17 = vmul.f32 %v6873_v41, %v5545_v19 }
0x313f   : > { %v5560_v44 = vmul.f32 %v6081_v42, %v5553_v17 }
0x3141   : > { %v5567_v45 = vadd.f32 %v6082_v43, %v5560_v44 }
0x3143   : > { %6604 = vmatmul.mubr.msk.f32.vlgmr.msra.gmra.mrb[58].mxu0 %vm789_vm1, %v5567_v45 }
0x3216   : > { %v5650_v48 = vpop.f32.mrb[58].mxu0 }
0x3217   : > { %v5651_v49 = vadd.f32 %v6084_v47, %v5650_v48  ;;  %v6605_v50 = vpop.f32.mrb[59].mxu0 }
0x3219   : > { %v5654_v51 = vmax.f32 %v5651_v49, 0.0 }
0x321b   : > { %6623 = vmatmul.mubr.msk.f32.vlgmr.msra.gmra.mrb[54].mxu1 %vm3170_vm3, %v5654_v51 }
0x32ee   : > { %v5741_v16 = vpop.f32.mrb[54].mxu1 }
0x32ef   : > { %v5742_v33 = vadd.f32 %v6095_v52, %v5741_v16  ;;  %v6624_v53 = vpop.f32.mrb[55].mxu1 }
0x32f1   : > { %v5745_v54 = vadd.f32 %v5742_v33, %v5567_v45 }
0x32f3   : > { %v5750_v55 = vsel %vm789_vm1, %v5745_v54, 0.0 }
0x32f4   : > { %5751 = vadd.xlane.f32.xlu1 %v5750_v55 }
0x3381   : > { %v5752_v24 = vpop.xlane.xlu1 %5751 }
0x3382   : > { %v5753_v56 = vmul.f32 0.03125, %v5752_v24 }
0x3384   : > { %v5754_v57 = vsub.f32 %v5745_v54, %v5753_v56 }
0x3386   : > { %v5755_v58 = vmul.f32 %v5754_v57, %v5754_v57 }
0x3388   : > { %v5756_v59 = vsel %vm789_vm1, %v5755_v58, 0.0 }
0x3389   : > { %5757 = vadd.xlane.f32.xlu1 %v5756_v59 }
0x3416   : > { %v5758_v60 = vpop.xlane.xlu1 %5757 }
0x3417   : > { %v5759_v61 = vmul.f32 0.03125, %v5758_v60 }
0x3419   : > { %v5760_v62 = vadd.f32 1e-05, %v5759_v61 }
0x341b   : > { %6874 = vrsqrt.f32 %v5760_v62 }
0x3425   : > { %v6875_v8 = vpop.eup %6874 }
0x3426   : > { %v5762_v2 = vmul.f32 %v6875_v8, %v5754_v57 }
0x3428   : > { %v5769_v35 = vmul.f32 %v6099_v63, %v5762_v2 }
0x342a   : > { %v5776_v4 = vadd.f32 %v6100_v3, %v5769_v35 }
0x342c   : > { %5777 = vst.msk [vmem:[%s770_s4] sm:$0xff] %vm789_vm1, %v5776_v4 }
0x342d   : > { %7065 = shalt.err (!%p7062_p2)
}
0x342e   : > { %s7066_s24 = scalar_lea.hbm %s8218_s28, 128  ;;  %s7070_s15 = scalar_lea.hbm %s8425_s18, 256 }
0x342f   : > { %p7067_p8 = scmp.ne.s32.totalorder %s8218_s28, %s7066_s24  ;;  %p7071_p1 = scmp.lt.u32.totalorder %s8218_s28, %s8425_s18 }
0x3430   : > { %p7072_p6 = scmp.lt.u32.totalorder %s7070_s15, %s7066_s24  ;;  %p7074_p0 = scmp.lt.u32.totalorder %s7066_s24, %s8218_s28 }
0x3431   : > { %p7068_p11 = pnand %p7067_p8, %p8426_p4 }
0x3432   : > { %p7073_p10 = por %p7072_p6, %p7071_p1 }
0x3433   : > { %p7069_p12 = pneg %p7068_p11 }
0x3434   : > { %p7075_p9 = por %p7074_p0, %p7073_p10 }
0x3436   : > { %p7076_p13 = pnand %p7075_p9, %p7069_p12 }
0x3438   : > { %7079 = shalt.err (!%p7076_p13)
}
0x3439   : > { %6715 = dma.vmem_to_hbm [thread:$0]  (%p8426_p4), %s8220_s3, 128, %s8218_s28, %s5779_s11  }
0x343a PF: > { %s8427_s5 = sld [smem:[#allocation19_spill]]  ;;  %s8428_s4 = sld [smem:[#allocation21_spill]] }
0x343b   : > { %s8429_s1 = sld [smem:[#allocation20_spill]] }
0x3440   : > { %s5804_s27 = sand.u32 1, %s8427_s5   ;;  %p8430_p7 = scmp.ne.s32.totalorder %s8428_s4, 0 }
0x3441   : > { %p8431_p3 = scmp.ge.s32.totalorder %s8429_s1, 2  ;;  %s5805_s25 = scalar_lea.sflag [#allocation4], %s5804_s27 }
0x3443   : > { %p6738_p5 = pnand %p8431_p3, %p8430_p7 }
0x3445   : > { %7113 = dma.done.wait (!%p6738_p5), %s5805_s25, 128  }
0x3446   : > { %7115 = vsyncadd (!%p6738_p5), %s5805_s25, 4294967168  ;;  %s8432_s24 = sld [smem:[#allocation22_spill]]  ;;  %s8433_s2 = sld [smem:[#allocation23_spill]] }
0x3447   : > { %s8434_s1 = smov %s7122_s22  ;;  %s8435_s22 = smov %s7126_s23 }
0x344c   : > { %p38_p2 = scmp.ge.s32.totalorder %s8432_s24, 4   ;;  %s8436_s23 = smov %s8433_s2 }
0x344e   :  { %40 = sbr.rel (!%p38_p2) target bundleno = 30 (0x1e), region = 208 }
0x3455   :  { %5810 = vsyncpa [#allocation3], 1 }
0x3456   :  { %5812 = vsyncpa [#allocation3 + $0x1], 1 }
0x3457   :  { %5813 = vsyncpa [#allocation6], 1 }
0x3458   :  { %5815 = vsyncpa [#allocation6 + $0x1], 1 }
0x3459   :  { %5816 = vsyncpa [#allocation9], 1 }
0x345a   :  { %5817 = vsyncpa [#allocation12], 1 }
0x345b   :  { %5818 = vsyncpa [#allocation4], 1 }
0x345c   :  { %5820 = vsyncpa [#allocation4 + $0x1], 1 }

</bundles_post_ra>
